<compile_context>
chip_gen: v7x
topology: tpu7x:2x2x1
jax: 0.10.0
libtpu: 0.0.40
codegen_flags: <defaults>
</compile_context>

<pallas_src>
import functools

import jax
import jax.numpy as jnp
import numpy as np
from jax.experimental import pallas as pl
from jax.experimental.pallas import tpu as pltpu


def _round_up(x, m):
    return (x + m - 1) // m * m


def _gru_encoder_kernel(
    x_ref,       # (T*B_pad, D)        time-major, batch-padded inputs
    wih0_ref,    # (D, 3*H_pad)        layer-0 input weights (gate blocks at H_pad boundaries)
    bgi0_ref,    # (1, 3*H_pad)        folded layer-0 gi bias: [bir+bhr | biz+bhz | bin]
    whh0_ref,    # (H_pad, 3*H_pad)    layer-0 hidden weights
    bhn0_ref,    # (1, H_pad)          layer-0 b_hn (kept separate: r*(Whn h + bhn))
    w1_ref,      # (2*H_pad, 6*H_pad)  layer-1 block-diagonal pack [Wih1 | 0 ; 0 | Whh1]
    b1_ref,      # (1, 6*H_pad)        folded layer-1 bias: [bir+bhr | biz+bhz | bin | 0 | 0 | bhn]
    wout_ref,    # (H_pad, D)          linear_out weight (transposed, zero-padded rows)
    bout_ref,    # (1, D)
    o_ref,       # (B_pad, D)
    *, T, B_pad, H_pad,
):
    Hp = H_pad

    # Layer-0 input projection for ALL timesteps in one MXU pass (+ folded r/z/n biases).
    gi0_all = (
        jnp.dot(x_ref[...], wih0_ref[...], preferred_element_type=jnp.float32)
        + bgi0_ref[...]
    )  # (T*B_pad, 3*Hp)

    # Hoist weight/bias loads out of the recurrence.
    whh0 = whh0_ref[...]
    bhn0 = bhn0_ref[...]
    w1 = w1_ref[...]
    b1 = b1_ref[...]

    h0 = jnp.zeros((B_pad, Hp), jnp.float32)
    h1 = jnp.zeros((B_pad, Hp), jnp.float32)

    # T is a static Python int: this loop is fully unrolled at trace time.  All slice
    # offsets are static and aligned to (8, 128) tiles, so slicing is free vreg selection.
    for t in range(T):
        gi0 = gi0_all[t * B_pad:(t + 1) * B_pad, :]                      # (B_pad, 3*Hp)

        # ---- layer 0: PyTorch-semantics GRU cell ----
        gh0 = jnp.dot(h0, whh0, preferred_element_type=jnp.float32)      # (B_pad, 3*Hp)
        r0 = jax.nn.sigmoid(gi0[:, 0 * Hp:1 * Hp] + gh0[:, 0 * Hp:1 * Hp])
        z0 = jax.nn.sigmoid(gi0[:, 1 * Hp:2 * Hp] + gh0[:, 1 * Hp:2 * Hp])
        n0 = jnp.tanh(gi0[:, 2 * Hp:3 * Hp] + r0 * (gh0[:, 2 * Hp:3 * Hp] + bhn0))
        h0 = (1.0 - z0) * n0 + z0 * h0

        # ---- layer 1: input+hidden projections fused into a single dot ----
        xh = jnp.concatenate([h0, h1], axis=1)                           # (B_pad, 2*Hp)
        g1 = jnp.dot(xh, w1, preferred_element_type=jnp.float32) + b1    # (B_pad, 6*Hp)
        r1 = jax.nn.sigmoid(g1[:, 0 * Hp:1 * Hp] + g1[:, 3 * Hp:4 * Hp])
        z1 = jax.nn.sigmoid(g1[:, 1 * Hp:2 * Hp] + g1[:, 4 * Hp:5 * Hp])
        n1 = jnp.tanh(g1[:, 2 * Hp:3 * Hp] + r1 * g1[:, 5 * Hp:6 * Hp])
        h1 = (1.0 - z1) * n1 + z1 * h1

    # linear_out applied to the last timestep of the top layer.
    o_ref[...] = (
        jnp.dot(h1, wout_ref[...], preferred_element_type=jnp.float32) + bout_ref[...]
    )


def _pad_gates_wT(w, in_pad, H, H_pad):
    """PyTorch (3H, in) gate-stacked weight -> transposed (in_pad, 3*H_pad) where each
    gate block (r, z, n) starts at a multiple of H_pad; extra rows/cols are zero."""
    in_dim = w.shape[1]
    out = jnp.zeros((in_pad, 3 * H_pad), jnp.float32)
    for g in range(3):
        out = out.at[:in_dim, g * H_pad:g * H_pad + H].set(w[g * H:(g + 1) * H, :].T)
    return out


def _pad_gates_b(b, H, H_pad):
    out = jnp.zeros((3 * H_pad,), jnp.float32)
    for g in range(3):
        out = out.at[g * H_pad:g * H_pad + H].set(b[g * H:(g + 1) * H])
    return out


@jax.jit
def gru_encoder_pallas(x, params):
    """x: (B, T, D) float32 (batch_first, like the PyTorch module). Returns (B, D)."""
    B, T, D = x.shape
    H = params["w_hh0"].shape[1]
    B_pad = _round_up(max(B, 8), 8)     # full sublane tile
    H_pad = _round_up(H, 128)           # each gate = whole 128-lane vreg(s)

    # Input prep: pad batch, go time-major, flatten to (T*B_pad, D) so the layer-0
    # projection is one dot and per-step slices are sublane-tile aligned.
    x_p = jnp.pad(x.astype(jnp.float32), ((0, B_pad - B), (0, 0), (0, 0)))
    x_tm = jnp.transpose(x_p, (1, 0, 2)).reshape(T * B_pad, D)

    # --- layer-0 params ---
    wih0_p = _pad_gates_wT(params["w_ih0"], D, H, H_pad)        # (D, 3*H_pad)
    whh0_p = _pad_gates_wT(params["w_hh0"], H_pad, H, H_pad)    # (H_pad, 3*H_pad)
    b_gi0 = _pad_gates_b(
        jnp.concatenate([params["b_ih0"][:2 * H] + params["b_hh0"][:2 * H],
                         params["b_ih0"][2 * H:]]),
        H, H_pad).reshape(1, -1)                                # (1, 3*H_pad)
    b_hn0 = jnp.zeros((1, H_pad), jnp.float32).at[0, :H].set(params["b_hh0"][2 * H:])

    # --- layer-1 params: block-diagonal pack so gi and gh come out of ONE dot ---
    wih1_p = _pad_gates_wT(params["w_ih1"], H_pad, H, H_pad)    # (H_pad, 3*H_pad)
    whh1_p = _pad_gates_wT(params["w_hh1"], H_pad, H, H_pad)    # (H_pad, 3*H_pad)
    w1_packed = jnp.zeros((2 * H_pad, 6 * H_pad), jnp.float32)
    w1_packed = w1_packed.at[:H_pad, :3 * H_pad].set(wih1_p)
    w1_packed = w1_packed.at[H_pad:, 3 * H_pad:].set(whh1_p)
    b1_gi = _pad_gates_b(
        jnp.concatenate([params["b_ih1"][:2 * H] + params["b_hh1"][:2 * H],
                         params["b_ih1"][2 * H:]]),
        H, H_pad)
    b1_gh = jnp.zeros((3 * H_pad,), jnp.float32).at[2 * H_pad:2 * H_pad + H].set(
        params["b_hh1"][2 * H:])
    b1_packed = jnp.concatenate([b1_gi, b1_gh]).reshape(1, -1)  # (1, 6*H_pad)

    # --- linear_out params ---
    wout_p = jnp.zeros((H_pad, D), jnp.float32).at[:H, :].set(params["w_out"].T)
    bout = params["b_out"].reshape(1, -1)

    kernel = functools.partial(_gru_encoder_kernel, T=T, B_pad=B_pad, H_pad=H_pad)

    out = pl.pallas_call(
        kernel,
        out_shape=jax.ShapeDtypeStruct((B_pad, D), jnp.float32),
        in_specs=[pl.BlockSpec(memory_space=pltpu.MemorySpace.VMEM) for _ in range(9)],
        out_specs=pl.BlockSpec(memory_space=pltpu.MemorySpace.VMEM),
    )(x_tm, wih0_p, b_gi0, whh0_p, b_hn0, w1_packed, b1_packed, wout_p, bout)

    return out[:B]


# ----------------------------- pure-JAX reference -----------------------------

def _gru_cell(x, h, wih_t, whh_t, bih, bhh, H):
    """One PyTorch-semantics GRU cell (unpadded). Weights pre-transposed: (in, 3H)."""
    gi = jnp.dot(x, wih_t, preferred_element_type=jnp.float32) + bih
    gh = jnp.dot(h, whh_t, preferred_element_type=jnp.float32) + bhh
    r = jax.nn.sigmoid(gi[:, 0 * H:1 * H] + gh[:, 0 * H:1 * H])
    z = jax.nn.sigmoid(gi[:, 1 * H:2 * H] + gh[:, 1 * H:2 * H])
    n = jnp.tanh(gi[:, 2 * H:3 * H] + r * gh[:, 2 * H:3 * H])
    return (1.0 - z) * n + z * h


def gru_encoder_ref(x, params):
    """Mirrors torch.nn.GRU(num_layers=2, batch_first=True) + Linear on last step."""
    B, T, D = x.shape
    H = params["w_hh0"].shape[1]
    h0 = jnp.zeros((B, H), jnp.float32)
    h1 = jnp.zeros((B, H), jnp.float32)
    for t in range(T):
        h0 = _gru_cell(x[:, t], h0, params["w_ih0"].T, params["w_hh0"].T,
                       params["b_ih0"][None, :], params["b_hh0"][None, :], H)
        h1 = _gru_cell(h0, h1, params["w_ih1"].T, params["w_hh1"].T,
                       params["b_ih1"][None, :], params["b_hh1"][None, :], H)
    return h1 @ params["w_out"].T + params["b_out"][None, :]


def make_params(key, dimension, hidden_units):
    """Deterministic init matching the PyTorch shapes (uniform(-1/sqrt(H), 1/sqrt(H)))."""
    D, H = dimension, hidden_units
    k = 1.0 / np.sqrt(H)
    names_shapes = [
        ("w_ih0", (3 * H, D)), ("w_hh0", (3 * H, H)), ("b_ih0", (3 * H,)), ("b_hh0", (3 * H,)),
        ("w_ih1", (3 * H, H)), ("w_hh1", (3 * H, H)), ("b_ih1", (3 * H,)), ("b_hh1", (3 * H,)),
        ("w_out", (D, H)), ("b_out", (D,)),
    ]
    keys = jax.random.split(key, len(names_shapes))
    return {
        name: jax.random.uniform(kk, shape, jnp.float32, minval=-k, maxval=k)
        for kk, (name, shape) in zip(keys, names_shapes)
    }


if __name__ == "__main__":
    B, T, D, H = 2, 8, 4, 32  # batch, seq len, feature dimension, hidden units

    root = jax.random.PRNGKey(0)
    kx, kp = jax.random.split(root)
    x = jax.random.normal(kx, (B, T, D), dtype=jnp.float32)
    params = make_params(kp, D, H)

    out = jax.block_until_ready(gru_encoder_pallas(x, params))
    ref = jax.block_until_ready(gru_encoder_ref(x, params))

    np.testing.assert_allclose(np.asarray(out), np.asarray(ref), rtol=2e-3, atol=2e-3)
    assert out.shape == (B, D)
    print("KERNEL_OK")
</pallas_src>

<mosaic_0001>
module attributes {stable_mosaic.version = 11 : i64} {
  func.func @_gru_encoder_kernel(%arg0: memref<64x4xf32, #tpu.memory_space<vmem>>, %arg1: memref<4x384xf32, #tpu.memory_space<vmem>>, %arg2: memref<1x384xf32, #tpu.memory_space<vmem>>, %arg3: memref<128x384xf32, #tpu.memory_space<vmem>>, %arg4: memref<1x128xf32, #tpu.memory_space<vmem>>, %arg5: memref<256x768xf32, #tpu.memory_space<vmem>>, %arg6: memref<1x768xf32, #tpu.memory_space<vmem>>, %arg7: memref<128x4xf32, #tpu.memory_space<vmem>>, %arg8: memref<1x4xf32, #tpu.memory_space<vmem>>, %arg9: memref<8x4xf32, #tpu.memory_space<vmem>>) attributes {dimension_semantics = [], scalar_prefetch = 0 : i64, scratch_operands = 0 : i64, tpu.core_type = #tpu.core_type<tc>} {
    %c0 = arith.constant 0 : index
    %c0_0 = arith.constant 0 : index
    %0 = vector.load %arg0[%c0, %c0_0] : memref<64x4xf32, #tpu.memory_space<vmem>>, vector<64x4xf32>
    %c0_1 = arith.constant 0 : index
    %c0_2 = arith.constant 0 : index
    %1 = vector.load %arg1[%c0_1, %c0_2] : memref<4x384xf32, #tpu.memory_space<vmem>>, vector<4x384xf32>
    %cst = arith.constant dense<0.000000e+00> : vector<64x384xf32>
    %2 = tpu.matmul %0, %1, %cst {dimension_numbers = #tpu.dot_dimension_numbers<[1], [0], [0], [1], [0, 0, 1, 1], [], []>} : vector<64x4xf32>, vector<4x384xf32>, vector<64x384xf32> -> vector<64x384xf32>
    %c0_3 = arith.constant 0 : index
    %c0_4 = arith.constant 0 : index
    %3 = vector.load %arg2[%c0_3, %c0_4] : memref<1x384xf32, #tpu.memory_space<vmem>>, vector<1x384xf32>
    %4 = vector.broadcast %3 : vector<1x384xf32> to vector<64x384xf32>
    %5 = arith.addf %2, %4 : vector<64x384xf32>
    %c0_5 = arith.constant 0 : index
    %c0_6 = arith.constant 0 : index
    %6 = vector.load %arg3[%c0_5, %c0_6] : memref<128x384xf32, #tpu.memory_space<vmem>>, vector<128x384xf32>
    %c0_7 = arith.constant 0 : index
    %c0_8 = arith.constant 0 : index
    %7 = vector.load %arg4[%c0_7, %c0_8] : memref<1x128xf32, #tpu.memory_space<vmem>>, vector<1x128xf32>
    %c0_9 = arith.constant 0 : index
    %c0_10 = arith.constant 0 : index
    %8 = vector.load %arg5[%c0_9, %c0_10] : memref<256x768xf32, #tpu.memory_space<vmem>>, vector<256x768xf32>
    %c0_11 = arith.constant 0 : index
    %c0_12 = arith.constant 0 : index
    %9 = vector.load %arg6[%c0_11, %c0_12] : memref<1x768xf32, #tpu.memory_space<vmem>>, vector<1x768xf32>
    %cst_13 = arith.constant 0.000000e+00 : f32
    %10 = vector.broadcast %cst_13 : f32 to vector<8x128xf32>
    %cst_14 = arith.constant 0.000000e+00 : f32
    %11 = vector.broadcast %cst_14 : f32 to vector<8x128xf32>
    %12 = vector.extract_strided_slice %5 {offsets = [0, 0], sizes = [8, 384], strides = [1, 1]} : vector<64x384xf32> to vector<8x384xf32>
    %cst_15 = arith.constant dense<0.000000e+00> : vector<8x384xf32>
    %13 = tpu.matmul %10, %6, %cst_15 {dimension_numbers = #tpu.dot_dimension_numbers<[1], [0], [0], [1], [0, 0, 1, 1], [], []>} : vector<8x128xf32>, vector<128x384xf32>, vector<8x384xf32> -> vector<8x384xf32>
    %14 = vector.extract_strided_slice %12 {offsets = [0, 0], sizes = [8, 128], strides = [1, 1]} : vector<8x384xf32> to vector<8x128xf32>
    %15 = vector.extract_strided_slice %13 {offsets = [0, 0], sizes = [8, 128], strides = [1, 1]} : vector<8x384xf32> to vector<8x128xf32>
    %16 = arith.addf %14, %15 : vector<8x128xf32>
    %17 = arith.negf %16 : vector<8x128xf32>
    %18 = math.exp %17 : vector<8x128xf32>
    %cst_16 = arith.constant 1.000000e+00 : f32
    %19 = vector.broadcast %cst_16 : f32 to vector<8x128xf32>
    %20 = arith.addf %19, %18 : vector<8x128xf32>
    %21 = arith.divf %19, %20 : vector<8x128xf32>
    %22 = vector.extract_strided_slice %12 {offsets = [0, 128], sizes = [8, 128], strides = [1, 1]} : vector<8x384xf32> to vector<8x128xf32>
    %23 = vector.extract_strided_slice %13 {offsets = [0, 128], sizes = [8, 128], strides = [1, 1]} : vector<8x384xf32> to vector<8x128xf32>
    %24 = arith.addf %22, %23 : vector<8x128xf32>
    %25 = arith.negf %24 : vector<8x128xf32>
    %26 = math.exp %25 : vector<8x128xf32>
    %cst_17 = arith.constant 1.000000e+00 : f32
    %27 = vector.broadcast %cst_17 : f32 to vector<8x128xf32>
    %28 = arith.addf %27, %26 : vector<8x128xf32>
    %29 = arith.divf %27, %28 : vector<8x128xf32>
    %30 = vector.extract_strided_slice %12 {offsets = [0, 256], sizes = [8, 128], strides = [1, 1]} : vector<8x384xf32> to vector<8x128xf32>
    %31 = vector.extract_strided_slice %13 {offsets = [0, 256], sizes = [8, 128], strides = [1, 1]} : vector<8x384xf32> to vector<8x128xf32>
    %32 = vector.broadcast %7 : vector<1x128xf32> to vector<8x128xf32>
    %33 = arith.addf %31, %32 : vector<8x128xf32>
    %34 = arith.mulf %21, %33 : vector<8x128xf32>
    %35 = arith.addf %30, %34 : vector<8x128xf32>
    %36 = math.tanh %35 : vector<8x128xf32>
    %cst_18 = arith.constant 1.000000e+00 : f32
    %37 = vector.broadcast %cst_18 : f32 to vector<8x128xf32>
    %38 = arith.subf %37, %29 : vector<8x128xf32>
    %39 = arith.mulf %38, %36 : vector<8x128xf32>
    %40 = arith.mulf %29, %10 : vector<8x128xf32>
    %41 = arith.addf %39, %40 : vector<8x128xf32>
    %42 = tpu.concatenate %41, %11 in 1 : vector<8x128xf32>, vector<8x128xf32> -> vector<8x256xf32>
    %cst_19 = arith.constant dense<0.000000e+00> : vector<8x768xf32>
    %43 = tpu.matmul %42, %8, %cst_19 {dimension_numbers = #tpu.dot_dimension_numbers<[1], [0], [0], [1], [0, 0, 1, 1], [], []>} : vector<8x256xf32>, vector<256x768xf32>, vector<8x768xf32> -> vector<8x768xf32>
    %44 = vector.broadcast %9 : vector<1x768xf32> to vector<8x768xf32>
    %45 = arith.addf %43, %44 : vector<8x768xf32>
    %46 = vector.extract_strided_slice %45 {offsets = [0, 0], sizes = [8, 128], strides = [1, 1]} : vector<8x768xf32> to vector<8x128xf32>
    %47 = vector.extract_strided_slice %45 {offsets = [0, 384], sizes = [8, 128], strides = [1, 1]} : vector<8x768xf32> to vector<8x128xf32>
    %48 = arith.addf %46, %47 : vector<8x128xf32>
    %49 = arith.negf %48 : vector<8x128xf32>
    %50 = math.exp %49 : vector<8x128xf32>
    %cst_20 = arith.constant 1.000000e+00 : f32
    %51 = vector.broadcast %cst_20 : f32 to vector<8x128xf32>
    %52 = arith.addf %51, %50 : vector<8x128xf32>
    %53 = arith.divf %51, %52 : vector<8x128xf32>
    %54 = vector.extract_strided_slice %45 {offsets = [0, 128], sizes = [8, 128], strides = [1, 1]} : vector<8x768xf32> to vector<8x128xf32>
    %55 = vector.extract_strided_slice %45 {offsets = [0, 512], sizes = [8, 128], strides = [1, 1]} : vector<8x768xf32> to vector<8x128xf32>
    %56 = arith.addf %54, %55 : vector<8x128xf32>
    %57 = arith.negf %56 : vector<8x128xf32>
    %58 = math.exp %57 : vector<8x128xf32>
    %cst_21 = arith.constant 1.000000e+00 : f32
    %59 = vector.broadcast %cst_21 : f32 to vector<8x128xf32>
    %60 = arith.addf %59, %58 : vector<8x128xf32>
    %61 = arith.divf %59, %60 : vector<8x128xf32>
    %62 = vector.extract_strided_slice %45 {offsets = [0, 256], sizes = [8, 128], strides = [1, 1]} : vector<8x768xf32> to vector<8x128xf32>
    %63 = vector.extract_strided_slice %45 {offsets = [0, 640], sizes = [8, 128], strides = [1, 1]} : vector<8x768xf32> to vector<8x128xf32>
    %64 = arith.mulf %53, %63 : vector<8x128xf32>
    %65 = arith.addf %62, %64 : vector<8x128xf32>
    %66 = math.tanh %65 : vector<8x128xf32>
    %cst_22 = arith.constant 1.000000e+00 : f32
    %67 = vector.broadcast %cst_22 : f32 to vector<8x128xf32>
    %68 = arith.subf %67, %61 : vector<8x128xf32>
    %69 = arith.mulf %68, %66 : vector<8x128xf32>
    %70 = arith.mulf %61, %11 : vector<8x128xf32>
    %71 = arith.addf %69, %70 : vector<8x128xf32>
    %72 = vector.extract_strided_slice %5 {offsets = [8, 0], sizes = [8, 384], strides = [1, 1]} : vector<64x384xf32> to vector<8x384xf32>
    %cst_23 = arith.constant dense<0.000000e+00> : vector<8x384xf32>
    %73 = tpu.matmul %41, %6, %cst_23 {dimension_numbers = #tpu.dot_dimension_numbers<[1], [0], [0], [1], [0, 0, 1, 1], [], []>} : vector<8x128xf32>, vector<128x384xf32>, vector<8x384xf32> -> vector<8x384xf32>
    %74 = vector.extract_strided_slice %72 {offsets = [0, 0], sizes = [8, 128], strides = [1, 1]} : vector<8x384xf32> to vector<8x128xf32>
    %75 = vector.extract_strided_slice %73 {offsets = [0, 0], sizes = [8, 128], strides = [1, 1]} : vector<8x384xf32> to vector<8x128xf32>
    %76 = arith.addf %74, %75 : vector<8x128xf32>
    %77 = arith.negf %76 : vector<8x128xf32>
    %78 = math.exp %77 : vector<8x128xf32>
    %cst_24 = arith.constant 1.000000e+00 : f32
    %79 = vector.broadcast %cst_24 : f32 to vector<8x128xf32>
    %80 = arith.addf %79, %78 : vector<8x128xf32>
    %81 = arith.divf %79, %80 : vector<8x128xf32>
    %82 = vector.extract_strided_slice %72 {offsets = [0, 128], sizes = [8, 128], strides = [1, 1]} : vector<8x384xf32> to vector<8x128xf32>
    %83 = vector.extract_strided_slice %73 {offsets = [0, 128], sizes = [8, 128], strides = [1, 1]} : vector<8x384xf32> to vector<8x128xf32>
    %84 = arith.addf %82, %83 : vector<8x128xf32>
    %85 = arith.negf %84 : vector<8x128xf32>
    %86 = math.exp %85 : vector<8x128xf32>
    %cst_25 = arith.constant 1.000000e+00 : f32
    %87 = vector.broadcast %cst_25 : f32 to vector<8x128xf32>
    %88 = arith.addf %87, %86 : vector<8x128xf32>
    %89 = arith.divf %87, %88 : vector<8x128xf32>
    %90 = vector.extract_strided_slice %72 {offsets = [0, 256], sizes = [8, 128], strides = [1, 1]} : vector<8x384xf32> to vector<8x128xf32>
    %91 = vector.extract_strided_slice %73 {offsets = [0, 256], sizes = [8, 128], strides = [1, 1]} : vector<8x384xf32> to vector<8x128xf32>
    %92 = vector.broadcast %7 : vector<1x128xf32> to vector<8x128xf32>
    %93 = arith.addf %91, %92 : vector<8x128xf32>
    %94 = arith.mulf %81, %93 : vector<8x128xf32>
    %95 = arith.addf %90, %94 : vector<8x128xf32>
    %96 = math.tanh %95 : vector<8x128xf32>
    %cst_26 = arith.constant 1.000000e+00 : f32
    %97 = vector.broadcast %cst_26 : f32 to vector<8x128xf32>
    %98 = arith.subf %97, %89 : vector<8x128xf32>
    %99 = arith.mulf %98, %96 : vector<8x128xf32>
    %100 = arith.mulf %89, %41 : vector<8x128xf32>
    %101 = arith.addf %99, %100 : vector<8x128xf32>
    %102 = tpu.concatenate %101, %71 in 1 : vector<8x128xf32>, vector<8x128xf32> -> vector<8x256xf32>
    %cst_27 = arith.constant dense<0.000000e+00> : vector<8x768xf32>
    %103 = tpu.matmul %102, %8, %cst_27 {dimension_numbers = #tpu.dot_dimension_numbers<[1], [0], [0], [1], [0, 0, 1, 1], [], []>} : vector<8x256xf32>, vector<256x768xf32>, vector<8x768xf32> -> vector<8x768xf32>
    %104 = vector.broadcast %9 : vector<1x768xf32> to vector<8x768xf32>
    %105 = arith.addf %103, %104 : vector<8x768xf32>
    %106 = vector.extract_strided_slice %105 {offsets = [0, 0], sizes = [8, 128], strides = [1, 1]} : vector<8x768xf32> to vector<8x128xf32>
    %107 = vector.extract_strided_slice %105 {offsets = [0, 384], sizes = [8, 128], strides = [1, 1]} : vector<8x768xf32> to vector<8x128xf32>
    %108 = arith.addf %106, %107 : vector<8x128xf32>
    %109 = arith.negf %108 : vector<8x128xf32>
    %110 = math.exp %109 : vector<8x128xf32>
    %cst_28 = arith.constant 1.000000e+00 : f32
    %111 = vector.broadcast %cst_28 : f32 to vector<8x128xf32>
    %112 = arith.addf %111, %110 : vector<8x128xf32>
    %113 = arith.divf %111, %112 : vector<8x128xf32>
    %114 = vector.extract_strided_slice %105 {offsets = [0, 128], sizes = [8, 128], strides = [1, 1]} : vector<8x768xf32> to vector<8x128xf32>
    %115 = vector.extract_strided_slice %105 {offsets = [0, 512], sizes = [8, 128], strides = [1, 1]} : vector<8x768xf32> to vector<8x128xf32>
    %116 = arith.addf %114, %115 : vector<8x128xf32>
    %117 = arith.negf %116 : vector<8x128xf32>
    %118 = math.exp %117 : vector<8x128xf32>
    %cst_29 = arith.constant 1.000000e+00 : f32
    %119 = vector.broadcast %cst_29 : f32 to vector<8x128xf32>
    %120 = arith.addf %119, %118 : vector<8x128xf32>
    %121 = arith.divf %119, %120 : vector<8x128xf32>
    %122 = vector.extract_strided_slice %105 {offsets = [0, 256], sizes = [8, 128], strides = [1, 1]} : vector<8x768xf32> to vector<8x128xf32>
    %123 = vector.extract_strided_slice %105 {offsets = [0, 640], sizes = [8, 128], strides = [1, 1]} : vector<8x768xf32> to vector<8x128xf32>
    %124 = arith.mulf %113, %123 : vector<8x128xf32>
    %125 = arith.addf %122, %124 : vector<8x128xf32>
    %126 = math.tanh %125 : vector<8x128xf32>
    %cst_30 = arith.constant 1.000000e+00 : f32
    %127 = vector.broadcast %cst_30 : f32 to vector<8x128xf32>
    %128 = arith.subf %127, %121 : vector<8x128xf32>
    %129 = arith.mulf %128, %126 : vector<8x128xf32>
    %130 = arith.mulf %121, %71 : vector<8x128xf32>
    %131 = arith.addf %129, %130 : vector<8x128xf32>
    %132 = vector.extract_strided_slice %5 {offsets = [16, 0], sizes = [8, 384], strides = [1, 1]} : vector<64x384xf32> to vector<8x384xf32>
    %cst_31 = arith.constant dense<0.000000e+00> : vector<8x384xf32>
    %133 = tpu.matmul %101, %6, %cst_31 {dimension_numbers = #tpu.dot_dimension_numbers<[1], [0], [0], [1], [0, 0, 1, 1], [], []>} : vector<8x128xf32>, vector<128x384xf32>, vector<8x384xf32> -> vector<8x384xf32>
    %134 = vector.extract_strided_slice %132 {offsets = [0, 0], sizes = [8, 128], strides = [1, 1]} : vector<8x384xf32> to vector<8x128xf32>
    %135 = vector.extract_strided_slice %133 {offsets = [0, 0], sizes = [8, 128], strides = [1, 1]} : vector<8x384xf32> to vector<8x128xf32>
    %136 = arith.addf %134, %135 : vector<8x128xf32>
    %137 = arith.negf %136 : vector<8x128xf32>
    %138 = math.exp %137 : vector<8x128xf32>
    %cst_32 = arith.constant 1.000000e+00 : f32
    %139 = vector.broadcast %cst_32 : f32 to vector<8x128xf32>
    %140 = arith.addf %139, %138 : vector<8x128xf32>
    %141 = arith.divf %139, %140 : vector<8x128xf32>
    %142 = vector.extract_strided_slice %132 {offsets = [0, 128], sizes = [8, 128], strides = [1, 1]} : vector<8x384xf32> to vector<8x128xf32>
    %143 = vector.extract_strided_slice %133 {offsets = [0, 128], sizes = [8, 128], strides = [1, 1]} : vector<8x384xf32> to vector<8x128xf32>
    %144 = arith.addf %142, %143 : vector<8x128xf32>
    %145 = arith.negf %144 : vector<8x128xf32>
    %146 = math.exp %145 : vector<8x128xf32>
    %cst_33 = arith.constant 1.000000e+00 : f32
    %147 = vector.broadcast %cst_33 : f32 to vector<8x128xf32>
    %148 = arith.addf %147, %146 : vector<8x128xf32>
    %149 = arith.divf %147, %148 : vector<8x128xf32>
    %150 = vector.extract_strided_slice %132 {offsets = [0, 256], sizes = [8, 128], strides = [1, 1]} : vector<8x384xf32> to vector<8x128xf32>
    %151 = vector.extract_strided_slice %133 {offsets = [0, 256], sizes = [8, 128], strides = [1, 1]} : vector<8x384xf32> to vector<8x128xf32>
    %152 = vector.broadcast %7 : vector<1x128xf32> to vector<8x128xf32>
    %153 = arith.addf %151, %152 : vector<8x128xf32>
    %154 = arith.mulf %141, %153 : vector<8x128xf32>
    %155 = arith.addf %150, %154 : vector<8x128xf32>
    %156 = math.tanh %155 : vector<8x128xf32>
    %cst_34 = arith.constant 1.000000e+00 : f32
    %157 = vector.broadcast %cst_34 : f32 to vector<8x128xf32>
    %158 = arith.subf %157, %149 : vector<8x128xf32>
    %159 = arith.mulf %158, %156 : vector<8x128xf32>
    %160 = arith.mulf %149, %101 : vector<8x128xf32>
    %161 = arith.addf %159, %160 : vector<8x128xf32>
    %162 = tpu.concatenate %161, %131 in 1 : vector<8x128xf32>, vector<8x128xf32> -> vector<8x256xf32>
    %cst_35 = arith.constant dense<0.000000e+00> : vector<8x768xf32>
    %163 = tpu.matmul %162, %8, %cst_35 {dimension_numbers = #tpu.dot_dimension_numbers<[1], [0], [0], [1], [0, 0, 1, 1], [], []>} : vector<8x256xf32>, vector<256x768xf32>, vector<8x768xf32> -> vector<8x768xf32>
    %164 = vector.broadcast %9 : vector<1x768xf32> to vector<8x768xf32>
    %165 = arith.addf %163, %164 : vector<8x768xf32>
    %166 = vector.extract_strided_slice %165 {offsets = [0, 0], sizes = [8, 128], strides = [1, 1]} : vector<8x768xf32> to vector<8x128xf32>
    %167 = vector.extract_strided_slice %165 {offsets = [0, 384], sizes = [8, 128], strides = [1, 1]} : vector<8x768xf32> to vector<8x128xf32>
    %168 = arith.addf %166, %167 : vector<8x128xf32>
    %169 = arith.negf %168 : vector<8x128xf32>
    %170 = math.exp %169 : vector<8x128xf32>
    %cst_36 = arith.constant 1.000000e+00 : f32
    %171 = vector.broadcast %cst_36 : f32 to vector<8x128xf32>
    %172 = arith.addf %171, %170 : vector<8x128xf32>
    %173 = arith.divf %171, %172 : vector<8x128xf32>
    %174 = vector.extract_strided_slice %165 {offsets = [0, 128], sizes = [8, 128], strides = [1, 1]} : vector<8x768xf32> to vector<8x128xf32>
    %175 = vector.extract_strided_slice %165 {offsets = [0, 512], sizes = [8, 128], strides = [1, 1]} : vector<8x768xf32> to vector<8x128xf32>
    %176 = arith.addf %174, %175 : vector<8x128xf32>
    %177 = arith.negf %176 : vector<8x128xf32>
    %178 = math.exp %177 : vector<8x128xf32>
    %cst_37 = arith.constant 1.000000e+00 : f32
    %179 = vector.broadcast %cst_37 : f32 to vector<8x128xf32>
    %180 = arith.addf %179, %178 : vector<8x128xf32>
    %181 = arith.divf %179, %180 : vector<8x128xf32>
    %182 = vector.extract_strided_slice %165 {offsets = [0, 256], sizes = [8, 128], strides = [1, 1]} : vector<8x768xf32> to vector<8x128xf32>
    %183 = vector.extract_strided_slice %165 {offsets = [0, 640], sizes = [8, 128], strides = [1, 1]} : vector<8x768xf32> to vector<8x128xf32>
    %184 = arith.mulf %173, %183 : vector<8x128xf32>
    %185 = arith.addf %182, %184 : vector<8x128xf32>
    %186 = math.tanh %185 : vector<8x128xf32>
    %cst_38 = arith.constant 1.000000e+00 : f32
    %187 = vector.broadcast %cst_38 : f32 to vector<8x128xf32>
    %188 = arith.subf %187, %181 : vector<8x128xf32>
    %189 = arith.mulf %188, %186 : vector<8x128xf32>
    %190 = arith.mulf %181, %131 : vector<8x128xf32>
    %191 = arith.addf %189, %190 : vector<8x128xf32>
    %192 = vector.extract_strided_slice %5 {offsets = [24, 0], sizes = [8, 384], strides = [1, 1]} : vector<64x384xf32> to vector<8x384xf32>
    %cst_39 = arith.constant dense<0.000000e+00> : vector<8x384xf32>
    %193 = tpu.matmul %161, %6, %cst_39 {dimension_numbers = #tpu.dot_dimension_numbers<[1], [0], [0], [1], [0, 0, 1, 1], [], []>} : vector<8x128xf32>, vector<128x384xf32>, vector<8x384xf32> -> vector<8x384xf32>
    %194 = vector.extract_strided_slice %192 {offsets = [0, 0], sizes = [8, 128], strides = [1, 1]} : vector<8x384xf32> to vector<8x128xf32>
    %195 = vector.extract_strided_slice %193 {offsets = [0, 0], sizes = [8, 128], strides = [1, 1]} : vector<8x384xf32> to vector<8x128xf32>
    %196 = arith.addf %194, %195 : vector<8x128xf32>
    %197 = arith.negf %196 : vector<8x128xf32>
    %198 = math.exp %197 : vector<8x128xf32>
    %cst_40 = arith.constant 1.000000e+00 : f32
    %199 = vector.broadcast %cst_40 : f32 to vector<8x128xf32>
    %200 = arith.addf %199, %198 : vector<8x128xf32>
    %201 = arith.divf %199, %200 : vector<8x128xf32>
    %202 = vector.extract_strided_slice %192 {offsets = [0, 128], sizes = [8, 128], strides = [1, 1]} : vector<8x384xf32> to vector<8x128xf32>
    %203 = vector.extract_strided_slice %193 {offsets = [0, 128], sizes = [8, 128], strides = [1, 1]} : vector<8x384xf32> to vector<8x128xf32>
    %204 = arith.addf %202, %203 : vector<8x128xf32>
    %205 = arith.negf %204 : vector<8x128xf32>
    %206 = math.exp %205 : vector<8x128xf32>
    %cst_41 = arith.constant 1.000000e+00 : f32
    %207 = vector.broadcast %cst_41 : f32 to vector<8x128xf32>
    %208 = arith.addf %207, %206 : vector<8x128xf32>
    %209 = arith.divf %207, %208 : vector<8x128xf32>
    %210 = vector.extract_strided_slice %192 {offsets = [0, 256], sizes = [8, 128], strides = [1, 1]} : vector<8x384xf32> to vector<8x128xf32>
    %211 = vector.extract_strided_slice %193 {offsets = [0, 256], sizes = [8, 128], strides = [1, 1]} : vector<8x384xf32> to vector<8x128xf32>
    %212 = vector.broadcast %7 : vector<1x128xf32> to vector<8x128xf32>
    %213 = arith.addf %211, %212 : vector<8x128xf32>
    %214 = arith.mulf %201, %213 : vector<8x128xf32>
    %215 = arith.addf %210, %214 : vector<8x128xf32>
    %216 = math.tanh %215 : vector<8x128xf32>
    %cst_42 = arith.constant 1.000000e+00 : f32
    %217 = vector.broadcast %cst_42 : f32 to vector<8x128xf32>
    %218 = arith.subf %217, %209 : vector<8x128xf32>
    %219 = arith.mulf %218, %216 : vector<8x128xf32>
    %220 = arith.mulf %209, %161 : vector<8x128xf32>
    %221 = arith.addf %219, %220 : vector<8x128xf32>
    %222 = tpu.concatenate %221, %191 in 1 : vector<8x128xf32>, vector<8x128xf32> -> vector<8x256xf32>
    %cst_43 = arith.constant dense<0.000000e+00> : vector<8x768xf32>
    %223 = tpu.matmul %222, %8, %cst_43 {dimension_numbers = #tpu.dot_dimension_numbers<[1], [0], [0], [1], [0, 0, 1, 1], [], []>} : vector<8x256xf32>, vector<256x768xf32>, vector<8x768xf32> -> vector<8x768xf32>
    %224 = vector.broadcast %9 : vector<1x768xf32> to vector<8x768xf32>
    %225 = arith.addf %223, %224 : vector<8x768xf32>
    %226 = vector.extract_strided_slice %225 {offsets = [0, 0], sizes = [8, 128], strides = [1, 1]} : vector<8x768xf32> to vector<8x128xf32>
    %227 = vector.extract_strided_slice %225 {offsets = [0, 384], sizes = [8, 128], strides = [1, 1]} : vector<8x768xf32> to vector<8x128xf32>
    %228 = arith.addf %226, %227 : vector<8x128xf32>
    %229 = arith.negf %228 : vector<8x128xf32>
    %230 = math.exp %229 : vector<8x128xf32>
    %cst_44 = arith.constant 1.000000e+00 : f32
    %231 = vector.broadcast %cst_44 : f32 to vector<8x128xf32>
    %232 = arith.addf %231, %230 : vector<8x128xf32>
    %233 = arith.divf %231, %232 : vector<8x128xf32>
    %234 = vector.extract_strided_slice %225 {offsets = [0, 128], sizes = [8, 128], strides = [1, 1]} : vector<8x768xf32> to vector<8x128xf32>
    %235 = vector.extract_strided_slice %225 {offsets = [0, 512], sizes = [8, 128], strides = [1, 1]} : vector<8x768xf32> to vector<8x128xf32>
    %236 = arith.addf %234, %235 : vector<8x128xf32>
    %237 = arith.negf %236 : vector<8x128xf32>
    %238 = math.exp %237 : vector<8x128xf32>
    %cst_45 = arith.constant 1.000000e+00 : f32
    %239 = vector.broadcast %cst_45 : f32 to vector<8x128xf32>
    %240 = arith.addf %239, %238 : vector<8x128xf32>
    %241 = arith.divf %239, %240 : vector<8x128xf32>
    %242 = vector.extract_strided_slice %225 {offsets = [0, 256], sizes = [8, 128], strides = [1, 1]} : vector<8x768xf32> to vector<8x128xf32>
    %243 = vector.extract_strided_slice %225 {offsets = [0, 640], sizes = [8, 128], strides = [1, 1]} : vector<8x768xf32> to vector<8x128xf32>
    %244 = arith.mulf %233, %243 : vector<8x128xf32>
    %245 = arith.addf %242, %244 : vector<8x128xf32>
    %246 = math.tanh %245 : vector<8x128xf32>
    %cst_46 = arith.constant 1.000000e+00 : f32
    %247 = vector.broadcast %cst_46 : f32 to vector<8x128xf32>
    %248 = arith.subf %247, %241 : vector<8x128xf32>
    %249 = arith.mulf %248, %246 : vector<8x128xf32>
    %250 = arith.mulf %241, %191 : vector<8x128xf32>
    %251 = arith.addf %249, %250 : vector<8x128xf32>
    %252 = vector.extract_strided_slice %5 {offsets = [32, 0], sizes = [8, 384], strides = [1, 1]} : vector<64x384xf32> to vector<8x384xf32>
    %cst_47 = arith.constant dense<0.000000e+00> : vector<8x384xf32>
    %253 = tpu.matmul %221, %6, %cst_47 {dimension_numbers = #tpu.dot_dimension_numbers<[1], [0], [0], [1], [0, 0, 1, 1], [], []>} : vector<8x128xf32>, vector<128x384xf32>, vector<8x384xf32> -> vector<8x384xf32>
    %254 = vector.extract_strided_slice %252 {offsets = [0, 0], sizes = [8, 128], strides = [1, 1]} : vector<8x384xf32> to vector<8x128xf32>
    %255 = vector.extract_strided_slice %253 {offsets = [0, 0], sizes = [8, 128], strides = [1, 1]} : vector<8x384xf32> to vector<8x128xf32>
    %256 = arith.addf %254, %255 : vector<8x128xf32>
    %257 = arith.negf %256 : vector<8x128xf32>
    %258 = math.exp %257 : vector<8x128xf32>
    %cst_48 = arith.constant 1.000000e+00 : f32
    %259 = vector.broadcast %cst_48 : f32 to vector<8x128xf32>
    %260 = arith.addf %259, %258 : vector<8x128xf32>
    %261 = arith.divf %259, %260 : vector<8x128xf32>
    %262 = vector.extract_strided_slice %252 {offsets = [0, 128], sizes = [8, 128], strides = [1, 1]} : vector<8x384xf32> to vector<8x128xf32>
    %263 = vector.extract_strided_slice %253 {offsets = [0, 128], sizes = [8, 128], strides = [1, 1]} : vector<8x384xf32> to vector<8x128xf32>
    %264 = arith.addf %262, %263 : vector<8x128xf32>
    %265 = arith.negf %264 : vector<8x128xf32>
    %266 = math.exp %265 : vector<8x128xf32>
    %cst_49 = arith.constant 1.000000e+00 : f32
    %267 = vector.broadcast %cst_49 : f32 to vector<8x128xf32>
    %268 = arith.addf %267, %266 : vector<8x128xf32>
    %269 = arith.divf %267, %268 : vector<8x128xf32>
    %270 = vector.extract_strided_slice %252 {offsets = [0, 256], sizes = [8, 128], strides = [1, 1]} : vector<8x384xf32> to vector<8x128xf32>
    %271 = vector.extract_strided_slice %253 {offsets = [0, 256], sizes = [8, 128], strides = [1, 1]} : vector<8x384xf32> to vector<8x128xf32>
    %272 = vector.broadcast %7 : vector<1x128xf32> to vector<8x128xf32>
    %273 = arith.addf %271, %272 : vector<8x128xf32>
    %274 = arith.mulf %261, %273 : vector<8x128xf32>
    %275 = arith.addf %270, %274 : vector<8x128xf32>
    %276 = math.tanh %275 : vector<8x128xf32>
    %cst_50 = arith.constant 1.000000e+00 : f32
    %277 = vector.broadcast %cst_50 : f32 to vector<8x128xf32>
    %278 = arith.subf %277, %269 : vector<8x128xf32>
    %279 = arith.mulf %278, %276 : vector<8x128xf32>
    %280 = arith.mulf %269, %221 : vector<8x128xf32>
    %281 = arith.addf %279, %280 : vector<8x128xf32>
    %282 = tpu.concatenate %281, %251 in 1 : vector<8x128xf32>, vector<8x128xf32> -> vector<8x256xf32>
    %cst_51 = arith.constant dense<0.000000e+00> : vector<8x768xf32>
    %283 = tpu.matmul %282, %8, %cst_51 {dimension_numbers = #tpu.dot_dimension_numbers<[1], [0], [0], [1], [0, 0, 1, 1], [], []>} : vector<8x256xf32>, vector<256x768xf32>, vector<8x768xf32> -> vector<8x768xf32>
    %284 = vector.broadcast %9 : vector<1x768xf32> to vector<8x768xf32>
    %285 = arith.addf %283, %284 : vector<8x768xf32>
    %286 = vector.extract_strided_slice %285 {offsets = [0, 0], sizes = [8, 128], strides = [1, 1]} : vector<8x768xf32> to vector<8x128xf32>
    %287 = vector.extract_strided_slice %285 {offsets = [0, 384], sizes = [8, 128], strides = [1, 1]} : vector<8x768xf32> to vector<8x128xf32>
    %288 = arith.addf %286, %287 : vector<8x128xf32>
    %289 = arith.negf %288 : vector<8x128xf32>
    %290 = math.exp %289 : vector<8x128xf32>
    %cst_52 = arith.constant 1.000000e+00 : f32
    %291 = vector.broadcast %cst_52 : f32 to vector<8x128xf32>
    %292 = arith.addf %291, %290 : vector<8x128xf32>
    %293 = arith.divf %291, %292 : vector<8x128xf32>
    %294 = vector.extract_strided_slice %285 {offsets = [0, 128], sizes = [8, 128], strides = [1, 1]} : vector<8x768xf32> to vector<8x128xf32>
    %295 = vector.extract_strided_slice %285 {offsets = [0, 512], sizes = [8, 128], strides = [1, 1]} : vector<8x768xf32> to vector<8x128xf32>
    %296 = arith.addf %294, %295 : vector<8x128xf32>
    %297 = arith.negf %296 : vector<8x128xf32>
    %298 = math.exp %297 : vector<8x128xf32>
    %cst_53 = arith.constant 1.000000e+00 : f32
    %299 = vector.broadcast %cst_53 : f32 to vector<8x128xf32>
    %300 = arith.addf %299, %298 : vector<8x128xf32>
    %301 = arith.divf %299, %300 : vector<8x128xf32>
    %302 = vector.extract_strided_slice %285 {offsets = [0, 256], sizes = [8, 128], strides = [1, 1]} : vector<8x768xf32> to vector<8x128xf32>
    %303 = vector.extract_strided_slice %285 {offsets = [0, 640], sizes = [8, 128], strides = [1, 1]} : vector<8x768xf32> to vector<8x128xf32>
    %304 = arith.mulf %293, %303 : vector<8x128xf32>
    %305 = arith.addf %302, %304 : vector<8x128xf32>
    %306 = math.tanh %305 : vector<8x128xf32>
    %cst_54 = arith.constant 1.000000e+00 : f32
    %307 = vector.broadcast %cst_54 : f32 to vector<8x128xf32>
    %308 = arith.subf %307, %301 : vector<8x128xf32>
    %309 = arith.mulf %308, %306 : vector<8x128xf32>
    %310 = arith.mulf %301, %251 : vector<8x128xf32>
    %311 = arith.addf %309, %310 : vector<8x128xf32>
    %312 = vector.extract_strided_slice %5 {offsets = [40, 0], sizes = [8, 384], strides = [1, 1]} : vector<64x384xf32> to vector<8x384xf32>
    %cst_55 = arith.constant dense<0.000000e+00> : vector<8x384xf32>
    %313 = tpu.matmul %281, %6, %cst_55 {dimension_numbers = #tpu.dot_dimension_numbers<[1], [0], [0], [1], [0, 0, 1, 1], [], []>} : vector<8x128xf32>, vector<128x384xf32>, vector<8x384xf32> -> vector<8x384xf32>
    %314 = vector.extract_strided_slice %312 {offsets = [0, 0], sizes = [8, 128], strides = [1, 1]} : vector<8x384xf32> to vector<8x128xf32>
    %315 = vector.extract_strided_slice %313 {offsets = [0, 0], sizes = [8, 128], strides = [1, 1]} : vector<8x384xf32> to vector<8x128xf32>
    %316 = arith.addf %314, %315 : vector<8x128xf32>
    %317 = arith.negf %316 : vector<8x128xf32>
    %318 = math.exp %317 : vector<8x128xf32>
    %cst_56 = arith.constant 1.000000e+00 : f32
    %319 = vector.broadcast %cst_56 : f32 to vector<8x128xf32>
    %320 = arith.addf %319, %318 : vector<8x128xf32>
    %321 = arith.divf %319, %320 : vector<8x128xf32>
    %322 = vector.extract_strided_slice %312 {offsets = [0, 128], sizes = [8, 128], strides = [1, 1]} : vector<8x384xf32> to vector<8x128xf32>
    %323 = vector.extract_strided_slice %313 {offsets = [0, 128], sizes = [8, 128], strides = [1, 1]} : vector<8x384xf32> to vector<8x128xf32>
    %324 = arith.addf %322, %323 : vector<8x128xf32>
    %325 = arith.negf %324 : vector<8x128xf32>
    %326 = math.exp %325 : vector<8x128xf32>
    %cst_57 = arith.constant 1.000000e+00 : f32
    %327 = vector.broadcast %cst_57 : f32 to vector<8x128xf32>
    %328 = arith.addf %327, %326 : vector<8x128xf32>
    %329 = arith.divf %327, %328 : vector<8x128xf32>
    %330 = vector.extract_strided_slice %312 {offsets = [0, 256], sizes = [8, 128], strides = [1, 1]} : vector<8x384xf32> to vector<8x128xf32>
    %331 = vector.extract_strided_slice %313 {offsets = [0, 256], sizes = [8, 128], strides = [1, 1]} : vector<8x384xf32> to vector<8x128xf32>
    %332 = vector.broadcast %7 : vector<1x128xf32> to vector<8x128xf32>
    %333 = arith.addf %331, %332 : vector<8x128xf32>
    %334 = arith.mulf %321, %333 : vector<8x128xf32>
    %335 = arith.addf %330, %334 : vector<8x128xf32>
    %336 = math.tanh %335 : vector<8x128xf32>
    %cst_58 = arith.constant 1.000000e+00 : f32
    %337 = vector.broadcast %cst_58 : f32 to vector<8x128xf32>
    %338 = arith.subf %337, %329 : vector<8x128xf32>
    %339 = arith.mulf %338, %336 : vector<8x128xf32>
    %340 = arith.mulf %329, %281 : vector<8x128xf32>
    %341 = arith.addf %339, %340 : vector<8x128xf32>
    %342 = tpu.concatenate %341, %311 in 1 : vector<8x128xf32>, vector<8x128xf32> -> vector<8x256xf32>
    %cst_59 = arith.constant dense<0.000000e+00> : vector<8x768xf32>
    %343 = tpu.matmul %342, %8, %cst_59 {dimension_numbers = #tpu.dot_dimension_numbers<[1], [0], [0], [1], [0, 0, 1, 1], [], []>} : vector<8x256xf32>, vector<256x768xf32>, vector<8x768xf32> -> vector<8x768xf32>
    %344 = vector.broadcast %9 : vector<1x768xf32> to vector<8x768xf32>
    %345 = arith.addf %343, %344 : vector<8x768xf32>
    %346 = vector.extract_strided_slice %345 {offsets = [0, 0], sizes = [8, 128], strides = [1, 1]} : vector<8x768xf32> to vector<8x128xf32>
    %347 = vector.extract_strided_slice %345 {offsets = [0, 384], sizes = [8, 128], strides = [1, 1]} : vector<8x768xf32> to vector<8x128xf32>
    %348 = arith.addf %346, %347 : vector<8x128xf32>
    %349 = arith.negf %348 : vector<8x128xf32>
    %350 = math.exp %349 : vector<8x128xf32>
    %cst_60 = arith.constant 1.000000e+00 : f32
    %351 = vector.broadcast %cst_60 : f32 to vector<8x128xf32>
    %352 = arith.addf %351, %350 : vector<8x128xf32>
    %353 = arith.divf %351, %352 : vector<8x128xf32>
    %354 = vector.extract_strided_slice %345 {offsets = [0, 128], sizes = [8, 128], strides = [1, 1]} : vector<8x768xf32> to vector<8x128xf32>
    %355 = vector.extract_strided_slice %345 {offsets = [0, 512], sizes = [8, 128], strides = [1, 1]} : vector<8x768xf32> to vector<8x128xf32>
    %356 = arith.addf %354, %355 : vector<8x128xf32>
    %357 = arith.negf %356 : vector<8x128xf32>
    %358 = math.exp %357 : vector<8x128xf32>
    %cst_61 = arith.constant 1.000000e+00 : f32
    %359 = vector.broadcast %cst_61 : f32 to vector<8x128xf32>
    %360 = arith.addf %359, %358 : vector<8x128xf32>
    %361 = arith.divf %359, %360 : vector<8x128xf32>
    %362 = vector.extract_strided_slice %345 {offsets = [0, 256], sizes = [8, 128], strides = [1, 1]} : vector<8x768xf32> to vector<8x128xf32>
    %363 = vector.extract_strided_slice %345 {offsets = [0, 640], sizes = [8, 128], strides = [1, 1]} : vector<8x768xf32> to vector<8x128xf32>
    %364 = arith.mulf %353, %363 : vector<8x128xf32>
    %365 = arith.addf %362, %364 : vector<8x128xf32>
    %366 = math.tanh %365 : vector<8x128xf32>
    %cst_62 = arith.constant 1.000000e+00 : f32
    %367 = vector.broadcast %cst_62 : f32 to vector<8x128xf32>
    %368 = arith.subf %367, %361 : vector<8x128xf32>
    %369 = arith.mulf %368, %366 : vector<8x128xf32>
    %370 = arith.mulf %361, %311 : vector<8x128xf32>
    %371 = arith.addf %369, %370 : vector<8x128xf32>
    %372 = vector.extract_strided_slice %5 {offsets = [48, 0], sizes = [8, 384], strides = [1, 1]} : vector<64x384xf32> to vector<8x384xf32>
    %cst_63 = arith.constant dense<0.000000e+00> : vector<8x384xf32>
    %373 = tpu.matmul %341, %6, %cst_63 {dimension_numbers = #tpu.dot_dimension_numbers<[1], [0], [0], [1], [0, 0, 1, 1], [], []>} : vector<8x128xf32>, vector<128x384xf32>, vector<8x384xf32> -> vector<8x384xf32>
    %374 = vector.extract_strided_slice %372 {offsets = [0, 0], sizes = [8, 128], strides = [1, 1]} : vector<8x384xf32> to vector<8x128xf32>
    %375 = vector.extract_strided_slice %373 {offsets = [0, 0], sizes = [8, 128], strides = [1, 1]} : vector<8x384xf32> to vector<8x128xf32>
    %376 = arith.addf %374, %375 : vector<8x128xf32>
    %377 = arith.negf %376 : vector<8x128xf32>
    %378 = math.exp %377 : vector<8x128xf32>
    %cst_64 = arith.constant 1.000000e+00 : f32
    %379 = vector.broadcast %cst_64 : f32 to vector<8x128xf32>
    %380 = arith.addf %379, %378 : vector<8x128xf32>
    %381 = arith.divf %379, %380 : vector<8x128xf32>
    %382 = vector.extract_strided_slice %372 {offsets = [0, 128], sizes = [8, 128], strides = [1, 1]} : vector<8x384xf32> to vector<8x128xf32>
    %383 = vector.extract_strided_slice %373 {offsets = [0, 128], sizes = [8, 128], strides = [1, 1]} : vector<8x384xf32> to vector<8x128xf32>
    %384 = arith.addf %382, %383 : vector<8x128xf32>
    %385 = arith.negf %384 : vector<8x128xf32>
    %386 = math.exp %385 : vector<8x128xf32>
    %cst_65 = arith.constant 1.000000e+00 : f32
    %387 = vector.broadcast %cst_65 : f32 to vector<8x128xf32>
    %388 = arith.addf %387, %386 : vector<8x128xf32>
    %389 = arith.divf %387, %388 : vector<8x128xf32>
    %390 = vector.extract_strided_slice %372 {offsets = [0, 256], sizes = [8, 128], strides = [1, 1]} : vector<8x384xf32> to vector<8x128xf32>
    %391 = vector.extract_strided_slice %373 {offsets = [0, 256], sizes = [8, 128], strides = [1, 1]} : vector<8x384xf32> to vector<8x128xf32>
    %392 = vector.broadcast %7 : vector<1x128xf32> to vector<8x128xf32>
    %393 = arith.addf %391, %392 : vector<8x128xf32>
    %394 = arith.mulf %381, %393 : vector<8x128xf32>
    %395 = arith.addf %390, %394 : vector<8x128xf32>
    %396 = math.tanh %395 : vector<8x128xf32>
    %cst_66 = arith.constant 1.000000e+00 : f32
    %397 = vector.broadcast %cst_66 : f32 to vector<8x128xf32>
    %398 = arith.subf %397, %389 : vector<8x128xf32>
    %399 = arith.mulf %398, %396 : vector<8x128xf32>
    %400 = arith.mulf %389, %341 : vector<8x128xf32>
    %401 = arith.addf %399, %400 : vector<8x128xf32>
    %402 = tpu.concatenate %401, %371 in 1 : vector<8x128xf32>, vector<8x128xf32> -> vector<8x256xf32>
    %cst_67 = arith.constant dense<0.000000e+00> : vector<8x768xf32>
    %403 = tpu.matmul %402, %8, %cst_67 {dimension_numbers = #tpu.dot_dimension_numbers<[1], [0], [0], [1], [0, 0, 1, 1], [], []>} : vector<8x256xf32>, vector<256x768xf32>, vector<8x768xf32> -> vector<8x768xf32>
    %404 = vector.broadcast %9 : vector<1x768xf32> to vector<8x768xf32>
    %405 = arith.addf %403, %404 : vector<8x768xf32>
    %406 = vector.extract_strided_slice %405 {offsets = [0, 0], sizes = [8, 128], strides = [1, 1]} : vector<8x768xf32> to vector<8x128xf32>
    %407 = vector.extract_strided_slice %405 {offsets = [0, 384], sizes = [8, 128], strides = [1, 1]} : vector<8x768xf32> to vector<8x128xf32>
    %408 = arith.addf %406, %407 : vector<8x128xf32>
    %409 = arith.negf %408 : vector<8x128xf32>
    %410 = math.exp %409 : vector<8x128xf32>
    %cst_68 = arith.constant 1.000000e+00 : f32
    %411 = vector.broadcast %cst_68 : f32 to vector<8x128xf32>
    %412 = arith.addf %411, %410 : vector<8x128xf32>
    %413 = arith.divf %411, %412 : vector<8x128xf32>
    %414 = vector.extract_strided_slice %405 {offsets = [0, 128], sizes = [8, 128], strides = [1, 1]} : vector<8x768xf32> to vector<8x128xf32>
    %415 = vector.extract_strided_slice %405 {offsets = [0, 512], sizes = [8, 128], strides = [1, 1]} : vector<8x768xf32> to vector<8x128xf32>
    %416 = arith.addf %414, %415 : vector<8x128xf32>
    %417 = arith.negf %416 : vector<8x128xf32>
    %418 = math.exp %417 : vector<8x128xf32>
    %cst_69 = arith.constant 1.000000e+00 : f32
    %419 = vector.broadcast %cst_69 : f32 to vector<8x128xf32>
    %420 = arith.addf %419, %418 : vector<8x128xf32>
    %421 = arith.divf %419, %420 : vector<8x128xf32>
    %422 = vector.extract_strided_slice %405 {offsets = [0, 256], sizes = [8, 128], strides = [1, 1]} : vector<8x768xf32> to vector<8x128xf32>
    %423 = vector.extract_strided_slice %405 {offsets = [0, 640], sizes = [8, 128], strides = [1, 1]} : vector<8x768xf32> to vector<8x128xf32>
    %424 = arith.mulf %413, %423 : vector<8x128xf32>
    %425 = arith.addf %422, %424 : vector<8x128xf32>
    %426 = math.tanh %425 : vector<8x128xf32>
    %cst_70 = arith.constant 1.000000e+00 : f32
    %427 = vector.broadcast %cst_70 : f32 to vector<8x128xf32>
    %428 = arith.subf %427, %421 : vector<8x128xf32>
    %429 = arith.mulf %428, %426 : vector<8x128xf32>
    %430 = arith.mulf %421, %371 : vector<8x128xf32>
    %431 = arith.addf %429, %430 : vector<8x128xf32>
    %432 = vector.extract_strided_slice %5 {offsets = [56, 0], sizes = [8, 384], strides = [1, 1]} : vector<64x384xf32> to vector<8x384xf32>
    %cst_71 = arith.constant dense<0.000000e+00> : vector<8x384xf32>
    %433 = tpu.matmul %401, %6, %cst_71 {dimension_numbers = #tpu.dot_dimension_numbers<[1], [0], [0], [1], [0, 0, 1, 1], [], []>} : vector<8x128xf32>, vector<128x384xf32>, vector<8x384xf32> -> vector<8x384xf32>
    %434 = vector.extract_strided_slice %432 {offsets = [0, 0], sizes = [8, 128], strides = [1, 1]} : vector<8x384xf32> to vector<8x128xf32>
    %435 = vector.extract_strided_slice %433 {offsets = [0, 0], sizes = [8, 128], strides = [1, 1]} : vector<8x384xf32> to vector<8x128xf32>
    %436 = arith.addf %434, %435 : vector<8x128xf32>
    %437 = arith.negf %436 : vector<8x128xf32>
    %438 = math.exp %437 : vector<8x128xf32>
    %cst_72 = arith.constant 1.000000e+00 : f32
    %439 = vector.broadcast %cst_72 : f32 to vector<8x128xf32>
    %440 = arith.addf %439, %438 : vector<8x128xf32>
    %441 = arith.divf %439, %440 : vector<8x128xf32>
    %442 = vector.extract_strided_slice %432 {offsets = [0, 128], sizes = [8, 128], strides = [1, 1]} : vector<8x384xf32> to vector<8x128xf32>
    %443 = vector.extract_strided_slice %433 {offsets = [0, 128], sizes = [8, 128], strides = [1, 1]} : vector<8x384xf32> to vector<8x128xf32>
    %444 = arith.addf %442, %443 : vector<8x128xf32>
    %445 = arith.negf %444 : vector<8x128xf32>
    %446 = math.exp %445 : vector<8x128xf32>
    %cst_73 = arith.constant 1.000000e+00 : f32
    %447 = vector.broadcast %cst_73 : f32 to vector<8x128xf32>
    %448 = arith.addf %447, %446 : vector<8x128xf32>
    %449 = arith.divf %447, %448 : vector<8x128xf32>
    %450 = vector.extract_strided_slice %432 {offsets = [0, 256], sizes = [8, 128], strides = [1, 1]} : vector<8x384xf32> to vector<8x128xf32>
    %451 = vector.extract_strided_slice %433 {offsets = [0, 256], sizes = [8, 128], strides = [1, 1]} : vector<8x384xf32> to vector<8x128xf32>
    %452 = vector.broadcast %7 : vector<1x128xf32> to vector<8x128xf32>
    %453 = arith.addf %451, %452 : vector<8x128xf32>
    %454 = arith.mulf %441, %453 : vector<8x128xf32>
    %455 = arith.addf %450, %454 : vector<8x128xf32>
    %456 = math.tanh %455 : vector<8x128xf32>
    %cst_74 = arith.constant 1.000000e+00 : f32
    %457 = vector.broadcast %cst_74 : f32 to vector<8x128xf32>
    %458 = arith.subf %457, %449 : vector<8x128xf32>
    %459 = arith.mulf %458, %456 : vector<8x128xf32>
    %460 = arith.mulf %449, %401 : vector<8x128xf32>
    %461 = arith.addf %459, %460 : vector<8x128xf32>
    %462 = tpu.concatenate %461, %431 in 1 : vector<8x128xf32>, vector<8x128xf32> -> vector<8x256xf32>
    %cst_75 = arith.constant dense<0.000000e+00> : vector<8x768xf32>
    %463 = tpu.matmul %462, %8, %cst_75 {dimension_numbers = #tpu.dot_dimension_numbers<[1], [0], [0], [1], [0, 0, 1, 1], [], []>} : vector<8x256xf32>, vector<256x768xf32>, vector<8x768xf32> -> vector<8x768xf32>
    %464 = vector.broadcast %9 : vector<1x768xf32> to vector<8x768xf32>
    %465 = arith.addf %463, %464 : vector<8x768xf32>
    %466 = vector.extract_strided_slice %465 {offsets = [0, 0], sizes = [8, 128], strides = [1, 1]} : vector<8x768xf32> to vector<8x128xf32>
    %467 = vector.extract_strided_slice %465 {offsets = [0, 384], sizes = [8, 128], strides = [1, 1]} : vector<8x768xf32> to vector<8x128xf32>
    %468 = arith.addf %466, %467 : vector<8x128xf32>
    %469 = arith.negf %468 : vector<8x128xf32>
    %470 = math.exp %469 : vector<8x128xf32>
    %cst_76 = arith.constant 1.000000e+00 : f32
    %471 = vector.broadcast %cst_76 : f32 to vector<8x128xf32>
    %472 = arith.addf %471, %470 : vector<8x128xf32>
    %473 = arith.divf %471, %472 : vector<8x128xf32>
    %474 = vector.extract_strided_slice %465 {offsets = [0, 128], sizes = [8, 128], strides = [1, 1]} : vector<8x768xf32> to vector<8x128xf32>
    %475 = vector.extract_strided_slice %465 {offsets = [0, 512], sizes = [8, 128], strides = [1, 1]} : vector<8x768xf32> to vector<8x128xf32>
    %476 = arith.addf %474, %475 : vector<8x128xf32>
    %477 = arith.negf %476 : vector<8x128xf32>
    %478 = math.exp %477 : vector<8x128xf32>
    %cst_77 = arith.constant 1.000000e+00 : f32
    %479 = vector.broadcast %cst_77 : f32 to vector<8x128xf32>
    %480 = arith.addf %479, %478 : vector<8x128xf32>
    %481 = arith.divf %479, %480 : vector<8x128xf32>
    %482 = vector.extract_strided_slice %465 {offsets = [0, 256], sizes = [8, 128], strides = [1, 1]} : vector<8x768xf32> to vector<8x128xf32>
    %483 = vector.extract_strided_slice %465 {offsets = [0, 640], sizes = [8, 128], strides = [1, 1]} : vector<8x768xf32> to vector<8x128xf32>
    %484 = arith.mulf %473, %483 : vector<8x128xf32>
    %485 = arith.addf %482, %484 : vector<8x128xf32>
    %486 = math.tanh %485 : vector<8x128xf32>
    %cst_78 = arith.constant 1.000000e+00 : f32
    %487 = vector.broadcast %cst_78 : f32 to vector<8x128xf32>
    %488 = arith.subf %487, %481 : vector<8x128xf32>
    %489 = arith.mulf %488, %486 : vector<8x128xf32>
    %490 = arith.mulf %481, %431 : vector<8x128xf32>
    %491 = arith.addf %489, %490 : vector<8x128xf32>
    %c0_79 = arith.constant 0 : index
    %c0_80 = arith.constant 0 : index
    %492 = vector.load %arg7[%c0_79, %c0_80] : memref<128x4xf32, #tpu.memory_space<vmem>>, vector<128x4xf32>
    %cst_81 = arith.constant dense<0.000000e+00> : vector<8x4xf32>
    %493 = tpu.matmul %491, %492, %cst_81 {dimension_numbers = #tpu.dot_dimension_numbers<[1], [0], [0], [1], [0, 0, 1, 1], [], []>} : vector<8x128xf32>, vector<128x4xf32>, vector<8x4xf32> -> vector<8x4xf32>
    %c0_82 = arith.constant 0 : index
    %c0_83 = arith.constant 0 : index
    %494 = vector.load %arg8[%c0_82, %c0_83] : memref<1x4xf32, #tpu.memory_space<vmem>>, vector<1x4xf32>
    %495 = vector.broadcast %494 : vector<1x4xf32> to vector<8x4xf32>
    %496 = arith.addf %493, %495 : vector<8x4xf32>
    %c0_84 = arith.constant 0 : index
    %c0_85 = arith.constant 0 : index
    %497 = vector.load %arg9[%c0_84, %c0_85] : memref<8x4xf32, #tpu.memory_space<vmem>>, vector<8x4xf32>
    tpu.vector_store %arg9[%c0_84, %c0_85], %496 {strides = array<i32>} : memref<8x4xf32, #tpu.memory_space<vmem>>, vector<8x4xf32>,
    return
  }
}

</mosaic_0001>

<bundles_post_ra>
// kernel: gru_encoder_pallas.1
= control target key start
LH: loop header
LB: loop body
LE: loop exit
PB: predicated region body
PF: predicated region fallthrough
CT: control target
= control target key end

     0   :  { %vm87_vm0 = vcmask 1043456   ;;  %v9062_v1 = vmov 0.0   ;;  %vm62_vm1 = vcmask 31744   ;;  %v9064_v34 = vmov 0.0|0.0   ;;  %s9052_s1 = inlined_call_operand.vmem [shape: f32[4,384], index: 1, kind: input, shape index: {}]   ;;  %s9053_s0 = inlined_call_operand.vmem [shape: f32[64,4], index: 0, kind: input, shape index: {}]   ;;  %s9054_s3 = inlined_call_operand.vmem [shape: f32[128,384], index: 3, kind: input, shape index: {}]   ;;  %s9055_s5 = inlined_call_operand.vmem [shape: f32[256,768], index: 5, kind: input, shape index: {}]   ;;  %s9056_s2 = inlined_call_operand.vmem [shape: f32[1,384], index: 2, kind: input, shape index: {}]   ;;  %s9057_s4 = inlined_call_operand.vmem [shape: f32[1,128], index: 4, kind: input, shape index: {}]   ;;  %s9058_s6 = inlined_call_operand.vmem [shape: f32[1,768], index: 6, kind: input, shape index: {}]   ;;  %s9059_s7 = inlined_call_operand.vmem [shape: f32[128,4], index: 7, kind: input, shape index: {}]   ;;  %s9060_s8 = inlined_call_operand.vmem [shape: f32[1,4], index: 8, kind: input, shape index: {}]   ;;  %s9061_s9 = inlined_call_operand.vmem [shape: f32[8,4], index: 9, kind: output, shape index: {}]  }
   0x1   :  { %v40_v0 = vld [vmem:[%s9052_s1] sm:$0xff]  ;;  %158 = vmatprep.mubr.f32.mxu0 %v9062_v1  ;;  %v313_v3 = vld [vmem:[%s9054_s3 + $0x8] sm:$0xff]  ;;  %v315_v7 = vld [vmem:[%s9054_s3 + $0x18] sm:$0xff]  ;;  %vm6617_vm2 = vmmov 0  }
   0x2   :  { %v32_v2 = vld [vmem:[%s9053_s0] sm:$0xff]  ;;  %v61_v4 = vcombine.high %v40_v0, %v40_v0  ;;  %v319_v10 = vld [vmem:[%s9054_s3 + $0x38] sm:$0xff]  ;;  %v322_v11 = vld [vmem:[%s9054_s3 + $0x50] sm:$0xff] }
   0x3   :  { %v316_v5 = vld [vmem:[%s9054_s3 + $0x20] sm:$0xff]  ;;  %4082 = vmatprep.mubr.msk.f32.mxu1 %vm62_vm1, %v32_v2  ;;  %v6699_v12 = vpack.c.bf16 %v322_v11, %v319_v10  ;;  %v318_v13 = vld [vmem:[%s9054_s3 + $0x30] sm:$0xff]  ;;  %v321_v14 = vld [vmem:[%s9054_s3 + $0x48] sm:$0xff] }
   0x4   :  { %v312_v6 = vld [vmem:[%s9054_s3] sm:$0xff]  ;;  %v6688_v8 = vpack.c.bf16 %v316_v5, %v313_v3  ;;  %3865 = vmatprep.subr.msk.mxu0 %vm87_vm0, %v61_v4  ;;  %v325_v15 = vld [vmem:[%s9054_s3 + $0x68] sm:$0xff]  ;;  %v6721_v18 = vpack.c.bf16 %v321_v14, %v318_v13  ;;  %v327_v21 = vld [vmem:[%s9054_s3 + $0x78] sm:$0xff] }
   0x5   :  { %v6690_v9 = vpack.c.bf16 %v315_v7, %v312_v6  ;;  %9362 = vst [vmem:[#allocation4_spill] sm:$0xff] %v6699_v12  ;;  %3866 = vmatpush1.msk.msra.mxu0 %vm87_vm0, %v40_v0  ;;  %v328_v16 = vld [vmem:[%s9054_s3 + $0x80] sm:$0xff]  ;;  %v33_v17 = vld [vmem:[%s9053_s0 + $0x8] sm:$0xff]  ;;  %v331_v22 = vld [vmem:[%s9054_s3 + $0x98] sm:$0xff] }
   0x6   :  { %9360 = vst [vmem:[#allocation2_spill] sm:$0xff] %v6688_v8  ;;  %3867 = vmatmul.mubr.msk.f32.vlgmr.msra.gmra.mrb[0].mxu0 %vm62_vm1, %v32_v2  ;;  %4410 = vmatprep.subr.bf16.mxu0 %v6688_v8  ;;  %9363 = vst [vmem:[#allocation5_spill] sm:$0xff] %v6721_v18  ;;  %v6724_v19 = vpack.c.bf16 %v328_v16, %v325_v15  ;;  %v324_v20 = vld [vmem:[%s9054_s3 + $0x60] sm:$0xff]  ;;  %v334_v23 = vld [vmem:[%s9054_s3 + $0xb0] sm:$0xff] }
   0x7   :  { %9361 = vst [vmem:[#allocation3_spill] sm:$0xff] %v6690_v9  ;;  %4412 = vmatpush1.bf16.msra.mxu0 %v6690_v9  ;;  %164 = vmatprep.mubr.f32.mxu0 %v9062_v1  ;;  %v34_v24 = vld [vmem:[%s9053_s0 + $0x10] sm:$0xff]  ;;  %v6744_v25 = vpack.c.bf16 %v327_v21, %v324_v20  ;;  %v41_v26 = vld [vmem:[%s9052_s1 + $0x8] sm:$0xf]  ;;  %v6750_v27 = vpack.c.bf16 %v334_v23, %v331_v22  ;;  %v340_v31 = vld [vmem:[%s9054_s3 + $0xe0] sm:$0xff] }
   0x8   :  { %4414 = vmatprep.subr.bf16.mxu0 %v6699_v12  ;;  %9364 = vst [vmem:[#allocation6_spill] sm:$0xff] %v6724_v19  ;;  %v330_v28 = vld [vmem:[%s9054_s3 + $0x90] sm:$0xff]  ;;  %v333_v29 = vld [vmem:[%s9054_s3 + $0xa8] sm:$0xff]  ;;  %4080 = vmatprep.subr.msk.mxu1 %vm87_vm0, %v41_v26  ;;  %v35_v36 = vld [vmem:[%s9053_s0 + $0x18] sm:$0xff] }
   0x9   :  { %9365 = vst [vmem:[#allocation7_spill] sm:$0xff] %v6744_v25  ;;  %9366 = vst [vmem:[#allocation8_spill] sm:$0xff] %v6750_v27  ;;  %v337_v30 = vld [vmem:[%s9054_s3 + $0xc8] sm:$0xff]  ;;  %4081 = vmatpush3.msk.msra.mxu1 %vm87_vm0, %v41_v26  ;;  %v314_v32 = vld [vmem:[%s9054_s3 + $0x10] sm:$0xff]  ;;  %v6781_v37 = vpack.c.bf16 %v333_v29, %v330_v28 }
   0xa   :  { %3868 = vmatmul.mubr.msk.f32.gmra.mrb[2].mxu0 %vm62_vm1, %v33_v17  ;;  %v317_v33 = vld [vmem:[%s9054_s3 + $0x28] sm:$0xff]  ;;  %4441 = vmatprep.subr.bf16.mxu1 %v9064_v34  ;;  %v320_v38 = vld [vmem:[%s9054_s3 + $0x40] sm:$0xff]  ;;  %v6787_v39 = vpack.c.bf16 %v340_v31, %v337_v30  ;;  %v339_v41 = vld [vmem:[%s9054_s3 + $0xd8] sm:$0xff] }
   0xb   :  { %4416 = vmatpush1.bf16.msra.mxu0 %v6721_v18  ;;  %170 = vmatprep.mubr.f32.mxu0 %v9062_v1  ;;  %v6774_v35 = vpack.c.bf16 %v317_v33, %v314_v32  ;;  %9368 = vst [vmem:[#allocation10_spill] sm:$0xff] %v6781_v37  ;;  %v336_v40 = vld [vmem:[%s9054_s3 + $0xc0] sm:$0xff]  ;;  %v323_v42 = vld [vmem:[%s9054_s3 + $0x58] sm:$0xff]  ;;  %v346_v44 = vld [vmem:[%s9054_s3 + $0x110] sm:$0xff] }
   0xc   :  { %4418 = vmatprep.subr.bf16.mxu0 %v6724_v19  ;;  %9369 = vst [vmem:[#allocation11_spill] sm:$0xff] %v6787_v39  ;;  %4083 = vmatmul.mubr.msk.f32.vlgmr.msra.gmra.mrb[0].mxu1 %vm62_vm1, %v33_v17  ;;  %v343_v43 = vld [vmem:[%s9054_s3 + $0xf8] sm:$0xff]  ;;  %v6806_v45 = vpack.c.bf16 %v323_v42, %v320_v38  ;;  %v326_v46 = vld [vmem:[%s9054_s3 + $0x70] sm:$0xff]  ;;  %v329_v47 = vld [vmem:[%s9054_s3 + $0x88] sm:$0xff]  ;;  %v6822_v49 = vpack.c.bf16 %v339_v41, %v336_v40 }
   0xd   :  { %9367 = vst [vmem:[#allocation9_spill] sm:$0xff] %v6774_v35  ;;  %4443 = vmatpush3.bf16.msra.mxu1 %v6774_v35  ;;  %4085 = vmatprep.mubr.msk.f32.mxu1 %vm62_vm1, %v34_v24  ;;  %v36_v48 = vld [vmem:[%s9053_s0 + $0x20] sm:$0xff]  ;;  %v6825_v50 = vpack.c.bf16 %v346_v44, %v343_v43  ;;  %v342_v51 = vld [vmem:[%s9054_s3 + $0xf0] sm:$0xff]  ;;  %v345_v52 = vld [vmem:[%s9054_s3 + $0x108] sm:$0xff]  ;;  %v6841_v55 = vpack.c.bf16 %v329_v47, %v326_v46 }
   0xe   :  { %3869 = vmatmul.mubr.msk.f32.gmra.mrb[4].mxu0 %vm62_vm1, %v34_v24  ;;  %9370 = vst [vmem:[#allocation12_spill] sm:$0xff] %v6806_v45  ;;  %4444 = vmatprep.subr.bf16.mxu1 %v9064_v34  ;;  %9371 = vst [vmem:[#allocation13_spill] sm:$0xff] %v6822_v49  ;;  %v349_v53 = vld [vmem:[%s9054_s3 + $0x128] sm:$0xff]  ;;  %v352_v54 = vld [vmem:[%s9054_s3 + $0x140] sm:$0xff]  ;;  %v6857_v59 = vpack.c.bf16 %v345_v52, %v342_v51 }
   0xf   :  { %4420 = vmatpush1.bf16.msra.mxu0 %v6744_v25  ;;  %176 = vmatprep.mubr.f32.mxu0 %v9062_v1  ;;  %9372 = vst [vmem:[#allocation14_spill] sm:$0xff] %v6825_v50  ;;  %9373 = vst [vmem:[#allocation15_spill] sm:$0xff] %v6841_v55  ;;  %v332_v56 = vld [vmem:[%s9054_s3 + $0xa0] sm:$0xff]  ;;  %v335_v57 = vld [vmem:[%s9054_s3 + $0xb8] sm:$0xff]  ;;  %v6863_v61 = vpack.c.bf16 %v352_v54, %v349_v53 }
  0x10   :  { %4422 = vmatprep.subr.bf16.mxu0 %v6750_v27  ;;  %4086 = vmatmul.mubr.msk.f32.gmra.mrb[2].mxu1 %vm62_vm1, %v35_v36  ;;  %v37_v58 = vld [vmem:[%s9053_s0 + $0x28] sm:$0xff]  ;;  %9374 = vst [vmem:[#allocation16_spill] sm:$0xff] %v6857_v59  ;;  %v38_v60 = vld [vmem:[%s9053_s0 + $0x30] sm:$0xff]  ;;  %v348_v62 = vld [vmem:[%s9054_s3 + $0x120] sm:$0xff]  ;;  %v6879_v3 = vpack.c.bf16 %v335_v57, %v332_v56 }
  0x11   :  { %4446 = vmatpush3.bf16.msra.mxu1 %v6806_v45  ;;  %4088 = vmatprep.mubr.msk.f32.mxu1 %vm62_vm1, %v36_v48  ;;  %9375 = vst [vmem:[#allocation17_spill] sm:$0xff] %v6863_v61  ;;  %v351_v63 = vld [vmem:[%s9054_s3 + $0x138] sm:$0xff]  ;;  %v358_v2 = vld [vmem:[%s9054_s3 + $0x170] sm:$0xff]  ;;  %v341_v5 = vld [vmem:[%s9054_s3 + $0xe8] sm:$0xff] }
  0x12   :  { %3870 = vmatmul.mubr.msk.f32.gmra.mrb[6].mxu0 %vm62_vm1, %v35_v36  ;;  %4447 = vmatprep.subr.bf16.mxu1 %v9064_v34  ;;  %v355_v0 = vld [vmem:[%s9054_s3 + $0x158] sm:$0xff]  ;;  %9376 = vst [vmem:[#allocation18_spill] sm:$0xff] %v6879_v3  ;;  %v338_v4 = vld [vmem:[%s9054_s3 + $0xd0] sm:$0xff]  ;;  %v6892_v6 = vpack.c.bf16 %v351_v63, %v348_v62  ;;  %v357_v13 = vld [vmem:[%s9054_s3 + $0x168] sm:$0xff] }
  0x13   :  { %4424 = vmatpush1.bf16.msra.mxu0 %v6781_v37  ;;  %182 = vmatprep.mubr.f32.mxu0 %v9062_v1  ;;  %v39_v7 = vld [vmem:[%s9053_s0 + $0x38] sm:$0xff]  ;;  %v6898_v10 = vpack.c.bf16 %v358_v2, %v355_v0  ;;  %v354_v11 = vld [vmem:[%s9054_s3 + $0x150] sm:$0xff]  ;;  %v6908_v14 = vpack.c.bf16 %v341_v5, %v338_v4  ;;  %v362_v15 = vld [vmem:[%s9055_s5 + $0x8] sm:$0xff] }
  0x14   :  { %4426 = vmatprep.subr.bf16.mxu0 %v6787_v39  ;;  %4089 = vmatmul.mubr.msk.f32.gmra.mrb[4].mxu1 %vm62_vm1, %v37_v58  ;;  %9377 = vst [vmem:[#allocation19_spill] sm:$0xff] %v6892_v6  ;;  %v368_v16 = vld [vmem:[%s9055_s5 + $0x38] sm:$0xff]  ;;  %v344_v17 = vld [vmem:[%s9054_s3 + $0x100] sm:$0xff]  ;;  %v6928_v21 = vpack.c.bf16 %v357_v13, %v354_v11  ;;  %v367_v24 = vld [vmem:[%s9055_s5 + $0x30] sm:$0xff] }
  0x15   :  { %4449 = vmatpush3.bf16.msra.mxu1 %v6841_v55  ;;  %4091 = vmatprep.mubr.msk.f32.mxu1 %vm62_vm1, %v38_v60  ;;  %9378 = vst [vmem:[#allocation20_spill] sm:$0xff] %v6898_v10  ;;  %9379 = vst [vmem:[#allocation21_spill] sm:$0xff] %v6908_v14  ;;  %v347_v20 = vld [vmem:[%s9054_s3 + $0x118] sm:$0xff]  ;;  %v6931_v22 = vpack.c.bf16 %v368_v16, %v362_v15  ;;  %v361_v23 = vld [vmem:[%s9055_s5] sm:$0xff] }
  0x16   :  { %3871 = vmatmul.mubr.msk.f32.gmra.mrb[8].mxu0 %vm62_vm1, %v36_v48  ;;  %4450 = vmatprep.subr.bf16.mxu1 %v9064_v34  ;;  %9380 = vst [vmem:[#allocation22_spill] sm:$0xff] %v6928_v21  ;;  %v6940_v26 = vpack.c.bf16 %v347_v20, %v344_v17  ;;  %v374_v28 = vld [vmem:[%s9055_s5 + $0x68] sm:$0xff]  ;;  %v380_v29 = vld [vmem:[%s9055_s5 + $0x98] sm:$0xff]  ;;  %v350_v30 = vld [vmem:[%s9054_s3 + $0x130] sm:$0xff]  ;;  %v6958_v32 = vpack.c.bf16 %v367_v24, %v361_v23 }
  0x17   :  { %4428 = vmatpush1.bf16.msra.mxu0 %v6822_v49  ;;  %188 = vmatprep.mubr.f32.mxu0 %v9062_v1  ;;  %9381 = vst [vmem:[#allocation23_spill] sm:$0xff] %v6931_v22  ;;  %v353_v31 = vld [vmem:[%s9054_s3 + $0x148] sm:$0xff]  ;;  %v6961_v33 = vpack.c.bf16 %v380_v29, %v374_v28  ;;  %v373_v36 = vld [vmem:[%s9055_s5 + $0x60] sm:$0xff]  ;;  %v379_v38 = vld [vmem:[%s9055_s5 + $0x90] sm:$0xff] }
  0x18   :  { %4430 = vmatprep.subr.bf16.mxu0 %v6825_v50  ;;  %4092 = vmatmul.mubr.msk.f32.gmra.mrb[6].mxu1 %vm62_vm1, %v39_v7  ;;  %9382 = vst [vmem:[#allocation24_spill] sm:$0xff] %v6940_v26  ;;  %v6970_v40 = vpack.c.bf16 %v353_v31, %v350_v30  ;;  %v386_v41 = vld [vmem:[%s9055_s5 + $0xc8] sm:$0xff]  ;;  %v392_v42 = vld [vmem:[%s9055_s5 + $0xf8] sm:$0xff]  ;;  %v356_v43 = vld [vmem:[%s9054_s3 + $0x160] sm:$0xff]  ;;  %v6993_v48 = vpack.c.bf16 %v379_v38, %v373_v36 }
  0x19   :  { %4452 = vmatpush3.bf16.msra.mxu1 %v6879_v3  ;;  %4126 = vmatprep.mubr.msk.f32.mxu1 %vm6617_vm2, %v9062_v1  ;;  %9383 = vst [vmem:[#allocation25_spill] sm:$0xff] %v6961_v33  ;;  %v359_v44 = vld [vmem:[%s9054_s3 + $0x178] sm:$0xff]  ;;  %v370_v47 = vld [vmem:[%s9055_s5 + $0x48] sm:$0xff]  ;;  %v6997_v51 = vpack.c.bf16 %v392_v42, %v386_v41  ;;  %v385_v52 = vld [vmem:[%s9055_s5 + $0xc0] sm:$0xff] }
  0x1a   :  { %3872 = vmatmul.mubr.msk.f32.gmra.mrb[10].mxu0 %vm62_vm1, %v37_v58  ;;  %4453 = vmatprep.subr.bf16.mxu1 %v9064_v34  ;;  %9384 = vst [vmem:[#allocation26_spill] sm:$0xff] %v6970_v40  ;;  %v364_v46 = vld [vmem:[%s9055_s5 + $0x18] sm:$0xff]  ;;  %9385 = vst [vmem:[#allocation27_spill] sm:$0xff] %v6993_v48  ;;  %v391_v53 = vld [vmem:[%s9055_s5 + $0xf0] sm:$0xff]  ;;  %v7006_v54 = vpack.c.bf16 %v359_v44, %v356_v43 }
  0x1b   :  { %4432 = vmatpush1.bf16.msra.mxu0 %v6857_v59  ;;  %194 = vmatprep.mubr.f32.mxu0 %v9062_v1  ;;  %9386 = vst [vmem:[#allocation28_spill] sm:$0xff] %v6997_v51  ;;  %v7009_v56 = vpack.c.bf16 %v370_v47, %v364_v46  ;;  %v363_v57 = vld [vmem:[%s9055_s5 + $0x10] sm:$0xff]  ;;  %v369_v58 = vld [vmem:[%s9055_s5 + $0x40] sm:$0xff]  ;;  %v382_v62 = vld [vmem:[%s9055_s5 + $0xa8] sm:$0xff]  ;;  %v7024_v63 = vpack.c.bf16 %v391_v53, %v385_v52 }
  0x1c   :  { %4434 = vmatprep.subr.bf16.mxu0 %v6863_v61  ;;  %9387 = vst [vmem:[#allocation29_spill] sm:$0xff] %v7006_v54  ;;  %v7028_v0 = vpack.c.bf16 %v369_v58, %v363_v57  ;;  %v375_v4 = vld [vmem:[%s9055_s5 + $0x70] sm:$0xff]  ;;  %v381_v5 = vld [vmem:[%s9055_s5 + $0xa0] sm:$0xff]  ;;  %v394_v11 = vld [vmem:[%s9055_s5 + $0x108] sm:$0xff] }
  0x1d   :  { %4455 = vmatpush3.bf16.msra.mxu1 %v6908_v14  ;;  %9388 = vst [vmem:[#allocation30_spill] sm:$0xff] %v7009_v56  ;;  %9389 = vst [vmem:[#allocation31_spill] sm:$0xff] %v7024_v63  ;;  %v7048_v13 = vpack.c.bf16 %v381_v5, %v375_v4  ;;  %v387_v16 = vld [vmem:[%s9055_s5 + $0xd0] sm:$0xff]  ;;  %v393_v17 = vld [vmem:[%s9055_s5 + $0x100] sm:$0xff] }
  0x1e   :  { %3873 = vmatmul.mubr.msk.f32.gmra.mrb[12].mxu0 %vm62_vm1, %v38_v60  ;;  %4456 = vmatprep.subr.bf16.mxu1 %v9064_v34  ;;  %v376_v60 = vld [vmem:[%s9055_s5 + $0x78] sm:$0xff]  ;;  %9390 = vst [vmem:[#allocation32_spill] sm:$0xff] %v7028_v0  ;;  %v7061_v20 = vpack.c.bf16 %v393_v17, %v387_v16  ;;  %v398_v23 = vld [vmem:[%s9055_s5 + $0x128] sm:$0xff]  ;;  %v397_v31 = vld [vmem:[%s9055_s5 + $0x120] sm:$0xff] }
  0x1f   :  { %4436 = vmatpush1.bf16.msra.mxu0 %v6892_v6  ;;  %200 = vmatprep.mubr.f32.mxu0 %v9062_v1  ;;  %v7031_v2 = vpack.c.bf16 %v382_v62, %v376_v60  ;;  %9392 = vst [vmem:[#allocation34_spill] sm:$0xff] %v7048_v13  ;;  %v404_v24 = vld [vmem:[%s9055_s5 + $0x158] sm:$0xff]  ;;  %v406_v30 = vld [vmem:[%s9055_s5 + $0x168] sm:$0xff]  ;;  %v403_v36 = vld [vmem:[%s9055_s5 + $0x150] sm:$0xff] }
  0x20   :  { %4438 = vmatprep.subr.bf16.mxu0 %v6898_v10  ;;  %9394 = vst [vmem:[#allocation36_spill] sm:$0xff] %v7061_v20  ;;  %v400_v28 = vld [vmem:[%s9055_s5 + $0x138] sm:$0xff]  ;;  %v7074_v29 = vpack.c.bf16 %v404_v24, %v398_v23  ;;  %v7087_v41 = vpack.c.bf16 %v403_v36, %v397_v31  ;;  %v399_v42 = vld [vmem:[%s9055_s5 + $0x130] sm:$0xff]  ;;  %v405_v43 = vld [vmem:[%s9055_s5 + $0x160] sm:$0xff] }
  0x21   :  { %4458 = vmatpush3.bf16.msra.mxu1 %v6940_v26  ;;  %9391 = vst [vmem:[#allocation33_spill] sm:$0xff] %v7031_v2  ;;  %v7085_v38 = vpack.c.bf16 %v406_v30, %v400_v28  ;;  %v410_v44 = vld [vmem:[%s9055_s5 + $0x188] sm:$0xff]  ;;  %v7099_v46 = vpack.c.bf16 %v405_v43, %v399_v42  ;;  %v416_v47 = vld [vmem:[%s9055_s5 + $0x1b8] sm:$0xff]  ;;  %v409_v60 = vld [vmem:[%s9055_s5 + $0x180] sm:$0xff] }
  0x22   :  { %3874 = vmatmul.mubr.msk.f32.gmra.mrb[14].mxu0 %vm62_vm1, %v39_v7  ;;  %4459 = vmatprep.subr.bf16.mxu1 %v9064_v34  ;;  %v388_v7 = vld [vmem:[%s9055_s5 + $0xd8] sm:$0xff]  ;;  %9395 = vst [vmem:[#allocation37_spill] sm:$0xff] %v7074_v29  ;;  %9397 = vst [vmem:[#allocation39_spill] sm:$0xff] %v7087_v41  ;;  %v418_v53 = vld [vmem:[%s9055_s5 + $0x1c8] sm:$0xff]  ;;  %v7112_v57 = vpack.c.bf16 %v416_v47, %v410_v44 }
  0x23   :  { %4440 = vmatpush1.bf16.msra.mxu0 %v6928_v21  ;;  %618 = vmatprep.mubr.f32.mxu0 %v9062_v1  ;;  %v7052_v15 = vpack.c.bf16 %v394_v11, %v388_v7  ;;  %9396 = vst [vmem:[#allocation38_spill] sm:$0xff] %v7085_v38  ;;  %9398 = vst [vmem:[#allocation40_spill] sm:$0xff] %v7099_v46  ;;  %v412_v52 = vld [vmem:[%s9055_s5 + $0x198] sm:$0xff]  ;;  %v415_v62 = vld [vmem:[%s9055_s5 + $0x1b0] sm:$0xff] }
  0x24   :  { %4466 = vmatprep.subr.bf16.mxu0 %v6931_v22  ;;  %9399 = vst [vmem:[#allocation41_spill] sm:$0xff] %v7112_v57  ;;  %v7114_v58 = vpack.c.bf16 %v418_v53, %v412_v52  ;;  %v411_v4 = vld [vmem:[%s9055_s5 + $0x190] sm:$0xff]  ;;  %v7128_v5 = vpack.c.bf16 %v415_v62, %v409_v60  ;;  %v417_v7 = vld [vmem:[%s9055_s5 + $0x1c0] sm:$0xff]  ;;  %v422_v16 = vld [vmem:[%s9055_s5 + $0x1e8] sm:$0xff] }
  0x25   :  { %4461 = vmatpush3.bf16.msra.mxu1 %v6970_v40  ;;  %9393 = vst [vmem:[#allocation35_spill] sm:$0xff] %v7052_v15  ;;  %v7133_v11 = vpack.c.bf16 %v417_v7, %v411_v4  ;;  %v428_v17 = vld [vmem:[%s9055_s5 + $0x218] sm:$0xff]  ;;  %v430_v28 = vld [vmem:[%s9055_s5 + $0x228] sm:$0xff]  ;;  %v421_v30 = vld [vmem:[%s9055_s5 + $0x1e0] sm:$0xff] }
  0x26   :  { %619 = vmatmul.mubr.f32.vlgmr.msra.gmra.mrb[0].mxu0 %v9062_v1  ;;  %4462 = vmatprep.subr.bf16.mxu1 %v9064_v34  ;;  %9400 = vst [vmem:[#allocation42_spill] sm:$0xff] %v7114_v58  ;;  %9401 = vst [vmem:[#allocation43_spill] sm:$0xff] %v7128_v5  ;;  %v424_v23 = vld [vmem:[%s9055_s5 + $0x1f8] sm:$0xff]  ;;  %v7146_v24 = vpack.c.bf16 %v428_v17, %v422_v16  ;;  %v427_v31 = vld [vmem:[%s9055_s5 + $0x210] sm:$0xff] }
  0x27   :  { %4468 = vmatpush1.bf16.msra.mxu0 %v6958_v32  ;;  %818 = vmatprep.mubr.f32.mxu0 %v9062_v1  ;;  %9402 = vst [vmem:[#allocation44_spill] sm:$0xff] %v7133_v11  ;;  %v7157_v36 = vpack.c.bf16 %v430_v28, %v424_v23  ;;  %v7159_v42 = vpack.c.bf16 %v427_v31, %v421_v30  ;;  %v423_v43 = vld [vmem:[%s9055_s5 + $0x1f0] sm:$0xff]  ;;  %v429_v44 = vld [vmem:[%s9055_s5 + $0x220] sm:$0xff]  ;;  %v434_v52 = vld [vmem:[%s9055_s5 + $0x248] sm:$0xff] }
  0x28   :  { %4470 = vmatprep.subr.bf16.mxu0 %v6961_v33  ;;  %9403 = vst [vmem:[#allocation45_spill] sm:$0xff] %v7146_v24  ;;  %v7168_v47 = vpack.c.bf16 %v429_v44, %v423_v43  ;;  %v440_v53 = vld [vmem:[%s9055_s5 + $0x278] sm:$0xff]  ;;  %v442_v4 = vld [vmem:[%s9055_s5 + $0x288] sm:$0xff]  ;;  %v433_v7 = vld [vmem:[%s9055_s5 + $0x240] sm:$0xff] }
  0x29   :  { %4464 = vmatpush3.bf16.msra.mxu1 %v7006_v54  ;;  %9404 = vst [vmem:[#allocation46_spill] sm:$0xff] %v7157_v36  ;;  %9405 = vst [vmem:[#allocation47_spill] sm:$0xff] %v7159_v42  ;;  %v436_v60 = vld [vmem:[%s9055_s5 + $0x258] sm:$0xff]  ;;  %v7182_v62 = vpack.c.bf16 %v440_v53, %v434_v52  ;;  %v439_v16 = vld [vmem:[%s9055_s5 + $0x270] sm:$0xff] }
  0x2a   :  { %4530 = vmatprep.subr.bf16.mxu1 %v7009_v56  ;;  %9406 = vst [vmem:[#allocation48_spill] sm:$0xff] %v7168_v47  ;;  %v7193_v17 = vpack.c.bf16 %v442_v4, %v436_v60  ;;  %v7195_v23 = vpack.c.bf16 %v439_v16, %v433_v7  ;;  %v435_v28 = vld [vmem:[%s9055_s5 + $0x250] sm:$0xff]  ;;  %v441_v30 = vld [vmem:[%s9055_s5 + $0x280] sm:$0xff]  ;;  %v446_v43 = vld [vmem:[%s9055_s5 + $0x2a8] sm:$0xff] }
  0x2b   :  { %4472 = vmatpush1.bf16.msra.mxu0 %v6993_v48  ;;  %9407 = vst [vmem:[#allocation49_spill] sm:$0xff] %v7182_v62  ;;  %v7204_v31 = vpack.c.bf16 %v441_v30, %v435_v28  ;;  %v452_v44 = vld [vmem:[%s9055_s5 + $0x2d8] sm:$0xff]  ;;  %v454_v60 = vld [vmem:[%s9055_s5 + $0x2e8] sm:$0xff]  ;;  %v445_v4 = vld [vmem:[%s9055_s5 + $0x2a0] sm:$0xff] }
  0x2c   :  { %4474 = vmatprep.subr.bf16.mxu0 %v6997_v51  ;;  %4127 = vmatmul.mubr.f32.vlgmr.msra.gmra.mrb[8].mxu1 %v9062_v1  ;;  %9408 = vst [vmem:[#allocation50_spill] sm:$0xff] %v7193_v17  ;;  %9409 = vst [vmem:[#allocation51_spill] sm:$0xff] %v7195_v23  ;;  %v448_v52 = vld [vmem:[%s9055_s5 + $0x2b8] sm:$0xff]  ;;  %v7218_v53 = vpack.c.bf16 %v452_v44, %v446_v43  ;;  %v451_v7 = vld [vmem:[%s9055_s5 + $0x2d0] sm:$0xff] }
  0x2d   :  { %4532 = vmatpush1.bf16.msra.mxu1 %v7028_v0  ;;  %889 = vmatprep.mubr.f32.mxu1 %v9062_v1  ;;  %9410 = vst [vmem:[#allocation52_spill] sm:$0xff] %v7204_v31  ;;  %v7229_v16 = vpack.c.bf16 %v454_v60, %v448_v52  ;;  %v7231_v28 = vpack.c.bf16 %v451_v7, %v445_v4  ;;  %v447_v30 = vld [vmem:[%s9055_s5 + $0x2b0] sm:$0xff]  ;;  %v453_v43 = vld [vmem:[%s9055_s5 + $0x2e0] sm:$0xff]  ;;  %v458_v52 = vld [vmem:[%s9055_s5 + $0x308] sm:$0xff] }
  0x2e   :  { %4534 = vmatprep.subr.bf16.mxu1 %v7031_v2  ;;  %9411 = vst [vmem:[#allocation53_spill] sm:$0xff] %v7218_v53  ;;  %v7240_v44 = vpack.c.bf16 %v453_v43, %v447_v30  ;;  %v464_v60 = vld [vmem:[%s9055_s5 + $0x338] sm:$0xff]  ;;  %v466_v30 = vld [vmem:[%s9055_s5 + $0x348] sm:$0xff]  ;;  %v457_v43 = vld [vmem:[%s9055_s5 + $0x300] sm:$0xff] }
  0x2f   :  { %4476 = vmatpush1.bf16.msra.mxu0 %v7024_v63  ;;  %9412 = vst [vmem:[#allocation54_spill] sm:$0xff] %v7229_v16  ;;  %9413 = vst [vmem:[#allocation55_spill] sm:$0xff] %v7231_v28  ;;  %v460_v4 = vld [vmem:[%s9055_s5 + $0x318] sm:$0xff]  ;;  %v7254_v7 = vpack.c.bf16 %v464_v60, %v458_v52  ;;  %v463_v1 = vld [vmem:[%s9055_s5 + $0x330] sm:$0xff] }
  0x30   :  { %4478 = vmatprep.subr.bf16.mxu0 %v7074_v29  ;;  %9414 = vst [vmem:[#allocation56_spill] sm:$0xff] %v7240_v44  ;;  %v7265_v34 = vpack.c.bf16 %v466_v30, %v460_v4  ;;  %v459_v52 = vld [vmem:[%s9055_s5 + $0x310] sm:$0xff]  ;;  %v465_v60 = vld [vmem:[%s9055_s5 + $0x340] sm:$0xff]  ;;  %v476_v4 = vld [vmem:[%s9055_s5 + $0x398] sm:$0xff] }
  0x31   :  { %4536 = vmatpush1.bf16.msra.mxu1 %v7048_v13  ;;  %9415 = vst [vmem:[#allocation57_spill] sm:$0xff] %v7254_v7  ;;  %v472_v30 = vld [vmem:[%s9055_s5 + $0x378] sm:$0xff] }
  0x32   :  { %4538 = vmatprep.subr.bf16.mxu1 %v7052_v15  ;;  %9416 = vst [vmem:[#allocation58_spill] sm:$0xff] %v7265_v34 }
  0x33   :  { %4480 = vmatpush1.bf16.msra.mxu0 %v7087_v41 }
  0x34   :  { %4482 = vmatprep.subr.bf16.mxu0 %v7112_v57 }
  0x35   :  { %4540 = vmatpush1.bf16.msra.mxu1 %v7061_v20 }
  0x36   :  { %4542 = vmatprep.subr.bf16.mxu1 %v7085_v38 }
  0x37   :  { %4484 = vmatpush1.bf16.msra.mxu0 %v7128_v5 }
  0x38   :  { %4486 = vmatprep.subr.bf16.mxu0 %v7146_v24 }
  0x39   :  { %4544 = vmatpush1.bf16.msra.mxu1 %v7099_v46 }
  0x3a   :  { %4546 = vmatprep.subr.bf16.mxu1 %v7114_v58 }
  0x3b   :  { %4488 = vmatpush1.bf16.msra.mxu0 %v7159_v42 }
  0x3c   :  { %4490 = vmatprep.subr.bf16.mxu0 %v7182_v62 }
  0x3d   :  { %4548 = vmatpush1.bf16.msra.mxu1 %v7133_v11 }
  0x3e   :  { %4550 = vmatprep.subr.bf16.mxu1 %v7157_v36 }
  0x3f   :  { %4492 = vmatpush1.bf16.msra.mxu0 %v7195_v23 }
  0x40   :  { %4494 = vmatprep.subr.bf16.mxu0 %v7218_v53 }
  0x41   :  { %4552 = vmatpush1.bf16.msra.mxu1 %v7168_v47 }
  0x42   :  { %4554 = vmatprep.subr.bf16.mxu1 %v7193_v17 }
  0x43   :  { %4496 = vmatpush1.bf16.msra.mxu0 %v7231_v28 }
  0x44   :  { %4498 = vmatprep.subr.bf16.mxu0 %v7254_v7 }
  0x45   :  { %4556 = vmatpush1.bf16.msra.mxu1 %v7204_v31 }
  0x46   :  { %4558 = vmatprep.subr.bf16.mxu1 %v7229_v16  ;;  %v7267_v16 = vpack.c.bf16 %v463_v1, %v457_v43  ;;  %v470_v1 = vld [vmem:[%s9055_s5 + $0x368] sm:$0xff] }
  0x47   :  { %v7290_v43 = vpack.c.bf16 %v476_v4, %v470_v1  ;;  %v471_v1 = vld [vmem:[%s9055_s5 + $0x370] sm:$0xff]  ;;  %v477_v4 = vld [vmem:[%s9055_s5 + $0x3a0] sm:$0xff] }
  0x48   :  { %9417 = vst [vmem:[#allocation59_spill] sm:$0xff] %v7267_v16  ;;  %4500 = vmatpush1.bf16.msra.mxu0 %v7267_v16 }
  0x49   :  { %4560 = vmatpush1.bf16.msra.mxu1 %v7240_v44  ;;  %v7276_v44 = vpack.c.bf16 %v465_v60, %v459_v52  ;;  %9419 = vst [vmem:[#allocation61_spill] sm:$0xff] %v7290_v43  ;;  %v478_v52 = vld [vmem:[%s9055_s5 + $0x3a8] sm:$0xff]  ;;  %v469_v60 = vld [vmem:[%s9055_s5 + $0x360] sm:$0xff]  ;;  %4502 = vmatprep.subr.bf16.mxu0 %v7290_v43 }
  0x4a   :  { %4562 = vmatprep.subr.bf16.mxu1 %v7265_v34  ;;  %v475_v34 = vld [vmem:[%s9055_s5 + $0x390] sm:$0xff]  ;;  %v7301_v31 = vpack.c.bf16 %v478_v52, %v472_v30  ;;  %v488_v30 = vld [vmem:[%s9055_s5 + $0x3f8] sm:$0xff] }
  0x4b   :  { %9418 = vst [vmem:[#allocation60_spill] sm:$0xff] %v7276_v44  ;;  %v7303_v17 = vpack.c.bf16 %v475_v34, %v469_v60  ;;  %v482_v34 = vld [vmem:[%s9055_s5 + $0x3c8] sm:$0xff]  ;;  %v484_v52 = vld [vmem:[%s9055_s5 + $0x3d8] sm:$0xff] }
  0x4c   :  { %9420 = vst [vmem:[#allocation62_spill] sm:$0xff] %v7301_v31  ;;  %v7326_v60 = vpack.c.bf16 %v488_v30, %v482_v34  ;;  %v483_v34 = vld [vmem:[%s9055_s5 + $0x3d0] sm:$0xff]  ;;  %v489_v30 = vld [vmem:[%s9055_s5 + $0x400] sm:$0xff] }
  0x4d   :  { %4564 = vmatpush1.bf16.msra.mxu1 %v7276_v44  ;;  %9421 = vst [vmem:[#allocation63_spill] sm:$0xff] %v7303_v17  ;;  %v7312_v44 = vpack.c.bf16 %v477_v4, %v471_v1  ;;  %4504 = vmatpush1.bf16.msra.mxu0 %v7303_v17  ;;  %v490_v1 = vld [vmem:[%s9055_s5 + $0x408] sm:$0xff]  ;;  %v481_v4 = vld [vmem:[%s9055_s5 + $0x3c0] sm:$0xff] }
  0x4e   :  { %4566 = vmatprep.subr.bf16.mxu1 %v7301_v31  ;;  %9423 = vst [vmem:[#allocation65_spill] sm:$0xff] %v7326_v60  ;;  %v487_v31 = vld [vmem:[%s9055_s5 + $0x3f0] sm:$0xff]  ;;  %v7337_v47 = vpack.c.bf16 %v490_v1, %v484_v52  ;;  %4506 = vmatprep.subr.bf16.mxu0 %v7326_v60  ;;  %v500_v52 = vld [vmem:[%s9055_s5 + $0x458] sm:$0xff] }
  0x4f   :  { %9422 = vst [vmem:[#allocation64_spill] sm:$0xff] %v7312_v44  ;;  %v7339_v36 = vpack.c.bf16 %v487_v31, %v481_v4  ;;  %v494_v31 = vld [vmem:[%s9055_s5 + $0x428] sm:$0xff]  ;;  %v496_v1 = vld [vmem:[%s9055_s5 + $0x438] sm:$0xff] }
  0x50   :  { %9424 = vst [vmem:[#allocation66_spill] sm:$0xff] %v7337_v47  ;;  %v7362_v4 = vpack.c.bf16 %v500_v52, %v494_v31  ;;  %v495_v31 = vld [vmem:[%s9055_s5 + $0x430] sm:$0xff]  ;;  %v501_v52 = vld [vmem:[%s9055_s5 + $0x460] sm:$0xff] }
  0x51   :  { %4568 = vmatpush1.bf16.msra.mxu1 %v7312_v44  ;;  %9425 = vst [vmem:[#allocation67_spill] sm:$0xff] %v7339_v36  ;;  %v7348_v44 = vpack.c.bf16 %v489_v30, %v483_v34  ;;  %4508 = vmatpush1.bf16.msra.mxu0 %v7339_v36  ;;  %v502_v34 = vld [vmem:[%s9055_s5 + $0x468] sm:$0xff]  ;;  %v493_v30 = vld [vmem:[%s9055_s5 + $0x420] sm:$0xff] }
  0x52   :  { %4570 = vmatprep.subr.bf16.mxu1 %v7337_v47  ;;  %9427 = vst [vmem:[#allocation69_spill] sm:$0xff] %v7362_v4  ;;  %v499_v47 = vld [vmem:[%s9055_s5 + $0x450] sm:$0xff]  ;;  %v7373_v11 = vpack.c.bf16 %v502_v34, %v496_v1  ;;  %4510 = vmatprep.subr.bf16.mxu0 %v7362_v4  ;;  %v512_v1 = vld [vmem:[%s9055_s5 + $0x4b8] sm:$0xff] }
  0x53   :  { %9426 = vst [vmem:[#allocation68_spill] sm:$0xff] %v7348_v44  ;;  %v7375_v58 = vpack.c.bf16 %v499_v47, %v493_v30  ;;  %v506_v47 = vld [vmem:[%s9055_s5 + $0x488] sm:$0xff]  ;;  %v508_v34 = vld [vmem:[%s9055_s5 + $0x498] sm:$0xff] }
  0x54   :  { %9428 = vst [vmem:[#allocation70_spill] sm:$0xff] %v7373_v11  ;;  %v7398_v30 = vpack.c.bf16 %v512_v1, %v506_v47  ;;  %v507_v47 = vld [vmem:[%s9055_s5 + $0x490] sm:$0xff]  ;;  %v513_v1 = vld [vmem:[%s9055_s5 + $0x4c0] sm:$0xff] }
  0x55   :  { %4572 = vmatpush1.bf16.msra.mxu1 %v7348_v44  ;;  %9429 = vst [vmem:[#allocation71_spill] sm:$0xff] %v7375_v58  ;;  %v7384_v44 = vpack.c.bf16 %v501_v52, %v495_v31  ;;  %4512 = vmatpush1.bf16.msra.mxu0 %v7375_v58  ;;  %v514_v31 = vld [vmem:[%s9055_s5 + $0x4c8] sm:$0xff]  ;;  %v505_v52 = vld [vmem:[%s9055_s5 + $0x480] sm:$0xff] }
  0x56   :  { %4574 = vmatprep.subr.bf16.mxu1 %v7373_v11  ;;  %9431 = vst [vmem:[#allocation73_spill] sm:$0xff] %v7398_v30  ;;  %v511_v11 = vld [vmem:[%s9055_s5 + $0x4b0] sm:$0xff]  ;;  %v7409_v46 = vpack.c.bf16 %v514_v31, %v508_v34  ;;  %4514 = vmatprep.subr.bf16.mxu0 %v7398_v30  ;;  %v524_v34 = vld [vmem:[%s9055_s5 + $0x518] sm:$0xff] }
  0x57   :  { %9430 = vst [vmem:[#allocation72_spill] sm:$0xff] %v7384_v44  ;;  %v7411_v38 = vpack.c.bf16 %v511_v11, %v505_v52  ;;  %v518_v11 = vld [vmem:[%s9055_s5 + $0x4e8] sm:$0xff]  ;;  %v520_v31 = vld [vmem:[%s9055_s5 + $0x4f8] sm:$0xff] }
  0x58   :  { %9432 = vst [vmem:[#allocation74_spill] sm:$0xff] %v7409_v46  ;;  %v7434_v52 = vpack.c.bf16 %v524_v34, %v518_v11  ;;  %v519_v11 = vld [vmem:[%s9055_s5 + $0x4f0] sm:$0xff]  ;;  %v525_v34 = vld [vmem:[%s9055_s5 + $0x520] sm:$0xff] }
  0x59   :  { %4576 = vmatpush1.bf16.msra.mxu1 %v7384_v44  ;;  %9433 = vst [vmem:[#allocation75_spill] sm:$0xff] %v7411_v38  ;;  %v7420_v44 = vpack.c.bf16 %v513_v1, %v507_v47  ;;  %4516 = vmatpush1.bf16.msra.mxu0 %v7411_v38  ;;  %v526_v47 = vld [vmem:[%s9055_s5 + $0x528] sm:$0xff]  ;;  %v517_v1 = vld [vmem:[%s9055_s5 + $0x4e0] sm:$0xff] }
  0x5a   :  { %4578 = vmatprep.subr.bf16.mxu1 %v7409_v46  ;;  %9435 = vst [vmem:[#allocation77_spill] sm:$0xff] %v7434_v52  ;;  %v523_v46 = vld [vmem:[%s9055_s5 + $0x510] sm:$0xff]  ;;  %v7445_v20 = vpack.c.bf16 %v526_v47, %v520_v31  ;;  %4518 = vmatprep.subr.bf16.mxu0 %v7434_v52  ;;  %v536_v31 = vld [vmem:[%s9055_s5 + $0x578] sm:$0xff] }
  0x5b   :  { %9434 = vst [vmem:[#allocation76_spill] sm:$0xff] %v7420_v44  ;;  %v7447_v15 = vpack.c.bf16 %v523_v46, %v517_v1  ;;  %v530_v46 = vld [vmem:[%s9055_s5 + $0x548] sm:$0xff]  ;;  %v532_v47 = vld [vmem:[%s9055_s5 + $0x558] sm:$0xff] }
  0x5c   :  { %9436 = vst [vmem:[#allocation78_spill] sm:$0xff] %v7445_v20  ;;  %v7470_v1 = vpack.c.bf16 %v536_v31, %v530_v46  ;;  %v531_v46 = vld [vmem:[%s9055_s5 + $0x550] sm:$0xff]  ;;  %v537_v31 = vld [vmem:[%s9055_s5 + $0x580] sm:$0xff] }
  0x5d   :  { %4580 = vmatpush1.bf16.msra.mxu1 %v7420_v44  ;;  %9437 = vst [vmem:[#allocation79_spill] sm:$0xff] %v7447_v15  ;;  %v7456_v44 = vpack.c.bf16 %v525_v34, %v519_v11  ;;  %4520 = vmatpush1.bf16.msra.mxu0 %v7447_v15  ;;  %v538_v11 = vld [vmem:[%s9055_s5 + $0x588] sm:$0xff]  ;;  %v529_v34 = vld [vmem:[%s9055_s5 + $0x540] sm:$0xff] }
  0x5e   :  { %4582 = vmatprep.subr.bf16.mxu1 %v7445_v20  ;;  %9439 = vst [vmem:[#allocation81_spill] sm:$0xff] %v7470_v1  ;;  %v535_v20 = vld [vmem:[%s9055_s5 + $0x570] sm:$0xff]  ;;  %v7481_v13 = vpack.c.bf16 %v538_v11, %v532_v47  ;;  %4522 = vmatprep.subr.bf16.mxu0 %v7470_v1  ;;  %v548_v47 = vld [vmem:[%s9055_s5 + $0x5d8] sm:$0xff] }
  0x5f   :  { %9438 = vst [vmem:[#allocation80_spill] sm:$0xff] %v7456_v44  ;;  %v7483_v2 = vpack.c.bf16 %v535_v20, %v529_v34  ;;  %v542_v20 = vld [vmem:[%s9055_s5 + $0x5a8] sm:$0xff]  ;;  %v544_v11 = vld [vmem:[%s9055_s5 + $0x5b8] sm:$0xff] }
  0x60   :  { %9440 = vst [vmem:[#allocation82_spill] sm:$0xff] %v7481_v13  ;;  %v7506_v34 = vpack.c.bf16 %v548_v47, %v542_v20  ;;  %v543_v20 = vld [vmem:[%s9055_s5 + $0x5b0] sm:$0xff]  ;;  %v549_v47 = vld [vmem:[%s9055_s5 + $0x5e0] sm:$0xff] }
  0x61   :  { %4584 = vmatpush1.bf16.msra.mxu1 %v7456_v44  ;;  %9441 = vst [vmem:[#allocation83_spill] sm:$0xff] %v7483_v2  ;;  %v7492_v44 = vpack.c.bf16 %v537_v31, %v531_v46  ;;  %4524 = vmatpush1.bf16.msra.mxu0 %v7483_v2  ;;  %v550_v46 = vld [vmem:[%s9055_s5 + $0x5e8] sm:$0xff]  ;;  %v541_v31 = vld [vmem:[%s9055_s5 + $0x5a0] sm:$0xff] }
  0x62   :  { %4586 = vmatprep.subr.bf16.mxu1 %v7481_v13  ;;  %9443 = vst [vmem:[#allocation85_spill] sm:$0xff] %v7506_v34  ;;  %v547_v13 = vld [vmem:[%s9055_s5 + $0x5d0] sm:$0xff]  ;;  %v7517_v0 = vpack.c.bf16 %v550_v46, %v544_v11  ;;  %4526 = vmatprep.subr.bf16.mxu0 %v7506_v34  ;;  %v372_v11 = vld [vmem:[%s9055_s5 + $0x58] sm:$0xff] }
  0x63   :  { %9442 = vst [vmem:[#allocation84_spill] sm:$0xff] %v7492_v44  ;;  %v7519_v56 = vpack.c.bf16 %v547_v13, %v541_v31  ;;  %v366_v13 = vld [vmem:[%s9055_s5 + $0x28] sm:$0xff]  ;;  %v9448_v31 = vmov 0.0|0.0  }
  0x64   :  { %9444 = vst [vmem:[#allocation86_spill] sm:$0xff] %v7517_v0  ;;  %v7539_v46 = vpack.c.bf16 %v372_v11, %v366_v13 }
  0x65   :  { %4588 = vmatpush1.bf16.msra.mxu1 %v7492_v44  ;;  %9445 = vst [vmem:[#allocation87_spill] sm:$0xff] %v7519_v56  ;;  %v7528_v44 = vpack.c.bf16 %v549_v47, %v543_v20  ;;  %4528 = vmatpush1.bf16.msra.mxu0 %v7519_v56  ;;  %v44_v20 = vlaneseq  ;;  %v42_v56 = vld [vmem:[%s9056_s2] sm:$0x7] }
  0x66   :  { %4590 = vmatprep.subr.bf16.mxu1 %v7517_v0  ;;  %9447 = vst [vmem:[#allocation89_spill] sm:$0xff] %v7539_v46  ;;  %4594 = vmatprep.subr.bf16.mxu0 %v7539_v46 }
  0x67   :  { %9446 = vst [vmem:[#allocation88_spill] sm:$0xff] %v7528_v44  ;;  %v7543_v47 = vshrl.u32 %v44_v20, 7 }
  0x69   :  { %4592 = vmatpush1.bf16.msra.mxu1 %v7528_v44  ;;  %v9152_v0 = vsub.s32 2, %v7543_v47 }
  0x6a   :  { %4689 = vmatprep.subr.bf16.mxu1 %v9448_v31 }
  0x6b   :  { %v55_v21 = vrot.slane %v42_v56, %v9152_v0 }
  0xdf   :  { %v4084_v34 = vpop.f32.mrb[0].mxu1 }
  0xe0   :  { %v7551_v44 = vadd.f32 %v4084_v34, %v55_v21  ;;  %v273_v13 = vpop.f32.mrb[1].mxu1  ;;  %v9155_v34 = vsub.s32 0, %v7543_v47 }
  0xe2   :  { %9449 = vst [vmem:[#allocation90_spill] sm:$0xff] %v7551_v44 }
  0xe3   :  { %v4087_v11 = vpop.f32.mrb[2].mxu1 }
  0xe4   :  { %v7553_v2 = vadd.f32 %v4087_v11, %v55_v21  ;;  %v283_v46 = vpop.f32.mrb[3].mxu1  ;;  %v9156_v11 = vsub.s32 1, %v7543_v47 }
  0xe5   :  { %v7555_v10 = vadd.f32 %v283_v46, %v55_v21  ;;  %v7569_v46 = vrot.slane %v42_v56, %v9155_v34 }
  0xe6   :  { %9450 = vst [vmem:[#allocation91_spill] sm:$0xff] %v7553_v2 }
  0xe7   :  { %9451 = vst [vmem:[#allocation92_spill] sm:$0xff] %v7555_v10  ;;  %v4090_v20 = vpop.f32.mrb[4].mxu1  ;;  %9456 = vst [vmem:[#allocation97_spill] sm:$0xff] %v7569_v46 }
  0xe8   :  { %v7557_v6 = vadd.f32 %v4090_v20, %v55_v21  ;;  %v293_v1 = vpop.f32.mrb[5].mxu1  ;;  %v7573_v20 = vrot.slane %v42_v56, %v9156_v11  ;;  %v7580_v56 = vld [vmem:[%s9057_s4] ss:$0 sm:$0xff] }
  0xe9   :  { %v7559_v15 = vadd.f32 %v293_v1, %v55_v21 }
  0xea   :  { %9452 = vst [vmem:[#allocation93_spill] sm:$0xff] %v7557_v6 }
  0xeb   :  { %9453 = vst [vmem:[#allocation94_spill] sm:$0xff] %v7559_v15  ;;  %v4093_v61 = vpop.f32.mrb[6].mxu1 }
  0xec   :  { %v7561_v59 = vadd.f32 %v4093_v61, %v55_v21  ;;  %v303_v0 = vpop.f32.mrb[7].mxu1 }
  0xed   :  { %v7563_v52 = vadd.f32 %v303_v0, %v55_v21 }
  0xee   :  { %9454 = vst [vmem:[#allocation95_spill] sm:$0xff] %v7561_v59 }
  0xef   :  { %9455 = vst [vmem:[#allocation96_spill] sm:$0xff] %v7563_v52 }
  0xf9   :  { %v620_v2 = vpop.f32.mrb[0].mxu0 }
  0xfa   :  { %v6417_v1 = vadd.f32 %v620_v2, %v7569_v46  ;;  %v622_v61 = vpop.f32.mrb[1].mxu0  ;;  %v274_v46 = vadd.f32 %v273_v13, %v55_v21  ;;  %v384_v21 = vld [vmem:[%s9055_s5 + $0xb8] sm:$0xff] }
  0xfb   :  { %v6418_v0 = vadd.f32 %v622_v61, %v7573_v20 }
  0xfc   :  { %v3884_v59 = vmul.f32 -1.442695, %v6417_v1 }
  0xfd   :  { %v3885_v52 = vmul.f32 -1.442695, %v6418_v0 }
  0xfe   :  { %6453 = vpow2.f32 %v3884_v59 }
  0xff   :  { %v691_v6 = vpop.f32.mrb[8].mxu1  ;;  %6455 = vpow2.f32 %v3885_v52 }
 0x100   :  { %v4128_v15 = vpop.f32.mrb[9].mxu1  ;;  %v715_v2 = vadd.f32 %v7580_v56, %v691_v6  ;;  %v378_v6 = vld [vmem:[%s9055_s5 + $0x88] sm:$0xff] }
 0x108   :  { %v6454_v10 = vpop.eup %6453 }
 0x109   :  { %v699_v44 = vadd.f32 1.0, %v6454_v10  ;;  %v6456_v34 = vpop.eup %6455  ;;  %v365_v10 = vld [vmem:[%s9055_s5 + $0x20] sm:$0xff] }
 0x10a   :  { %v706_v11 = vadd.f32 1.0, %v6456_v34 }
 0x10b   :  { %6457 = vrcp.f32 %v699_v44  ;;  %v371_v44 = vld [vmem:[%s9055_s5 + $0x50] sm:$0xff] }
 0x10c   :  { %6459 = vrcp.f32 %v706_v11  ;;  %v7595_v11 = vpack.c.bf16 %v371_v44, %v365_v10  ;;  %v389_v44 = vld [vmem:[%s9055_s5 + $0xe0] sm:$0xff] }
 0x115   :  { %v6458_v1 = vpop.eup %6457 }
 0x116   :  { %v716_v59 = vmul.f32 %v6458_v1, %v715_v2  ;;  %v6460_v15 = vpop.eup %6459  ;;  %v7599_v2 = vpack.c.bf16 %v384_v21, %v378_v6  ;;  %v377_v1 = vld [vmem:[%s9055_s5 + $0x80] sm:$0xff]  ;;  %v402_v6 = vld [vmem:[%s9055_s5 + $0x148] sm:$0xff]  ;;  %v408_v21 = vld [vmem:[%s9055_s5 + $0x178] sm:$0xff] }
 0x117   :  { %v719_v52 = vsub.f32 1.0, %v6460_v15  ;;  %v721_v13 = vmul.f32 0.0, %v6460_v15  ;;  %v396_v15 = vld [vmem:[%s9055_s5 + $0x118] sm:$0xff] }
 0x118   :  { %v717_v61 = vadd.f32 %v716_v59, %v274_v46  ;;  %v383_v59 = vld [vmem:[%s9055_s5 + $0xb0] sm:$0xff] }
 0x11a   :  { %6461 = vtanh.f32 %v717_v61  ;;  %v390_v61 = vld [vmem:[%s9055_s5 + $0xe8] sm:$0xff] }
 0x11b   :  { %v7621_v10 = vpack.c.bf16 %v396_v15, %v390_v61  ;;  %v407_v61 = vld [vmem:[%s9055_s5 + $0x170] sm:$0xff]  ;;  %v414_v15 = vld [vmem:[%s9055_s5 + $0x1a8] sm:$0xff] }
 0x124   :  { %v6462_v0 = vpop.eup %6461 }
 0x125   :  { %v720_v34 = vmul.f32 %v6462_v0, %v719_v52  ;;  %v7617_v52 = vpack.c.bf16 %v383_v59, %v377_v1  ;;  %v395_v0 = vld [vmem:[%s9055_s5 + $0x110] sm:$0xff]  ;;  %v7644_v1 = vpack.c.bf16 %v408_v21, %v402_v6  ;;  %v401_v59 = vld [vmem:[%s9055_s5 + $0x140] sm:$0xff] }
 0x126   :  { %v413_v21 = vld [vmem:[%s9055_s5 + $0x1a0] sm:$0xff] }
 0x127   :  { %v7597_v46 = vadd.f32 %v721_v13, %v720_v34  ;;  %v9457_v13 = vmov 0.0   ;;  %v7640_v34 = vpack.c.bf16 %v395_v0, %v389_v44  ;;  %v420_v44 = vld [vmem:[%s9055_s5 + $0x1d8] sm:$0xff]  ;;  %v7660_v0 = vpack.c.bf16 %v407_v61, %v401_v59 }
 0x128   :  { %v7664_v6 = vpack.c.bf16 %v420_v44, %v414_v15  ;;  %v432_v59 = vld [vmem:[%s9055_s5 + $0x238] sm:$0xff]  ;;  %v425_v44 = vld [vmem:[%s9055_s5 + $0x200] sm:$0xff] }
 0x129   :  { %819 = vmatmul.mubr.f32.vlgmr.msra.gmra.mrb[16].mxu0 %v7597_v46  ;;  %890 = vmatmul.mubr.f32.vlgmr.msra.gmra.mrb[10].mxu1 %v7597_v46 }
 0x12a   :  { %4596 = vmatpush1.bf16.msra.mxu0 %v7595_v11  ;;  %4691 = vmatpush3.bf16.msra.mxu1 %v6774_v35  ;;  %9458 = vst [vmem:[#allocation98_spill] sm:$0xff] %v7664_v6  ;;  %v431_v35 = vld [vmem:[%s9055_s5 + $0x230] sm:$0xff] }
 0x12b   :  { %4598 = vmatprep.subr.bf16.mxu0 %v7599_v2  ;;  %4692 = vmatprep.subr.bf16.mxu1 %v9448_v31 }
 0x12c   :  { %4161 = vmatprep.mubr.msk.f32.mxu1 %vm6617_vm2, %v9457_v13  ;;  %960 = vmatprep.mubr.f32.mxu0 %v9457_v13 }
 0x12e   :  { %4600 = vmatpush1.bf16.msra.mxu0 %v7617_v52  ;;  %4694 = vmatpush3.bf16.msra.mxu1 %v6806_v45  ;;  %v419_v45 = vld [vmem:[%s9055_s5 + $0x1d0] sm:$0xff] }
 0x12f   :  { %4602 = vmatprep.subr.bf16.mxu0 %v7621_v10  ;;  %4695 = vmatprep.subr.bf16.mxu1 %v9448_v31  ;;  %v7680_v61 = vpack.c.bf16 %v419_v45, %v413_v21  ;;  %v444_v45 = vld [vmem:[%s9055_s5 + $0x298] sm:$0xff] }
 0x132   :  { %4604 = vmatpush1.bf16.msra.mxu0 %v7640_v34  ;;  %4697 = vmatpush3.bf16.msra.mxu1 %v6841_v55  ;;  %v426_v55 = vld [vmem:[%s9055_s5 + $0x208] sm:$0xff] }
 0x133   :  { %4606 = vmatprep.subr.bf16.mxu0 %v7644_v1  ;;  %4698 = vmatprep.subr.bf16.mxu1 %v9448_v31  ;;  %v7684_v15 = vpack.c.bf16 %v432_v59, %v426_v55  ;;  %v7700_v55 = vpack.c.bf16 %v431_v35, %v425_v44  ;;  %v437_v59 = vld [vmem:[%s9055_s5 + $0x260] sm:$0xff]  ;;  %v456_v35 = vld [vmem:[%s9055_s5 + $0x2f8] sm:$0xff] }
 0x135   :  { %9459 = vst [vmem:[#allocation99_spill] sm:$0xff] %v7684_v15 }
 0x136   :  { %4608 = vmatpush1.bf16.msra.mxu0 %v7660_v0  ;;  %4700 = vmatpush3.bf16.msra.mxu1 %v6879_v3  ;;  %v438_v3 = vld [vmem:[%s9055_s5 + $0x268] sm:$0xff] }
 0x137   :  { %4610 = vmatprep.subr.bf16.mxu0 %v7664_v6  ;;  %4701 = vmatprep.subr.bf16.mxu1 %v9448_v31  ;;  %v7704_v21 = vpack.c.bf16 %v444_v45, %v438_v3  ;;  %v443_v6 = vld [vmem:[%s9055_s5 + $0x290] sm:$0xff]  ;;  %v449_v45 = vld [vmem:[%s9055_s5 + $0x2c0] sm:$0xff] }
 0x138   :  { %v7720_v3 = vpack.c.bf16 %v443_v6, %v437_v59  ;;  %v468_v6 = vld [vmem:[%s9055_s5 + $0x358] sm:$0xff] }
 0x139   :  { %9460 = vst [vmem:[#allocation100_spill] sm:$0xff] %v7704_v21 }
 0x13a   :  { %4612 = vmatpush1.bf16.msra.mxu0 %v7680_v61  ;;  %4703 = vmatpush3.bf16.msra.mxu1 %v6908_v14  ;;  %v450_v14 = vld [vmem:[%s9055_s5 + $0x2c8] sm:$0xff] }
 0x13b   :  { %4614 = vmatprep.subr.bf16.mxu0 %v7684_v15  ;;  %4704 = vmatprep.subr.bf16.mxu1 %v9448_v31  ;;  %v7724_v44 = vpack.c.bf16 %v456_v35, %v450_v14  ;;  %v455_v15 = vld [vmem:[%s9055_s5 + $0x2f0] sm:$0xff]  ;;  %v461_v35 = vld [vmem:[%s9055_s5 + $0x320] sm:$0xff] }
 0x13c   :  { %v7740_v14 = vpack.c.bf16 %v455_v15, %v449_v45  ;;  %v480_v15 = vld [vmem:[%s9055_s5 + $0x3b8] sm:$0xff] }
 0x13e   :  { %4616 = vmatpush1.bf16.msra.mxu0 %v7700_v55  ;;  %4706 = vmatpush3.bf16.msra.mxu1 %v6940_v26  ;;  %v462_v26 = vld [vmem:[%s9055_s5 + $0x328] sm:$0xff] }
 0x13f   :  { %4618 = vmatprep.subr.bf16.mxu0 %v7704_v21  ;;  %4707 = vmatprep.subr.bf16.mxu1 %v9448_v31  ;;  %v7744_v59 = vpack.c.bf16 %v468_v6, %v462_v26  ;;  %v467_v21 = vld [vmem:[%s9055_s5 + $0x350] sm:$0xff]  ;;  %v473_v6 = vld [vmem:[%s9055_s5 + $0x380] sm:$0xff] }
 0x140   :  { %v7760_v26 = vpack.c.bf16 %v467_v21, %v461_v35  ;;  %v492_v21 = vld [vmem:[%s9055_s5 + $0x418] sm:$0xff] }
 0x142   :  { %4620 = vmatpush1.bf16.msra.mxu0 %v7720_v3  ;;  %4709 = vmatpush3.bf16.msra.mxu1 %v6970_v40  ;;  %v474_v40 = vld [vmem:[%s9055_s5 + $0x388] sm:$0xff] }
 0x143   :  { %4622 = vmatprep.subr.bf16.mxu0 %v7724_v44  ;;  %4710 = vmatprep.subr.bf16.mxu1 %v9448_v31  ;;  %v7763_v45 = vpack.c.bf16 %v480_v15, %v474_v40  ;;  %v479_v31 = vld [vmem:[%s9055_s5 + $0x3b0] sm:$0xff]  ;;  %v485_v15 = vld [vmem:[%s9055_s5 + $0x3e0] sm:$0xff] }
 0x144   :  { %v7780_v40 = vpack.c.bf16 %v479_v31, %v473_v6  ;;  %v498_v31 = vld [vmem:[%s9055_s5 + $0x448] sm:$0xff]  ;;  %v504_v6 = vld [vmem:[%s9055_s5 + $0x478] sm:$0xff] }
 0x145   :  { %9461 = vst [vmem:[#allocation101_spill] sm:$0xff] %v7763_v45 }
 0x146   :  { %4624 = vmatpush1.bf16.msra.mxu0 %v7740_v14  ;;  %4712 = vmatpush3.bf16.msra.mxu1 %v7006_v54  ;;  %v486_v54 = vld [vmem:[%s9055_s5 + $0x3e8] sm:$0xff]  ;;  %9462 = vst [vmem:[#allocation102_spill] sm:$0xff] %v7780_v40 }
 0x147   :  { %4626 = vmatprep.subr.bf16.mxu0 %v7744_v59  ;;  %4714 = vmatprep.subr.bf16.mxu1 %v6931_v22  ;;  %v7784_v35 = vpack.c.bf16 %v492_v21, %v486_v54  ;;  %v491_v22 = vld [vmem:[%s9055_s5 + $0x410] sm:$0xff]  ;;  %v7804_v21 = vpack.c.bf16 %v504_v6, %v498_v31 }
 0x148   :  { %v7800_v54 = vpack.c.bf16 %v491_v22, %v485_v15  ;;  %v510_v22 = vld [vmem:[%s9055_s5 + $0x4a8] sm:$0xff]  ;;  %v516_v15 = vld [vmem:[%s9055_s5 + $0x4d8] sm:$0xff] }
 0x149   :  { %4162 = vmatmul.mubr.f32.vlgmr.msra.gmra.mrb[12].mxu1 %v7597_v46  ;;  %9463 = vst [vmem:[#allocation103_spill] sm:$0xff] %v7784_v35  ;;  %9465 = vst [vmem:[#allocation105_spill] sm:$0xff] %v7804_v21  ;;  %v7824_v6 = vpack.c.bf16 %v516_v15, %v510_v22 }
 0x14a   :  { %4628 = vmatpush1.bf16.msra.mxu0 %v7760_v26  ;;  %4716 = vmatpush1.bf16.msra.mxu1 %v6958_v32  ;;  %9464 = vst [vmem:[#allocation104_spill] sm:$0xff] %v7800_v54 }
 0x14b   :  { %4630 = vmatprep.subr.bf16.mxu0 %v7763_v45  ;;  %4718 = vmatprep.subr.bf16.mxu1 %v6961_v33  ;;  %v497_v33 = vld [vmem:[%s9055_s5 + $0x440] sm:$0xff]  ;;  %v503_v45 = vld [vmem:[%s9055_s5 + $0x470] sm:$0xff]  ;;  %9467 = vst [vmem:[#allocation107_spill] sm:$0xff] %v7824_v6 }
 0x14c   :  { %v7820_v31 = vpack.c.bf16 %v503_v45, %v497_v33  ;;  %v522_v33 = vld [vmem:[%s9055_s5 + $0x508] sm:$0xff]  ;;  %v528_v45 = vld [vmem:[%s9055_s5 + $0x538] sm:$0xff] }
 0x14d   :  { %v7844_v15 = vpack.c.bf16 %v528_v45, %v522_v33 }
 0x14e   :  { %4632 = vmatpush1.bf16.msra.mxu0 %v7780_v40  ;;  %4720 = vmatpush1.bf16.msra.mxu1 %v6993_v48  ;;  %9466 = vst [vmem:[#allocation106_spill] sm:$0xff] %v7820_v31 }
 0x14f   :  { %4634 = vmatprep.subr.bf16.mxu0 %v7784_v35  ;;  %4722 = vmatprep.subr.bf16.mxu1 %v6997_v51  ;;  %v509_v51 = vld [vmem:[%s9055_s5 + $0x4a0] sm:$0xff]  ;;  %v515_v35 = vld [vmem:[%s9055_s5 + $0x4d0] sm:$0xff]  ;;  %9469 = vst [vmem:[#allocation109_spill] sm:$0xff] %v7844_v15 }
 0x150   :  { %v7840_v22 = vpack.c.bf16 %v515_v35, %v509_v51  ;;  %v534_v51 = vld [vmem:[%s9055_s5 + $0x568] sm:$0xff]  ;;  %v540_v35 = vld [vmem:[%s9055_s5 + $0x598] sm:$0xff] }
 0x151   :  { %v7864_v45 = vpack.c.bf16 %v540_v35, %v534_v51 }
 0x152   :  { %4636 = vmatpush1.bf16.msra.mxu0 %v7800_v54  ;;  %4724 = vmatpush1.bf16.msra.mxu1 %v7024_v63  ;;  %9468 = vst [vmem:[#allocation108_spill] sm:$0xff] %v7840_v22 }
 0x153   :  { %4638 = vmatprep.subr.bf16.mxu0 %v7804_v21  ;;  %4726 = vmatprep.subr.bf16.mxu1 %v7074_v29  ;;  %v521_v29 = vld [vmem:[%s9055_s5 + $0x500] sm:$0xff]  ;;  %v527_v21 = vld [vmem:[%s9055_s5 + $0x530] sm:$0xff]  ;;  %9471 = vst [vmem:[#allocation111_spill] sm:$0xff] %v7864_v45 }
 0x154   :  { %v7860_v33 = vpack.c.bf16 %v527_v21, %v521_v29  ;;  %v546_v29 = vld [vmem:[%s9055_s5 + $0x5c8] sm:$0xff]  ;;  %v552_v21 = vld [vmem:[%s9055_s5 + $0x5f8] sm:$0xff] }
 0x155   :  { %v7884_v35 = vpack.c.bf16 %v552_v21, %v546_v29  ;;  %v9478_v29 = vld [vmem:[#allocation79_spill] sm:$0xff]  ;;  %v9479_v21 = vld [vmem:[#allocation81_spill] sm:$0xff] }
 0x156   :  { %4640 = vmatpush1.bf16.msra.mxu0 %v7820_v31  ;;  %4728 = vmatpush1.bf16.msra.mxu1 %v7087_v41  ;;  %9470 = vst [vmem:[#allocation110_spill] sm:$0xff] %v7860_v33 }
 0x157   :  { %4642 = vmatprep.subr.bf16.mxu0 %v7824_v6  ;;  %4730 = vmatprep.subr.bf16.mxu1 %v7112_v57  ;;  %v533_v57 = vld [vmem:[%s9055_s5 + $0x560] sm:$0xff]  ;;  %v539_v6 = vld [vmem:[%s9055_s5 + $0x590] sm:$0xff]  ;;  %9473 = vst [vmem:[#allocation113_spill] sm:$0xff] %v7884_v35 }
 0x158   :  { %v7880_v51 = vpack.c.bf16 %v539_v6, %v533_v57  ;;  %v9476_v6 = vld [vmem:[#allocation16_spill] sm:$0xff] }
 0x15a   :  { %4644 = vmatpush1.bf16.msra.mxu0 %v7840_v22  ;;  %4732 = vmatpush1.bf16.msra.mxu1 %v7128_v5  ;;  %9472 = vst [vmem:[#allocation112_spill] sm:$0xff] %v7880_v51 }
 0x15b   :  { %4646 = vmatprep.subr.bf16.mxu0 %v7844_v15  ;;  %4734 = vmatprep.subr.bf16.mxu1 %v7146_v24  ;;  %v545_v24 = vld [vmem:[%s9055_s5 + $0x5c0] sm:$0xff]  ;;  %v551_v15 = vld [vmem:[%s9055_s5 + $0x5f0] sm:$0xff] }
 0x15c   :  { %v7894_v57 = vpack.c.bf16 %v551_v15, %v545_v24  ;;  %v9475_v24 = vld [vmem:[#allocation77_spill] sm:$0xff] }
 0x15d   :  { %v9477_v15 = vld [vmem:[#allocation17_spill] sm:$0xff] }
 0x15e   :  { %4648 = vmatpush1.bf16.msra.mxu0 %v7860_v33  ;;  %4736 = vmatpush1.bf16.msra.mxu1 %v7159_v42  ;;  %9474 = vst [vmem:[#allocation114_spill] sm:$0xff] %v7894_v57 }
 0x15f   :  { %4650 = vmatprep.subr.bf16.mxu0 %v7864_v45  ;;  %4738 = vmatprep.subr.bf16.mxu1 %v7182_v62  ;;  %v9522_v62 = vsub.s32 1, %v7543_v47 }
 0x162   :  { %4652 = vmatpush1.bf16.msra.mxu0 %v7880_v51  ;;  %4740 = vmatpush1.bf16.msra.mxu1 %v7195_v23 }
 0x163   :  { %4654 = vmatprep.subr.bf16.mxu0 %v7884_v35  ;;  %4742 = vmatprep.subr.bf16.mxu1 %v7218_v53 }
 0x166   :  { %4656 = vmatpush1.bf16.msra.mxu0 %v7894_v57  ;;  %4744 = vmatpush1.bf16.msra.mxu1 %v7231_v28  ;;  %v9498_v28 = vld [vmem:[#allocation48_spill] sm:$0xff] }
 0x167   :  { %4658 = vmatprep.subr.bf16.mxu0 %v6688_v8  ;;  %4746 = vmatprep.subr.bf16.mxu1 %v7254_v7  ;;  %v9494_v7 = vld [vmem:[#allocation40_spill] sm:$0xff] }
 0x169   :  { %961 = vmatmul.mubr.f32.vlgmr.msra.gmra.mrb[18].mxu0 %v7597_v46 }
 0x16a   :  { %4660 = vmatpush1.bf16.msra.mxu0 %v6690_v9  ;;  %1052 = vmatprep.mubr.f32.mxu0 %v9457_v13 }
 0x16b   :  { %4662 = vmatprep.subr.bf16.mxu0 %v6699_v12  ;;  %4748 = vmatpush1.bf16.msra.mxu1 %v7267_v16  ;;  %v9491_v16 = vld [vmem:[#allocation35_spill] sm:$0xff] }
 0x16c   :  { %4750 = vmatprep.subr.bf16.mxu1 %v7290_v43  ;;  %v9490_v43 = vld [vmem:[#allocation34_spill] sm:$0xff] }
 0x16e   :  { %4664 = vmatpush1.bf16.msra.mxu0 %v6721_v18 }
 0x16f   :  { %4666 = vmatprep.subr.bf16.mxu0 %v6724_v19  ;;  %4752 = vmatpush1.bf16.msra.mxu1 %v7303_v17  ;;  %v9487_v17 = vld [vmem:[#allocation89_spill] sm:$0xff] }
 0x170   :  { %4754 = vmatprep.subr.bf16.mxu1 %v7326_v60  ;;  %v9484_v60 = vld [vmem:[#allocation22_spill] sm:$0xff] }
 0x172   :  { %4668 = vmatpush1.bf16.msra.mxu0 %v6744_v25 }
 0x173   :  { %4670 = vmatprep.subr.bf16.mxu0 %v6750_v27  ;;  %4756 = vmatpush1.bf16.msra.mxu1 %v7339_v36  ;;  %v9483_v36 = vld [vmem:[#allocation85_spill] sm:$0xff] }
 0x174   :  { %4758 = vmatprep.subr.bf16.mxu1 %v7362_v4  ;;  %v9480_v4 = vld [vmem:[#allocation19_spill] sm:$0xff] }
 0x176   :  { %4672 = vmatpush1.bf16.msra.mxu0 %v6781_v37 }
 0x177   :  { %4674 = vmatprep.subr.bf16.mxu0 %v6787_v39  ;;  %4760 = vmatpush1.bf16.msra.mxu1 %v7375_v58  ;;  %v9481_v58 = vld [vmem:[#allocation20_spill] sm:$0xff] }
 0x178   :  { %4762 = vmatprep.subr.bf16.mxu1 %v7398_v30  ;;  %v9482_v30 = vld [vmem:[#allocation83_spill] sm:$0xff] }
 0x17a   :  { %4676 = vmatpush1.bf16.msra.mxu0 %v6822_v49 }
 0x17b   :  { %4678 = vmatprep.subr.bf16.mxu0 %v6825_v50  ;;  %4764 = vmatpush1.bf16.msra.mxu1 %v7411_v38  ;;  %v9485_v38 = vld [vmem:[#allocation30_spill] sm:$0xff] }
 0x17c   :  { %4766 = vmatprep.subr.bf16.mxu1 %v9475_v24  ;;  %v9486_v24 = vld [vmem:[#allocation87_spill] sm:$0xff] }
 0x17e   :  { %4680 = vmatpush1.bf16.msra.mxu0 %v9476_v6 }
 0x17f   :  { %4682 = vmatprep.subr.bf16.mxu0 %v9477_v15  ;;  %4768 = vmatpush1.bf16.msra.mxu1 %v9478_v29  ;;  %v9488_v29 = vld [vmem:[#allocation32_spill] sm:$0xff] }
 0x180   :  { %4770 = vmatprep.subr.bf16.mxu1 %v9479_v21  ;;  %v9489_v21 = vld [vmem:[#allocation33_spill] sm:$0xff] }
 0x182   :  { %4684 = vmatpush1.bf16.msra.mxu0 %v9480_v4 }
 0x183   :  { %4686 = vmatprep.subr.bf16.mxu0 %v9481_v58  ;;  %4772 = vmatpush1.bf16.msra.mxu1 %v9482_v30  ;;  %v9492_v30 = vld [vmem:[#allocation36_spill] sm:$0xff] }
 0x184   :  { %4774 = vmatprep.subr.bf16.mxu1 %v9483_v36  ;;  %v9493_v36 = vld [vmem:[#allocation38_spill] sm:$0xff] }
 0x186   :  { %4688 = vmatpush1.bf16.msra.mxu0 %v9484_v60 }
 0x187   :  { %4778 = vmatprep.subr.bf16.mxu0 %v9485_v38  ;;  %4776 = vmatpush1.bf16.msra.mxu1 %v9486_v24  ;;  %v9495_v38 = vld [vmem:[#allocation42_spill] sm:$0xff]  ;;  %v9496_v24 = vld [vmem:[#allocation44_spill] sm:$0xff] }
 0x188   :  { %4842 = vmatprep.subr.bf16.mxu1 %v9487_v17  ;;  %v9497_v17 = vld [vmem:[#allocation46_spill] sm:$0xff] }
 0x189   :  { %1053 = vmatmul.mubr.f32.vlgmr.msra.gmra.mrb[2].mxu0 %v7597_v46 }
 0x18a   :  { %4780 = vmatpush1.bf16.msra.mxu0 %v9488_v29  ;;  %v9499_v29 = vld [vmem:[#allocation50_spill] sm:$0xff] }
 0x18b   :  { %4782 = vmatprep.subr.bf16.mxu0 %v9489_v21  ;;  %v9500_v21 = vld [vmem:[#allocation52_spill] sm:$0xff] }
 0x18e   :  { %4784 = vmatpush1.bf16.msra.mxu0 %v9490_v43  ;;  %v9501_v43 = vld [vmem:[#allocation54_spill] sm:$0xff] }
 0x18f   :  { %4786 = vmatprep.subr.bf16.mxu0 %v9491_v16  ;;  %v9502_v16 = vld [vmem:[#allocation56_spill] sm:$0xff] }
 0x192   :  { %4788 = vmatpush1.bf16.msra.mxu0 %v9492_v30  ;;  %v9503_v30 = vld [vmem:[#allocation58_spill] sm:$0xff] }
 0x193   :  { %4790 = vmatprep.subr.bf16.mxu0 %v9493_v36  ;;  %v9504_v36 = vld [vmem:[#allocation60_spill] sm:$0xff] }
 0x196   :  { %4792 = vmatpush1.bf16.msra.mxu0 %v9494_v7  ;;  %v9505_v7 = vld [vmem:[#allocation62_spill] sm:$0xff] }
 0x197   :  { %4794 = vmatprep.subr.bf16.mxu0 %v9495_v38  ;;  %v9506_v38 = vld [vmem:[#allocation64_spill] sm:$0xff] }
 0x19a   :  { %4796 = vmatpush1.bf16.msra.mxu0 %v9496_v24  ;;  %v9507_v24 = vld [vmem:[#allocation66_spill] sm:$0xff] }
 0x19b   :  { %4798 = vmatprep.subr.bf16.mxu0 %v9497_v17  ;;  %v9508_v17 = vld [vmem:[#allocation68_spill] sm:$0xff] }
 0x19e   :  { %4800 = vmatpush1.bf16.msra.mxu0 %v9498_v28  ;;  %v9509_v28 = vld [vmem:[#allocation70_spill] sm:$0xff] }
 0x19f   :  { %4802 = vmatprep.subr.bf16.mxu0 %v9499_v29  ;;  %v9510_v29 = vld [vmem:[#allocation72_spill] sm:$0xff] }
 0x1a2   :  { %4804 = vmatpush1.bf16.msra.mxu0 %v9500_v21  ;;  %v9511_v21 = vld [vmem:[#allocation74_spill] sm:$0xff] }
 0x1a3   :  { %4806 = vmatprep.subr.bf16.mxu0 %v9501_v43  ;;  %v9512_v43 = vld [vmem:[#allocation76_spill] sm:$0xff] }
 0x1a6   :  { %4808 = vmatpush1.bf16.msra.mxu0 %v9502_v16  ;;  %v9513_v16 = vld [vmem:[#allocation78_spill] sm:$0xff] }
 0x1a7   :  { %4810 = vmatprep.subr.bf16.mxu0 %v9503_v30  ;;  %v9514_v30 = vld [vmem:[#allocation80_spill] sm:$0xff] }
 0x1aa   :  { %4812 = vmatpush1.bf16.msra.mxu0 %v9504_v36  ;;  %v9515_v36 = vld [vmem:[#allocation82_spill] sm:$0xff] }
 0x1ab   :  { %4814 = vmatprep.subr.bf16.mxu0 %v9505_v7  ;;  %v9516_v7 = vld [vmem:[#allocation84_spill] sm:$0xff] }
 0x1ae   :  { %4816 = vmatpush1.bf16.msra.mxu0 %v9506_v38  ;;  %v9517_v38 = vld [vmem:[#allocation86_spill] sm:$0xff] }
 0x1af   :  { %4818 = vmatprep.subr.bf16.mxu0 %v9507_v24  ;;  %v9518_v24 = vld [vmem:[#allocation88_spill] sm:$0xff] }
 0x1b2   :  { %4820 = vmatpush1.bf16.msra.mxu0 %v9508_v17 }
 0x1b3   :  { %4822 = vmatprep.subr.bf16.mxu0 %v9509_v28 }
 0x1b6   :  { %4824 = vmatpush1.bf16.msra.mxu0 %v9510_v29 }
 0x1b7   :  { %4826 = vmatprep.subr.bf16.mxu0 %v9511_v21  ;;  %v553_v21 = vld [vmem:[%s9058_s6] sm:$0x3f] }
 0x1b8   :  { %v7986_v45 = vrot.slane %v553_v21, %v9522_v62 }
 0x1ba   :  { %4828 = vmatpush1.bf16.msra.mxu0 %v9512_v43  ;;  %v738_v43 = vsub.s32 3, %v7543_v47  ;;  %9523 = vst [vmem:[#allocation117_spill] sm:$0xff] %v7986_v45 }
 0x1bb   :  { %4830 = vmatprep.subr.bf16.mxu0 %v9513_v16  ;;  %v9519_v16 = vsub.s32 0, %v7543_v47 }
 0x1bd   :  { %v7976_v29 = vrot.slane %v553_v21, %v9519_v16  ;;  %v742_v16 = vsub.s32 4, %v7543_v47 }
 0x1be   :  { %4832 = vmatpush1.bf16.msra.mxu0 %v9514_v30  ;;  %v7978_v30 = vrot.slane %v553_v21, %v738_v43  ;;  %v746_v43 = vsub.s32 5, %v7543_v47 }
 0x1bf   :  { %4834 = vmatprep.subr.bf16.mxu0 %v9515_v36  ;;  %9520 = vst [vmem:[#allocation115_spill] sm:$0xff] %v7976_v29 }
 0x1c0   :  { %9521 = vst [vmem:[#allocation116_spill] sm:$0xff] %v7978_v30 }
 0x1c2   :  { %4836 = vmatpush1.bf16.msra.mxu0 %v9516_v7 }
 0x1c3   :  { %4838 = vmatprep.subr.bf16.mxu0 %v9517_v38 }
 0x1c6   :  { %4840 = vmatpush1.bf16.msra.mxu0 %v9518_v24 }
 0x1c7   :  { %4906 = vmatprep.subr.bf16.mxu0 %v6688_v8 }
 0x1fc   :  { %v820_v36 = vpop.f32.mrb[16].mxu0  ;;  %v891_v7 = vpop.f32.mrb[10].mxu1 }
 0x1fd   :  { %v821_v38 = vadd.f32 %v820_v36, %v7976_v29  ;;  %v822_v28 = vpop.f32.mrb[17].mxu0  ;;  %v893_v24 = vpop.f32.mrb[11].mxu1  ;;  %v7988_v36 = vrot.slane %v553_v21, %v742_v16  ;;  %v7990_v29 = vrot.slane %v553_v21, %v746_v43 }
 0x1fe   :  { %v894_v8 = vadd.f32 %v893_v24, %v7978_v30 }
 0x1ff   :  { %9524 = vst [vmem:[#allocation118_spill] sm:$0xff] %v7988_v36  ;;  %9525 = vst [vmem:[#allocation119_spill] sm:$0xff] %v7990_v29 }
 0x200   :  { %v967_v17 = vadd.f32 %v894_v8, %v821_v38  ;;  %v9526_v8 = vsub.s32 2, %v7543_v47 }
 0x202   :  { %v3887_v35 = vmul.f32 -1.442695, %v967_v17  ;;  %v7994_v38 = vrot.slane %v553_v21, %v9526_v8 }
 0x204   :  { %6463 = vpow2.f32 %v3887_v35  ;;  %v892_v62 = vadd.f32 %v891_v7, %v7994_v38 }
 0x20e   :  { %v6464_v23 = vpop.eup %6463 }
 0x20f   :  { %v971_v51 = vadd.f32 1.0, %v6464_v23  ;;  %v823_v23 = vadd.f32 %v822_v28, %v7986_v45 }
 0x211   :  { %6465 = vrcp.f32 %v971_v51 }
 0x21b   :  { %v6466_v24 = vpop.eup %6465 }
 0x21c   :  { %v1125_v57 = vpop.f32.mrb[12].mxu1 }
 0x21d   :  { %v4163_v53 = vpop.f32.mrb[13].mxu1 }
 0x23c   :  { %v962_v17 = vpop.f32.mrb[18].mxu0 }
 0x23d   :  { %v963_v53 = vadd.f32 %v962_v17, %v7988_v36  ;;  %v964_v51 = vpop.f32.mrb[19].mxu0  ;;  %v9527_v17 = vld [vmem:[#allocation97_spill] sm:$0xff] }
 0x23e   :  { %v965_v35 = vadd.f32 %v964_v51, %v7990_v29 }
 0x23f   :  { %v974_v30 = vadd.f32 %v963_v53, %v823_v23 }
 0x240   :  { %v981_v16 = vmul.f32 %v6466_v24, %v965_v35  ;;  %v1143_v24 = vadd.f32 %v7580_v56, %v1125_v57  ;;  %v9530_v57 = vld [vmem:[#allocation99_spill] sm:$0xff] }
 0x241   :  { %v3888_v42 = vmul.f32 -1.442695, %v974_v30 }
 0x242   :  { %v982_v43 = vadd.f32 %v981_v16, %v892_v62 }
 0x243   :  { %6467 = vpow2.f32 %v3888_v42 }
 0x24d   :  { %v6468_v33 = vpop.eup %6467 }
 0x24e   :  { %v978_v47 = vadd.f32 1.0, %v6468_v33 }
 0x250   :  { %6469 = vrcp.f32 %v978_v47 }
 0x251   :  { %6471 = vtanh.f32 %v982_v43 }
 0x25a   :  { %v6470_v21 = vpop.eup %6469 }
 0x25b   :  { %v984_v8 = vsub.f32 1.0, %v6470_v21  ;;  %v6472_v28 = vpop.eup %6471  ;;  %v986_v29 = vmul.f32 0.0, %v6470_v21 }
 0x25c   :  { %v1054_v45 = vpop.f32.mrb[2].mxu0 }
 0x25d   :  { %v6419_v36 = vadd.f32 %v1054_v45, %v9527_v17  ;;  %v1056_v5 = vpop.f32.mrb[3].mxu0  ;;  %v985_v51 = vmul.f32 %v6472_v28, %v984_v8 }
 0x25e   :  { %v6420_v7 = vadd.f32 %v1056_v5, %v7573_v20 }
 0x25f   :  { %v3889_v23 = vmul.f32 -1.442695, %v6419_v36  ;;  %v8001_v53 = vadd.f32 %v986_v29, %v985_v51  ;;  %v9528_v29 = vld [vmem:[#allocation90_spill] sm:$0xff]  ;;  %v9531_v51 = vld [vmem:[#allocation100_spill] sm:$0xff] }
 0x260   :  { %v3890_v42 = vmul.f32 -1.442695, %v6420_v7  ;;  %v9533_v7 = vld [vmem:[#allocation101_spill] sm:$0xff] }
 0x261   :  { %6473 = vpow2.f32 %v3889_v23  ;;  %1215 = vmatprep.mubr.f32.mxu1 %v8001_v53  ;;  %1286 = vmatprep.mubr.f32.mxu0 %v8001_v53  ;;  %v9532_v23 = vld [vmem:[#allocation23_spill] sm:$0xff] }
 0x262   :  { %6475 = vpow2.f32 %v3890_v42  ;;  %v9534_v42 = vld [vmem:[#allocation25_spill] sm:$0xff] }
 0x26b   :  { %v6474_v30 = vpop.eup %6473 }
 0x26c   :  { %v1133_v33 = vadd.f32 1.0, %v6474_v30  ;;  %v6476_v35 = vpop.eup %6475  ;;  %v9535_v30 = vld [vmem:[#allocation103_spill] sm:$0xff] }
 0x26d   :  { %v1140_v45 = vadd.f32 1.0, %v6476_v35  ;;  %v9537_v35 = vld [vmem:[#allocation105_spill] sm:$0xff] }
 0x26e   :  { %6477 = vrcp.f32 %v1133_v33  ;;  %v9536_v33 = vld [vmem:[#allocation28_spill] sm:$0xff] }
 0x26f   :  { %6479 = vrcp.f32 %v1140_v45  ;;  %v9538_v45 = vld [vmem:[#allocation37_spill] sm:$0xff] }
 0x278   :  { %v6478_v62 = vpop.eup %6477 }
 0x279   :  { %v1144_v36 = vmul.f32 %v6478_v62, %v1143_v24  ;;  %v6480_v5 = vpop.eup %6479  ;;  %v9539_v24 = vld [vmem:[#allocation107_spill] sm:$0xff]  ;;  %v9540_v62 = vld [vmem:[#allocation41_spill] sm:$0xff] }
 0x27a   :  { %v1147_v43 = vsub.f32 1.0, %v6480_v5  ;;  %v1149_v8 = vmul.f32 %v6480_v5, %v7597_v46  ;;  %v9529_v46 = vld [vmem:[#allocation98_spill] sm:$0xff] }
 0x27b   :  { %v1145_v16 = vadd.f32 %v1144_v36, %v9528_v29  ;;  %v9541_v36 = vld [vmem:[#allocation43_spill] sm:$0xff]  ;;  %v9542_v29 = vld [vmem:[#allocation109_spill] sm:$0xff]  ;;  %v9544_v5 = vld [vmem:[#allocation110_spill] sm:$0xff] }
 0x27d   :  { %6481 = vtanh.f32 %v1145_v16  ;;  %v9543_v16 = vld [vmem:[#allocation45_spill] sm:$0xff] }
 0x287   :  { %v6482_v47 = vpop.eup %6481 }
 0x288   :  { %v1148_v21 = vmul.f32 %v6482_v47, %v1147_v43  ;;  %v9545_v43 = vld [vmem:[#allocation47_spill] sm:$0xff] }
 0x289   :  { %v9546_v47 = vld [vmem:[#allocation111_spill] sm:$0xff] }
 0x28a   :  { %v8009_v28 = vadd.f32 %v1149_v8, %v1148_v21  ;;  %v9547_v21 = vld [vmem:[#allocation49_spill] sm:$0xff]  ;;  %v9548_v8 = vld [vmem:[#allocation112_spill] sm:$0xff] }
 0x28c   :  { %1216 = vmatmul.mubr.f32.vlgmr.msra.gmra.mrb[14].mxu1 %v8009_v28  ;;  %1287 = vmatmul.mubr.f32.vlgmr.msra.gmra.mrb[20].mxu0 %v8009_v28 }
 0x28d   :  { %4844 = vmatpush1.bf16.msra.mxu1 %v7595_v11  ;;  %4908 = vmatpush1.bf16.msra.mxu0 %v6690_v9  ;;  %v9563_v9 = vld [vmem:[#allocation67_spill] sm:$0xff] }
 0x28e   :  { %1357 = vmatprep.mubr.f32.mxu1 %v8001_v53  ;;  %4846 = vmatprep.subr.bf16.mxu1 %v7599_v2 }
 0x28f   :  { %4910 = vmatprep.subr.bf16.mxu0 %v6699_v12  ;;  %1449 = vmatprep.mubr.f32.mxu0 %v9457_v13  ;;  %v9562_v12 = vld [vmem:[#allocation15_spill] sm:$0xff] }
 0x291   :  { %4848 = vmatpush1.bf16.msra.mxu1 %v7617_v52  ;;  %4912 = vmatpush1.bf16.msra.mxu0 %v6721_v18  ;;  %v9561_v18 = vld [vmem:[#allocation65_spill] sm:$0xff] }
 0x292   :  { %4850 = vmatprep.subr.bf16.mxu1 %v7621_v10  ;;  %4914 = vmatprep.subr.bf16.mxu0 %v6724_v19  ;;  %v9560_v19 = vld [vmem:[#allocation63_spill] sm:$0xff] }
 0x295   :  { %4852 = vmatpush1.bf16.msra.mxu1 %v7640_v34  ;;  %4916 = vmatpush1.bf16.msra.mxu0 %v6744_v25  ;;  %v9559_v25 = vld [vmem:[#allocation12_spill] sm:$0xff] }
 0x296   :  { %4854 = vmatprep.subr.bf16.mxu1 %v7644_v1  ;;  %4918 = vmatprep.subr.bf16.mxu0 %v6750_v27  ;;  %v9558_v27 = vld [vmem:[#allocation61_spill] sm:$0xff] }
 0x299   :  { %4856 = vmatpush1.bf16.msra.mxu1 %v7660_v0  ;;  %4920 = vmatpush1.bf16.msra.mxu0 %v6781_v37  ;;  %v9557_v37 = vld [vmem:[#allocation59_spill] sm:$0xff] }
 0x29a   :  { %4858 = vmatprep.subr.bf16.mxu1 %v9529_v46  ;;  %4922 = vmatprep.subr.bf16.mxu0 %v6787_v39  ;;  %v9556_v39 = vld [vmem:[#allocation9_spill] sm:$0xff] }
 0x29d   :  { %4860 = vmatpush1.bf16.msra.mxu1 %v7680_v61  ;;  %4924 = vmatpush1.bf16.msra.mxu0 %v6822_v49  ;;  %v9555_v49 = vld [vmem:[#allocation57_spill] sm:$0xff] }
 0x29e   :  { %4862 = vmatprep.subr.bf16.mxu1 %v9530_v57  ;;  %4926 = vmatprep.subr.bf16.mxu0 %v6825_v50  ;;  %v9554_v50 = vmov 0.0|0.0  }
 0x2a1   :  { %4864 = vmatpush1.bf16.msra.mxu1 %v7700_v55  ;;  %4928 = vmatpush1.bf16.msra.mxu0 %v9476_v6  ;;  %v9553_v6 = vld [vmem:[#allocation55_spill] sm:$0xff] }
 0x2a2   :  { %4866 = vmatprep.subr.bf16.mxu1 %v9531_v51  ;;  %4930 = vmatprep.subr.bf16.mxu0 %v9477_v15  ;;  %v9552_v15 = vld [vmem:[#allocation114_spill] sm:$0xff] }
 0x2a5   :  { %4868 = vmatpush1.bf16.msra.mxu1 %v7720_v3  ;;  %4932 = vmatpush1.bf16.msra.mxu0 %v9480_v4  ;;  %v9551_v4 = vld [vmem:[#allocation53_spill] sm:$0xff] }
 0x2a6   :  { %4870 = vmatprep.subr.bf16.mxu1 %v7724_v44  ;;  %4934 = vmatprep.subr.bf16.mxu0 %v9481_v58  ;;  %v9550_v58 = vld [vmem:[#allocation113_spill] sm:$0xff] }
 0x2a9   :  { %4872 = vmatpush1.bf16.msra.mxu1 %v7740_v14  ;;  %4936 = vmatpush1.bf16.msra.mxu0 %v9484_v60  ;;  %v9549_v60 = vld [vmem:[#allocation51_spill] sm:$0xff] }
 0x2aa   :  { %4874 = vmatprep.subr.bf16.mxu1 %v7744_v59  ;;  %4962 = vmatprep.subr.bf16.mxu0 %v9532_v23 }
 0x2ac   :  { %1450 = vmatmul.mubr.f32.vlgmr.msra.gmra.mrb[4].mxu0 %v8009_v28 }
 0x2ad   :  { %4876 = vmatpush1.bf16.msra.mxu1 %v7760_v26  ;;  %4964 = vmatpush1.bf16.msra.mxu0 %v6958_v32 }
 0x2ae   :  { %4878 = vmatprep.subr.bf16.mxu1 %v9533_v7  ;;  %4966 = vmatprep.subr.bf16.mxu0 %v9534_v42 }
 0x2b1   :  { %4880 = vmatpush1.bf16.msra.mxu1 %v7780_v40  ;;  %4968 = vmatpush1.bf16.msra.mxu0 %v6993_v48 }
 0x2b2   :  { %4882 = vmatprep.subr.bf16.mxu1 %v9535_v30  ;;  %4970 = vmatprep.subr.bf16.mxu0 %v9536_v33 }
 0x2b5   :  { %4884 = vmatpush1.bf16.msra.mxu1 %v7800_v54  ;;  %4972 = vmatpush1.bf16.msra.mxu0 %v7024_v63 }
 0x2b6   :  { %4886 = vmatprep.subr.bf16.mxu1 %v9537_v35  ;;  %4974 = vmatprep.subr.bf16.mxu0 %v9538_v45  ;;  %v9616_v35 = vld [vmem:[#allocation119_spill] sm:$0xff] }
 0x2b9   :  { %4888 = vmatpush1.bf16.msra.mxu1 %v7820_v31  ;;  %4976 = vmatpush1.bf16.msra.mxu0 %v7087_v41  ;;  %v9615_v31 = vld [vmem:[#allocation118_spill] sm:$0xff] }
 0x2ba   :  { %4890 = vmatprep.subr.bf16.mxu1 %v9539_v24  ;;  %4978 = vmatprep.subr.bf16.mxu0 %v9540_v62  ;;  %v9614_v24 = vld [vmem:[#allocation117_spill] sm:$0xff] }
 0x2bd   :  { %4892 = vmatpush1.bf16.msra.mxu1 %v7840_v22  ;;  %4980 = vmatpush1.bf16.msra.mxu0 %v9541_v36 }
 0x2be   :  { %4894 = vmatprep.subr.bf16.mxu1 %v9542_v29  ;;  %4982 = vmatprep.subr.bf16.mxu0 %v9543_v16  ;;  %v9613_v29 = vld [vmem:[#allocation116_spill] sm:$0xff] }
 0x2c1   :  { %4896 = vmatpush1.bf16.msra.mxu1 %v9544_v5  ;;  %4984 = vmatpush1.bf16.msra.mxu0 %v9545_v43  ;;  %v9587_v43 = vld [vmem:[#allocation40_spill] sm:$0xff] }
 0x2c2   :  { %4898 = vmatprep.subr.bf16.mxu1 %v9546_v47  ;;  %4986 = vmatprep.subr.bf16.mxu0 %v9547_v21  ;;  %v9583_v21 = vld [vmem:[#allocation34_spill] sm:$0xff]  ;;  %v9584_v47 = vld [vmem:[#allocation35_spill] sm:$0xff]  ;;  %v9591_v5 = vld [vmem:[#allocation48_spill] sm:$0xff] }
 0x2c5   :  { %4900 = vmatpush1.bf16.msra.mxu1 %v9548_v8  ;;  %4988 = vmatpush1.bf16.msra.mxu0 %v9549_v60  ;;  %v9577_v60 = vld [vmem:[#allocation29_spill] sm:$0xff] }
 0x2c6   :  { %4902 = vmatprep.subr.bf16.mxu1 %v9550_v58  ;;  %4990 = vmatprep.subr.bf16.mxu0 %v9551_v4  ;;  %v9571_v4 = vld [vmem:[#allocation24_spill] sm:$0xff]  ;;  %v9574_v58 = vld [vmem:[#allocation26_spill] sm:$0xff]  ;;  %v9580_v8 = vld [vmem:[#allocation89_spill] sm:$0xff] }
 0x2c9   :  { %4904 = vmatpush1.bf16.msra.mxu1 %v9552_v15  ;;  %4992 = vmatpush1.bf16.msra.mxu0 %v9553_v6  ;;  %v9565_v6 = vld [vmem:[#allocation18_spill] sm:$0xff]  ;;  %v9568_v15 = vld [vmem:[#allocation21_spill] sm:$0xff] }
 0x2ca   :  { %4937 = vmatprep.subr.bf16.mxu1 %v9554_v50  ;;  %4994 = vmatprep.subr.bf16.mxu0 %v9555_v49  ;;  %v9564_v49 = vld [vmem:[#allocation69_spill] sm:$0xff] }
 0x2cc   :  { %1358 = vmatmul.mubr.f32.vlgmr.msra.gmra.mrb[16].mxu1 %v8009_v28 }
 0x2cd   :  { %4939 = vmatpush3.bf16.msra.mxu1 %v9556_v39  ;;  %4196 = vmatprep.mubr.msk.f32.mxu1 %vm6617_vm2, %v9457_v13 }
 0x2ce   :  { %4940 = vmatprep.subr.bf16.mxu1 %v9554_v50  ;;  %4996 = vmatpush1.bf16.msra.mxu0 %v9557_v37  ;;  %v9567_v37 = vld [vmem:[#allocation73_spill] sm:$0xff] }
 0x2cf   :  { %4998 = vmatprep.subr.bf16.mxu0 %v9558_v27  ;;  %v9566_v27 = vld [vmem:[#allocation71_spill] sm:$0xff] }
 0x2d1   :  { %4942 = vmatpush3.bf16.msra.mxu1 %v9559_v25 }
 0x2d2   :  { %4943 = vmatprep.subr.bf16.mxu1 %v9554_v50  ;;  %5000 = vmatpush1.bf16.msra.mxu0 %v9560_v19  ;;  %v9570_v19 = vld [vmem:[#allocation77_spill] sm:$0xff] }
 0x2d3   :  { %5002 = vmatprep.subr.bf16.mxu0 %v9561_v18  ;;  %v9569_v18 = vld [vmem:[#allocation75_spill] sm:$0xff] }
 0x2d5   :  { %4945 = vmatpush3.bf16.msra.mxu1 %v9562_v12 }
 0x2d6   :  { %4946 = vmatprep.subr.bf16.mxu1 %v9554_v50  ;;  %5004 = vmatpush1.bf16.msra.mxu0 %v9563_v9  ;;  %v9573_v9 = vld [vmem:[#allocation81_spill] sm:$0xff] }
 0x2d7   :  { %5006 = vmatprep.subr.bf16.mxu0 %v9564_v49  ;;  %v9572_v49 = vld [vmem:[#allocation79_spill] sm:$0xff] }
 0x2d9   :  { %4948 = vmatpush3.bf16.msra.mxu1 %v9565_v6 }
 0x2da   :  { %4949 = vmatprep.subr.bf16.mxu1 %v9554_v50  ;;  %5008 = vmatpush1.bf16.msra.mxu0 %v9566_v27  ;;  %v9576_v27 = vld [vmem:[#allocation85_spill] sm:$0xff] }
 0x2db   :  { %5010 = vmatprep.subr.bf16.mxu0 %v9567_v37  ;;  %v9575_v37 = vld [vmem:[#allocation83_spill] sm:$0xff] }
 0x2dd   :  { %4951 = vmatpush3.bf16.msra.mxu1 %v9568_v15 }
 0x2de   :  { %4952 = vmatprep.subr.bf16.mxu1 %v9554_v50  ;;  %5012 = vmatpush1.bf16.msra.mxu0 %v9569_v18  ;;  %v9578_v18 = vld [vmem:[#allocation30_spill] sm:$0xff] }
 0x2df   :  { %5014 = vmatprep.subr.bf16.mxu0 %v9570_v19  ;;  %v9579_v19 = vld [vmem:[#allocation87_spill] sm:$0xff] }
 0x2e1   :  { %4954 = vmatpush3.bf16.msra.mxu1 %v9571_v4 }
 0x2e2   :  { %4955 = vmatprep.subr.bf16.mxu1 %v9554_v50  ;;  %5016 = vmatpush1.bf16.msra.mxu0 %v9572_v49  ;;  %v9581_v49 = vld [vmem:[#allocation32_spill] sm:$0xff] }
 0x2e3   :  { %5018 = vmatprep.subr.bf16.mxu0 %v9573_v9  ;;  %v9582_v9 = vld [vmem:[#allocation33_spill] sm:$0xff] }
 0x2e5   :  { %4957 = vmatpush3.bf16.msra.mxu1 %v9574_v58 }
 0x2e6   :  { %4958 = vmatprep.subr.bf16.mxu1 %v9554_v50  ;;  %5020 = vmatpush1.bf16.msra.mxu0 %v9575_v37  ;;  %v9585_v37 = vld [vmem:[#allocation36_spill] sm:$0xff] }
 0x2e7   :  { %5022 = vmatprep.subr.bf16.mxu0 %v9576_v27  ;;  %v9586_v27 = vld [vmem:[#allocation38_spill] sm:$0xff] }
 0x2e9   :  { %4960 = vmatpush3.bf16.msra.mxu1 %v9577_v60 }
 0x2ea   :  { %5026 = vmatprep.subr.bf16.mxu1 %v9578_v18  ;;  %5024 = vmatpush1.bf16.msra.mxu0 %v9579_v19  ;;  %v9588_v18 = vld [vmem:[#allocation42_spill] sm:$0xff]  ;;  %v9589_v19 = vld [vmem:[#allocation44_spill] sm:$0xff] }
 0x2eb   :  { %5090 = vmatprep.subr.bf16.mxu0 %v9580_v8  ;;  %v9590_v8 = vld [vmem:[#allocation46_spill] sm:$0xff] }
 0x2ec   :  { %4197 = vmatmul.mubr.f32.vlgmr.msra.gmra.mrb[18].mxu1 %v8009_v28 }
 0x2ed   :  { %5028 = vmatpush1.bf16.msra.mxu1 %v9581_v49  ;;  %v9592_v49 = vld [vmem:[#allocation50_spill] sm:$0xff] }
 0x2ee   :  { %5030 = vmatprep.subr.bf16.mxu1 %v9582_v9  ;;  %v9593_v9 = vld [vmem:[#allocation52_spill] sm:$0xff] }
 0x2f1   :  { %5032 = vmatpush1.bf16.msra.mxu1 %v9583_v21  ;;  %v9594_v21 = vld [vmem:[#allocation54_spill] sm:$0xff] }
 0x2f2   :  { %5034 = vmatprep.subr.bf16.mxu1 %v9584_v47  ;;  %v9595_v47 = vld [vmem:[#allocation56_spill] sm:$0xff] }
 0x2f5   :  { %5036 = vmatpush1.bf16.msra.mxu1 %v9585_v37  ;;  %v9596_v37 = vld [vmem:[#allocation58_spill] sm:$0xff] }
 0x2f6   :  { %5038 = vmatprep.subr.bf16.mxu1 %v9586_v27  ;;  %v9597_v27 = vld [vmem:[#allocation60_spill] sm:$0xff] }
 0x2f9   :  { %5040 = vmatpush1.bf16.msra.mxu1 %v9587_v43  ;;  %v9598_v43 = vld [vmem:[#allocation62_spill] sm:$0xff] }
 0x2fa   :  { %5042 = vmatprep.subr.bf16.mxu1 %v9588_v18  ;;  %v9599_v18 = vld [vmem:[#allocation64_spill] sm:$0xff] }
 0x2fd   :  { %5044 = vmatpush1.bf16.msra.mxu1 %v9589_v19  ;;  %v9600_v19 = vld [vmem:[#allocation66_spill] sm:$0xff] }
 0x2fe   :  { %5046 = vmatprep.subr.bf16.mxu1 %v9590_v8  ;;  %v9601_v8 = vld [vmem:[#allocation68_spill] sm:$0xff] }
 0x301   :  { %5048 = vmatpush1.bf16.msra.mxu1 %v9591_v5  ;;  %v9602_v5 = vld [vmem:[#allocation70_spill] sm:$0xff] }
 0x302   :  { %5050 = vmatprep.subr.bf16.mxu1 %v9592_v49  ;;  %v9603_v49 = vld [vmem:[#allocation72_spill] sm:$0xff] }
 0x305   :  { %5052 = vmatpush1.bf16.msra.mxu1 %v9593_v9  ;;  %v9604_v9 = vld [vmem:[#allocation74_spill] sm:$0xff] }
 0x306   :  { %5054 = vmatprep.subr.bf16.mxu1 %v9594_v21  ;;  %v9605_v21 = vld [vmem:[#allocation76_spill] sm:$0xff] }
 0x309   :  { %5056 = vmatpush1.bf16.msra.mxu1 %v9595_v47  ;;  %v9606_v47 = vld [vmem:[#allocation78_spill] sm:$0xff] }
 0x30a   :  { %5058 = vmatprep.subr.bf16.mxu1 %v9596_v37  ;;  %v9607_v37 = vld [vmem:[#allocation80_spill] sm:$0xff] }
 0x30d   :  { %5060 = vmatpush1.bf16.msra.mxu1 %v9597_v27  ;;  %v9608_v27 = vld [vmem:[#allocation82_spill] sm:$0xff] }
 0x30e   :  { %5062 = vmatprep.subr.bf16.mxu1 %v9598_v43  ;;  %v9609_v43 = vld [vmem:[#allocation84_spill] sm:$0xff] }
 0x311   :  { %5064 = vmatpush1.bf16.msra.mxu1 %v9599_v18  ;;  %v9610_v18 = vld [vmem:[#allocation86_spill] sm:$0xff] }
 0x312   :  { %5066 = vmatprep.subr.bf16.mxu1 %v9600_v19  ;;  %v9611_v19 = vld [vmem:[#allocation88_spill] sm:$0xff] }
 0x315   :  { %5068 = vmatpush1.bf16.msra.mxu1 %v9601_v8  ;;  %v9612_v8 = vld [vmem:[#allocation115_spill] sm:$0xff] }
 0x316   :  { %5070 = vmatprep.subr.bf16.mxu1 %v9602_v5 }
 0x319   :  { %5072 = vmatpush1.bf16.msra.mxu1 %v9603_v49 }
 0x31a   :  { %5074 = vmatprep.subr.bf16.mxu1 %v9604_v9 }
 0x31d   :  { %5076 = vmatpush1.bf16.msra.mxu1 %v9605_v21 }
 0x31e   :  { %5078 = vmatprep.subr.bf16.mxu1 %v9606_v47 }
 0x321   :  { %5080 = vmatpush1.bf16.msra.mxu1 %v9607_v37 }
 0x322   :  { %5082 = vmatprep.subr.bf16.mxu1 %v9608_v27 }
 0x325   :  { %5084 = vmatpush1.bf16.msra.mxu1 %v9609_v43 }
 0x326   :  { %5086 = vmatprep.subr.bf16.mxu1 %v9610_v18 }
 0x329   :  { %5088 = vmatpush1.bf16.msra.mxu1 %v9611_v19 }
 0x32a   :  { %5185 = vmatprep.subr.bf16.mxu1 %v9554_v50 }
 0x35f   :  { %v1217_v5 = vpop.f32.mrb[14].mxu1  ;;  %v1288_v49 = vpop.f32.mrb[20].mxu0 }
 0x360   :  { %v1218_v9 = vadd.f32 %v1217_v5, %v9612_v8  ;;  %v1219_v16 = vpop.f32.mrb[15].mxu1  ;;  %v1290_v21 = vpop.f32.mrb[21].mxu0 }
 0x361   :  { %v1291_v47 = vadd.f32 %v1290_v21, %v9613_v29  ;;  %v1220_v41 = vadd.f32 %v1219_v16, %v9614_v24 }
 0x363   :  { %v1364_v36 = vadd.f32 %v1291_v47, %v1218_v9  ;;  %v1289_v47 = vadd.f32 %v1288_v49, %v7994_v38 }
 0x365   :  { %v3891_v27 = vmul.f32 -1.442695, %v1364_v36 }
 0x367   :  { %6483 = vpow2.f32 %v3891_v27 }
 0x371   :  { %v6484_v43 = vpop.eup %6483 }
 0x372   :  { %v1368_v62 = vadd.f32 1.0, %v6484_v43 }
 0x374   :  { %6485 = vrcp.f32 %v1368_v62 }
 0x37e   :  { %v6486_v21 = vpop.eup %6485 }
 0x37f   :  { %v1451_v37 = vpop.f32.mrb[4].mxu0 }
 0x380   :  { %v1453_v22 = vpop.f32.mrb[5].mxu0  ;;  %v6421_v19 = vadd.f32 %v1451_v37, %v9527_v17 }
 0x381   :  { %v6422_v37 = vadd.f32 %v1453_v22, %v7573_v20 }
 0x382   :  { %v3893_v8 = vmul.f32 -1.442695, %v6421_v19 }
 0x383   :  { %v3894_v62 = vmul.f32 -1.442695, %v6422_v37 }
 0x384   :  { %6487 = vpow2.f32 %v3893_v8 }
 0x38e   :  { %v6488_v17 = vpop.eup %6487 }
 0x39f   :  { %v1359_v18 = vpop.f32.mrb[16].mxu1 }
 0x3a0   :  { %v1360_v45 = vadd.f32 %v1359_v18, %v9615_v31  ;;  %v1361_v5 = vpop.f32.mrb[17].mxu1  ;;  %v1530_v31 = vadd.f32 1.0, %v6488_v17  ;;  %v9617_v17 = vld [vmem:[#allocation92_spill] sm:$0xff] }
 0x3a1   :  { %v1362_v63 = vadd.f32 %v1361_v5, %v9616_v35 }
 0x3a2   :  { %v1371_v9 = vadd.f32 %v1360_v45, %v1220_v41 }
 0x3a3   :  { %v1378_v36 = vmul.f32 %v6486_v21, %v1362_v63 }
 0x3a4   :  { %v3892_v27 = vmul.f32 -1.442695, %v1371_v9 }
 0x3a5   :  { %v1379_v43 = vadd.f32 %v1378_v36, %v1289_v47 }
 0x3a6   :  { %6489 = vpow2.f32 %v3892_v27 }
 0x3a7   :  { %6491 = vpow2.f32 %v3894_v62 }
 0x3b0   :  { %v6490_v16 = vpop.eup %6489 }
 0x3b1   :  { %v1375_v18 = vadd.f32 1.0, %v6490_v16  ;;  %v6492_v19 = vpop.eup %6491 }
 0x3b2   :  { %v1537_v45 = vadd.f32 1.0, %v6492_v19  ;;  %v9620_v19 = vld [vmem:[#allocation37_spill] sm:$0xff] }
 0x3b3   :  { %6493 = vrcp.f32 %v1375_v18 }
 0x3b4   :  { %6495 = vtanh.f32 %v1379_v43 }
 0x3b5   :  { %6497 = vrcp.f32 %v1530_v31 }
 0x3b6   :  { %6499 = vrcp.f32 %v1537_v45  ;;  %v9622_v45 = vld [vmem:[#allocation39_spill] sm:$0xff] }
 0x3bd   :  { %v6494_v41 = vpop.eup %6493 }
 0x3be   :  { %v1381_v49 = vsub.f32 1.0, %v6494_v41  ;;  %v6496_v63 = vpop.eup %6495  ;;  %v1383_v22 = vmul.f32 %v6494_v41, %v8001_v53  ;;  %v9618_v53 = vld [vmem:[#allocation31_spill] sm:$0xff]  ;;  %v9621_v41 = vld [vmem:[#allocation106_spill] sm:$0xff] }
 0x3bf   :  { %v1522_v5 = vpop.f32.mrb[18].mxu1  ;;  %v6498_v47 = vpop.eup %6497 }
 0x3c0   :  { %v1540_v8 = vadd.f32 %v7580_v56, %v1522_v5  ;;  %v4198_v21 = vpop.f32.mrb[19].mxu1  ;;  %v1382_v9 = vmul.f32 %v6496_v63, %v1381_v49  ;;  %v6500_v31 = vpop.eup %6499  ;;  %v9623_v49 = vld [vmem:[#allocation107_spill] sm:$0xff]  ;;  %v9624_v63 = vld [vmem:[#allocation41_spill] sm:$0xff]  ;;  %v9625_v5 = vld [vmem:[#allocation108_spill] sm:$0xff] }
 0x3c1   :  { %v1544_v37 = vsub.f32 1.0, %v6500_v31  ;;  %v1546_v56 = vmul.f32 %v6500_v31, %v8009_v28  ;;  %v9619_v28 = vld [vmem:[#allocation105_spill] sm:$0xff]  ;;  %v9634_v31 = vld [vmem:[#allocation51_spill] sm:$0xff] }
 0x3c2   :  { %v1541_v36 = vmul.f32 %v6498_v47, %v1540_v8  ;;  %v8158_v27 = vadd.f32 %v1383_v22, %v1382_v9  ;;  %v9626_v8 = vld [vmem:[#allocation43_spill] sm:$0xff]  ;;  %v9627_v21 = vld [vmem:[#allocation109_spill] sm:$0xff]  ;;  %v9629_v22 = vld [vmem:[#allocation110_spill] sm:$0xff] }
 0x3c3   :  { %v9628_v9 = vld [vmem:[#allocation45_spill] sm:$0xff]  ;;  %v9630_v47 = vld [vmem:[#allocation47_spill] sm:$0xff] }
 0x3c4   :  { %v1542_v43 = vadd.f32 %v1541_v36, %v9617_v17  ;;  %1612 = vmatprep.mubr.f32.mxu0 %v8158_v27  ;;  %1683 = vmatprep.mubr.f32.mxu1 %v8158_v27  ;;  %v9631_v36 = vld [vmem:[#allocation111_spill] sm:$0xff]  ;;  %v9632_v17 = vld [vmem:[#allocation49_spill] sm:$0xff] }
 0x3c6   :  { %6501 = vtanh.f32 %v1542_v43  ;;  %v9633_v43 = vld [vmem:[#allocation112_spill] sm:$0xff] }
 0x3d0   :  { %v6502_v62 = vpop.eup %6501 }
 0x3d1   :  { %v1545_v16 = vmul.f32 %v6502_v62, %v1544_v37  ;;  %v9635_v37 = vld [vmem:[#allocation113_spill] sm:$0xff] }
 0x3d2   :  { %v9636_v62 = vld [vmem:[#allocation53_spill] sm:$0xff] }
 0x3d3   :  { %v8164_v18 = vadd.f32 %v1546_v56, %v1545_v16  ;;  %v9637_v56 = vld [vmem:[#allocation114_spill] sm:$0xff]  ;;  %v9638_v16 = vld [vmem:[#allocation55_spill] sm:$0xff] }
 0x3d5   :  { %1613 = vmatmul.mubr.f32.vlgmr.msra.gmra.mrb[22].mxu0 %v8164_v18  ;;  %1684 = vmatmul.mubr.f32.vlgmr.msra.gmra.mrb[20].mxu1 %v8164_v18 }
 0x3d6   :  { %5092 = vmatpush1.bf16.msra.mxu0 %v7595_v11  ;;  %5187 = vmatpush3.bf16.msra.mxu1 %v9556_v39  ;;  %v9646_v39 = vld [vmem:[#allocation6_spill] sm:$0xff] }
 0x3d7   :  { %1754 = vmatprep.mubr.f32.mxu0 %v8158_v27  ;;  %5094 = vmatprep.subr.bf16.mxu0 %v7599_v2 }
 0x3d8   :  { %5188 = vmatprep.subr.bf16.mxu1 %v9554_v50  ;;  %4231 = vmatprep.mubr.msk.f32.mxu1 %vm6617_vm2, %v9457_v13 }
 0x3da   :  { %5096 = vmatpush1.bf16.msra.mxu0 %v7617_v52  ;;  %5190 = vmatpush3.bf16.msra.mxu1 %v9559_v25  ;;  %v9645_v25 = vld [vmem:[#allocation5_spill] sm:$0xff] }
 0x3db   :  { %5098 = vmatprep.subr.bf16.mxu0 %v7621_v10  ;;  %5191 = vmatprep.subr.bf16.mxu1 %v9554_v50 }
 0x3de   :  { %5100 = vmatpush1.bf16.msra.mxu0 %v7640_v34  ;;  %5193 = vmatpush3.bf16.msra.mxu1 %v9562_v12  ;;  %v9644_v12 = vld [vmem:[#allocation61_spill] sm:$0xff] }
 0x3df   :  { %5102 = vmatprep.subr.bf16.mxu0 %v7644_v1  ;;  %5194 = vmatprep.subr.bf16.mxu1 %v9554_v50 }
 0x3e2   :  { %5104 = vmatpush1.bf16.msra.mxu0 %v7660_v0  ;;  %5196 = vmatpush3.bf16.msra.mxu1 %v9565_v6  ;;  %v9643_v6 = vld [vmem:[#allocation59_spill] sm:$0xff] }
 0x3e3   :  { %5106 = vmatprep.subr.bf16.mxu0 %v9529_v46  ;;  %5197 = vmatprep.subr.bf16.mxu1 %v9554_v50 }
 0x3e6   :  { %5108 = vmatpush1.bf16.msra.mxu0 %v7680_v61  ;;  %5199 = vmatpush3.bf16.msra.mxu1 %v9568_v15  ;;  %v9642_v15 = vld [vmem:[#allocation4_spill] sm:$0xff] }
 0x3e7   :  { %5110 = vmatprep.subr.bf16.mxu0 %v9530_v57  ;;  %5200 = vmatprep.subr.bf16.mxu1 %v9554_v50 }
 0x3ea   :  { %5112 = vmatpush1.bf16.msra.mxu0 %v7700_v55  ;;  %5202 = vmatpush3.bf16.msra.mxu1 %v9571_v4  ;;  %v9641_v4 = vld [vmem:[#allocation3_spill] sm:$0xff] }
 0x3eb   :  { %5114 = vmatprep.subr.bf16.mxu0 %v9531_v51  ;;  %5203 = vmatprep.subr.bf16.mxu1 %v9554_v50 }
 0x3ee   :  { %5116 = vmatpush1.bf16.msra.mxu0 %v7720_v3  ;;  %5205 = vmatpush3.bf16.msra.mxu1 %v9574_v58  ;;  %v9640_v58 = vld [vmem:[#allocation57_spill] sm:$0xff] }
 0x3ef   :  { %5118 = vmatprep.subr.bf16.mxu0 %v7724_v44  ;;  %5206 = vmatprep.subr.bf16.mxu1 %v9554_v50  ;;  %v9647_v50 = vld [vmem:[#allocation63_spill] sm:$0xff] }
 0x3f2   :  { %5120 = vmatpush1.bf16.msra.mxu0 %v7740_v14  ;;  %5208 = vmatpush3.bf16.msra.mxu1 %v9577_v60  ;;  %v9639_v60 = vld [vmem:[#allocation2_spill] sm:$0xff] }
 0x3f3   :  { %5122 = vmatprep.subr.bf16.mxu0 %v7744_v59  ;;  %5210 = vmatprep.subr.bf16.mxu1 %v9532_v23 }
 0x3f5   :  { %4232 = vmatmul.mubr.f32.vlgmr.msra.gmra.mrb[22].mxu1 %v8164_v18 }
 0x3f6   :  { %5124 = vmatpush1.bf16.msra.mxu0 %v7760_v26  ;;  %5212 = vmatpush1.bf16.msra.mxu1 %v6958_v32 }
 0x3f7   :  { %5126 = vmatprep.subr.bf16.mxu0 %v9533_v7  ;;  %5214 = vmatprep.subr.bf16.mxu1 %v9534_v42 }
 0x3fa   :  { %5128 = vmatpush1.bf16.msra.mxu0 %v7780_v40  ;;  %5216 = vmatpush1.bf16.msra.mxu1 %v6993_v48 }
 0x3fb   :  { %5130 = vmatprep.subr.bf16.mxu0 %v9535_v30  ;;  %5218 = vmatprep.subr.bf16.mxu1 %v9536_v33 }
 0x3fe   :  { %5132 = vmatpush1.bf16.msra.mxu0 %v7800_v54  ;;  %5220 = vmatpush1.bf16.msra.mxu1 %v9618_v53 }
 0x3ff   :  { %5134 = vmatprep.subr.bf16.mxu0 %v9619_v28  ;;  %5222 = vmatprep.subr.bf16.mxu1 %v9620_v19 }
 0x402   :  { %5136 = vmatpush1.bf16.msra.mxu0 %v9621_v41  ;;  %5224 = vmatpush1.bf16.msra.mxu1 %v9622_v45  ;;  %v9679_v45 = vld [vmem:[#allocation40_spill] sm:$0xff] }
 0x403   :  { %5138 = vmatprep.subr.bf16.mxu0 %v9623_v49  ;;  %5226 = vmatprep.subr.bf16.mxu1 %v9624_v63  ;;  %v9675_v63 = vld [vmem:[#allocation34_spill] sm:$0xff]  ;;  %v9676_v49 = vld [vmem:[#allocation35_spill] sm:$0xff]  ;;  %v9683_v41 = vld [vmem:[#allocation48_spill] sm:$0xff] }
 0x406   :  { %5140 = vmatpush1.bf16.msra.mxu0 %v9625_v5  ;;  %5228 = vmatpush1.bf16.msra.mxu1 %v9626_v8  ;;  %v9669_v8 = vld [vmem:[#allocation22_spill] sm:$0xff]  ;;  %v9672_v5 = vld [vmem:[#allocation89_spill] sm:$0xff] }
 0x407   :  { %5142 = vmatprep.subr.bf16.mxu0 %v9627_v21  ;;  %5230 = vmatprep.subr.bf16.mxu1 %v9628_v9  ;;  %v9665_v9 = vld [vmem:[#allocation19_spill] sm:$0xff]  ;;  %v9668_v21 = vld [vmem:[#allocation85_spill] sm:$0xff] }
 0x40a   :  { %5144 = vmatpush1.bf16.msra.mxu0 %v9629_v22  ;;  %5232 = vmatpush1.bf16.msra.mxu1 %v9630_v47  ;;  %v9661_v47 = vld [vmem:[#allocation16_spill] sm:$0xff]  ;;  %v9664_v22 = vld [vmem:[#allocation81_spill] sm:$0xff] }
 0x40b   :  { %5146 = vmatprep.subr.bf16.mxu0 %v9631_v36  ;;  %5234 = vmatprep.subr.bf16.mxu1 %v9632_v17  ;;  %v9657_v17 = vld [vmem:[#allocation13_spill] sm:$0xff] }
 0x40c   :  { %v9660_v36 = vld [vmem:[#allocation77_spill] sm:$0xff] }
 0x40e   :  { %5148 = vmatpush1.bf16.msra.mxu0 %v9633_v43  ;;  %5236 = vmatpush1.bf16.msra.mxu1 %v9634_v31  ;;  %v9653_v31 = vld [vmem:[#allocation10_spill] sm:$0xff]  ;;  %v9656_v43 = vld [vmem:[#allocation73_spill] sm:$0xff] }
 0x40f   :  { %5150 = vmatprep.subr.bf16.mxu0 %v9635_v37  ;;  %5238 = vmatprep.subr.bf16.mxu1 %v9636_v62  ;;  %v9651_v62 = vld [vmem:[#allocation67_spill] sm:$0xff]  ;;  %v9652_v37 = vld [vmem:[#allocation69_spill] sm:$0xff] }
 0x412   :  { %5152 = vmatpush1.bf16.msra.mxu0 %v9637_v56  ;;  %5240 = vmatpush1.bf16.msra.mxu1 %v9638_v16  ;;  %v9648_v16 = vld [vmem:[#allocation65_spill] sm:$0xff]  ;;  %v9650_v56 = vld [vmem:[#allocation8_spill] sm:$0xff] }
 0x413   :  { %5154 = vmatprep.subr.bf16.mxu0 %v9639_v60  ;;  %5242 = vmatprep.subr.bf16.mxu1 %v9640_v58  ;;  %v9649_v58 = vld [vmem:[#allocation7_spill] sm:$0xff] }
 0x415   :  { %1755 = vmatmul.mubr.f32.vlgmr.msra.gmra.mrb[24].mxu0 %v8164_v18 }
 0x416   :  { %5156 = vmatpush1.bf16.msra.mxu0 %v9641_v4  ;;  %1846 = vmatprep.mubr.f32.mxu0 %v9457_v13 }
 0x417   :  { %5158 = vmatprep.subr.bf16.mxu0 %v9642_v15  ;;  %5244 = vmatpush1.bf16.msra.mxu1 %v9643_v6  ;;  %v9654_v6 = vld [vmem:[#allocation11_spill] sm:$0xff] }
 0x418   :  { %5246 = vmatprep.subr.bf16.mxu1 %v9644_v12  ;;  %v9655_v12 = vld [vmem:[#allocation71_spill] sm:$0xff] }
 0x41a   :  { %5160 = vmatpush1.bf16.msra.mxu0 %v9645_v25 }
 0x41b   :  { %5162 = vmatprep.subr.bf16.mxu0 %v9646_v39  ;;  %5248 = vmatpush1.bf16.msra.mxu1 %v9647_v50  ;;  %v9658_v50 = vld [vmem:[#allocation14_spill] sm:$0xff] }
 0x41c   :  { %5250 = vmatprep.subr.bf16.mxu1 %v9648_v16  ;;  %v9659_v16 = vld [vmem:[#allocation75_spill] sm:$0xff] }
 0x41e   :  { %5164 = vmatpush1.bf16.msra.mxu0 %v9649_v58 }
 0x41f   :  { %5166 = vmatprep.subr.bf16.mxu0 %v9650_v56  ;;  %5252 = vmatpush1.bf16.msra.mxu1 %v9651_v62  ;;  %v9662_v62 = vld [vmem:[#allocation17_spill] sm:$0xff] }
 0x420   :  { %5254 = vmatprep.subr.bf16.mxu1 %v9652_v37  ;;  %v9663_v37 = vld [vmem:[#allocation79_spill] sm:$0xff] }
 0x422   :  { %5168 = vmatpush1.bf16.msra.mxu0 %v9653_v31 }
 0x423   :  { %5170 = vmatprep.subr.bf16.mxu0 %v9654_v6  ;;  %5256 = vmatpush1.bf16.msra.mxu1 %v9655_v12  ;;  %v9666_v12 = vld [vmem:[#allocation20_spill] sm:$0xff] }
 0x424   :  { %5258 = vmatprep.subr.bf16.mxu1 %v9656_v43  ;;  %v9667_v43 = vld [vmem:[#allocation83_spill] sm:$0xff] }
 0x426   :  { %5172 = vmatpush1.bf16.msra.mxu0 %v9657_v17 }
 0x427   :  { %5174 = vmatprep.subr.bf16.mxu0 %v9658_v50  ;;  %5260 = vmatpush1.bf16.msra.mxu1 %v9659_v16  ;;  %v9670_v16 = vld [vmem:[#allocation30_spill] sm:$0xff] }
 0x428   :  { %5262 = vmatprep.subr.bf16.mxu1 %v9660_v36  ;;  %v9671_v36 = vld [vmem:[#allocation87_spill] sm:$0xff] }
 0x42a   :  { %5176 = vmatpush1.bf16.msra.mxu0 %v9661_v47 }
 0x42b   :  { %5178 = vmatprep.subr.bf16.mxu0 %v9662_v62  ;;  %5264 = vmatpush1.bf16.msra.mxu1 %v9663_v37  ;;  %v9673_v37 = vld [vmem:[#allocation32_spill] sm:$0xff] }
 0x42c   :  { %5266 = vmatprep.subr.bf16.mxu1 %v9664_v22  ;;  %v9674_v22 = vld [vmem:[#allocation33_spill] sm:$0xff] }
 0x42e   :  { %5180 = vmatpush1.bf16.msra.mxu0 %v9665_v9 }
 0x42f   :  { %5182 = vmatprep.subr.bf16.mxu0 %v9666_v12  ;;  %5268 = vmatpush1.bf16.msra.mxu1 %v9667_v43  ;;  %v9677_v43 = vld [vmem:[#allocation36_spill] sm:$0xff] }
 0x430   :  { %5270 = vmatprep.subr.bf16.mxu1 %v9668_v21  ;;  %v9678_v21 = vld [vmem:[#allocation38_spill] sm:$0xff] }
 0x432   :  { %5184 = vmatpush1.bf16.msra.mxu0 %v9669_v8 }
 0x433   :  { %5274 = vmatprep.subr.bf16.mxu0 %v9670_v16  ;;  %5272 = vmatpush1.bf16.msra.mxu1 %v9671_v36  ;;  %v9680_v16 = vld [vmem:[#allocation42_spill] sm:$0xff]  ;;  %v9681_v36 = vld [vmem:[#allocation44_spill] sm:$0xff] }
 0x434   :  { %5338 = vmatprep.subr.bf16.mxu1 %v9672_v5  ;;  %v9682_v5 = vld [vmem:[#allocation46_spill] sm:$0xff] }
 0x435   :  { %1847 = vmatmul.mubr.f32.vlgmr.msra.gmra.mrb[6].mxu0 %v8164_v18 }
 0x436   :  { %5276 = vmatpush1.bf16.msra.mxu0 %v9673_v37  ;;  %v9684_v37 = vld [vmem:[#allocation50_spill] sm:$0xff] }
 0x437   :  { %5278 = vmatprep.subr.bf16.mxu0 %v9674_v22  ;;  %v9685_v22 = vld [vmem:[#allocation52_spill] sm:$0xff] }
 0x43a   :  { %5280 = vmatpush1.bf16.msra.mxu0 %v9675_v63  ;;  %v9686_v63 = vld [vmem:[#allocation54_spill] sm:$0xff] }
 0x43b   :  { %5282 = vmatprep.subr.bf16.mxu0 %v9676_v49  ;;  %v9687_v49 = vld [vmem:[#allocation56_spill] sm:$0xff] }
 0x43e   :  { %5284 = vmatpush1.bf16.msra.mxu0 %v9677_v43  ;;  %v9688_v43 = vld [vmem:[#allocation58_spill] sm:$0xff] }
 0x43f   :  { %5286 = vmatprep.subr.bf16.mxu0 %v9678_v21  ;;  %v9689_v21 = vld [vmem:[#allocation60_spill] sm:$0xff] }
 0x442   :  { %5288 = vmatpush1.bf16.msra.mxu0 %v9679_v45  ;;  %v9690_v45 = vld [vmem:[#allocation62_spill] sm:$0xff] }
 0x443   :  { %5290 = vmatprep.subr.bf16.mxu0 %v9680_v16  ;;  %v9691_v16 = vld [vmem:[#allocation64_spill] sm:$0xff] }
 0x446   :  { %5292 = vmatpush1.bf16.msra.mxu0 %v9681_v36  ;;  %v9692_v36 = vld [vmem:[#allocation66_spill] sm:$0xff] }
 0x447   :  { %5294 = vmatprep.subr.bf16.mxu0 %v9682_v5  ;;  %v9693_v5 = vld [vmem:[#allocation68_spill] sm:$0xff] }
 0x44a   :  { %5296 = vmatpush1.bf16.msra.mxu0 %v9683_v41  ;;  %v9694_v41 = vld [vmem:[#allocation70_spill] sm:$0xff] }
 0x44b   :  { %5298 = vmatprep.subr.bf16.mxu0 %v9684_v37  ;;  %v9695_v37 = vld [vmem:[#allocation72_spill] sm:$0xff] }
 0x44e   :  { %5300 = vmatpush1.bf16.msra.mxu0 %v9685_v22  ;;  %v9696_v22 = vld [vmem:[#allocation74_spill] sm:$0xff] }
 0x44f   :  { %5302 = vmatprep.subr.bf16.mxu0 %v9686_v63  ;;  %v9697_v63 = vld [vmem:[#allocation76_spill] sm:$0xff] }
 0x452   :  { %5304 = vmatpush1.bf16.msra.mxu0 %v9687_v49  ;;  %v9698_v49 = vld [vmem:[#allocation78_spill] sm:$0xff] }
 0x453   :  { %5306 = vmatprep.subr.bf16.mxu0 %v9688_v43  ;;  %v9699_v43 = vld [vmem:[#allocation80_spill] sm:$0xff] }
 0x456   :  { %5308 = vmatpush1.bf16.msra.mxu0 %v9689_v21  ;;  %v9700_v21 = vld [vmem:[#allocation82_spill] sm:$0xff] }
 0x457   :  { %5310 = vmatprep.subr.bf16.mxu0 %v9690_v45  ;;  %v9701_v45 = vld [vmem:[#allocation84_spill] sm:$0xff] }
 0x45a   :  { %5312 = vmatpush1.bf16.msra.mxu0 %v9691_v16  ;;  %v9702_v16 = vld [vmem:[#allocation86_spill] sm:$0xff] }
 0x45b   :  { %5314 = vmatprep.subr.bf16.mxu0 %v9692_v36  ;;  %v9703_v36 = vld [vmem:[#allocation88_spill] sm:$0xff] }
 0x45e   :  { %5316 = vmatpush1.bf16.msra.mxu0 %v9693_v5  ;;  %v9704_v5 = vld [vmem:[#allocation115_spill] sm:$0xff] }
 0x45f   :  { %5318 = vmatprep.subr.bf16.mxu0 %v9694_v41 }
 0x462   :  { %5320 = vmatpush1.bf16.msra.mxu0 %v9695_v37 }
 0x463   :  { %5322 = vmatprep.subr.bf16.mxu0 %v9696_v22 }
 0x466   :  { %5324 = vmatpush1.bf16.msra.mxu0 %v9697_v63 }
 0x467   :  { %5326 = vmatprep.subr.bf16.mxu0 %v9698_v49 }
 0x46a   :  { %5328 = vmatpush1.bf16.msra.mxu0 %v9699_v43 }
 0x46b   :  { %5330 = vmatprep.subr.bf16.mxu0 %v9700_v21 }
 0x46e   :  { %5332 = vmatpush1.bf16.msra.mxu0 %v9701_v45 }
 0x46f   :  { %5334 = vmatprep.subr.bf16.mxu0 %v9702_v16 }
 0x472   :  { %5336 = vmatpush1.bf16.msra.mxu0 %v9703_v36 }
 0x473   :  { %5402 = vmatprep.subr.bf16.mxu0 %v9639_v60  ;;  %v9705_v60 = vld [vmem:[#allocation118_spill] sm:$0xff] }
 0x4a8   :  { %v1614_v41 = vpop.f32.mrb[22].mxu0  ;;  %v1685_v37 = vpop.f32.mrb[20].mxu1 }
 0x4a9   :  { %v1615_v22 = vadd.f32 %v1614_v41, %v9704_v5  ;;  %v1616_v19 = vpop.f32.mrb[23].mxu0  ;;  %v1687_v63 = vpop.f32.mrb[21].mxu1 }
 0x4aa   :  { %v1688_v49 = vadd.f32 %v1687_v63, %v9613_v29  ;;  %v1617_v36 = vadd.f32 %v1616_v19, %v9614_v24  ;;  %v1686_v63 = vadd.f32 %v1685_v37, %v7994_v38 }
 0x4ac   :  { %v1761_v28 = vadd.f32 %v1688_v49, %v1615_v22 }
 0x4ae   :  { %v3895_v21 = vmul.f32 -1.442695, %v1761_v28 }
 0x4b0   :  { %6503 = vpow2.f32 %v3895_v21 }
 0x4ba   :  { %v6504_v45 = vpop.eup %6503 }
 0x4bb   :  { %v1765_v54 = vadd.f32 1.0, %v6504_v45 }
 0x4bd   :  { %6505 = vrcp.f32 %v1765_v54 }
 0x4c7   :  { %v6506_v5 = vpop.eup %6505 }
 0x4c8   :  { %v1919_v43 = vpop.f32.mrb[22].mxu1 }
 0x4c9   :  { %v4233_v53 = vpop.f32.mrb[23].mxu1 }
 0x4e8   :  { %v1756_v16 = vpop.f32.mrb[24].mxu0 }
 0x4e9   :  { %v1757_v33 = vadd.f32 %v1756_v16, %v9705_v60  ;;  %v1758_v30 = vpop.f32.mrb[25].mxu0  ;;  %v9706_v16 = vld [vmem:[#allocation97_spill] sm:$0xff] }
 0x4ea   :  { %v1759_v41 = vadd.f32 %v1758_v30, %v9616_v35 }
 0x4eb   :  { %v1768_v48 = vadd.f32 %v1757_v33, %v1617_v36 }
 0x4ec   :  { %v1775_v49 = vmul.f32 %v6506_v5, %v1759_v41 }
 0x4ed   :  { %v3896_v22 = vmul.f32 -1.442695, %v1768_v48 }
 0x4ee   :  { %v1776_v53 = vadd.f32 %v1775_v49, %v1686_v63 }
 0x4ef   :  { %6507 = vpow2.f32 %v3896_v22 }
 0x4f9   :  { %v6508_v28 = vpop.eup %6507 }
 0x4fa   :  { %v1772_v21 = vadd.f32 1.0, %v6508_v28 }
 0x4fc   :  { %6509 = vrcp.f32 %v1772_v21 }
 0x4fd   :  { %6511 = vtanh.f32 %v1776_v53  ;;  %v9707_v53 = vld [vmem:[#allocation91_spill] sm:$0xff] }
 0x506   :  { %v6510_v54 = vpop.eup %6509 }
 0x507   :  { %v1778_v45 = vsub.f32 1.0, %v6510_v54  ;;  %v6512_v19 = vpop.eup %6511  ;;  %v1780_v33 = vmul.f32 %v6510_v54, %v8158_v27 }
 0x508   :  { %v1848_v24 = vpop.f32.mrb[6].mxu0 }
 0x509   :  { %v6423_v60 = vadd.f32 %v1848_v24, %v9706_v16  ;;  %v1850_v29 = vpop.f32.mrb[7].mxu0  ;;  %v1779_v30 = vmul.f32 %v6512_v19, %v1778_v45 }
 0x50a   :  { %v6424_v48 = vadd.f32 %v1850_v29, %v7573_v20 }
 0x50b   :  { %v3897_v36 = vmul.f32 -1.442695, %v6423_v60  ;;  %v8311_v37 = vadd.f32 %v1780_v33, %v1779_v30  ;;  %v8319_v60 = vld [vmem:[%s9057_s4] ss:$0 sm:$0xff] }
 0x50c   :  { %v3898_v5 = vmul.f32 -1.442695, %v6424_v48  ;;  %v1937_v27 = vadd.f32 %v8319_v60, %v1919_v43  ;;  %v9709_v43 = vld [vmem:[#allocation103_spill] sm:$0xff]  ;;  %v9711_v48 = vld [vmem:[#allocation104_spill] sm:$0xff] }
 0x50d   :  { %6513 = vpow2.f32 %v3897_v36  ;;  %2009 = vmatprep.mubr.f32.mxu1 %v8311_v37  ;;  %2080 = vmatprep.mubr.f32.mxu0 %v8311_v37  ;;  %v9710_v36 = vld [vmem:[#allocation28_spill] sm:$0xff] }
 0x50e   :  { %6515 = vpow2.f32 %v3898_v5  ;;  %v9712_v5 = vld [vmem:[#allocation31_spill] sm:$0xff] }
 0x517   :  { %v6514_v41 = vpop.eup %6513 }
 0x518   :  { %v1927_v63 = vadd.f32 1.0, %v6514_v41  ;;  %v6516_v24 = vpop.eup %6515  ;;  %v9713_v41 = vld [vmem:[#allocation105_spill] sm:$0xff] }
 0x519   :  { %v1934_v49 = vadd.f32 1.0, %v6516_v24  ;;  %v9715_v24 = vld [vmem:[#allocation106_spill] sm:$0xff] }
 0x51a   :  { %6517 = vrcp.f32 %v1927_v63  ;;  %v9714_v63 = vld [vmem:[#allocation37_spill] sm:$0xff] }
 0x51b   :  { %6519 = vrcp.f32 %v1934_v49  ;;  %v9716_v49 = vld [vmem:[#allocation39_spill] sm:$0xff] }
 0x524   :  { %v6518_v29 = vpop.eup %6517 }
 0x525   :  { %v1938_v22 = vmul.f32 %v6518_v29, %v1937_v27  ;;  %v6520_v21 = vpop.eup %6519  ;;  %v9717_v27 = vld [vmem:[#allocation107_spill] sm:$0xff]  ;;  %v9718_v29 = vld [vmem:[#allocation41_spill] sm:$0xff] }
 0x526   :  { %v1941_v54 = vsub.f32 1.0, %v6520_v21  ;;  %v1943_v30 = vmul.f32 %v6520_v21, %v8164_v18  ;;  %v9708_v18 = vld [vmem:[#allocation27_spill] sm:$0xff]  ;;  %v9722_v21 = vld [vmem:[#allocation45_spill] sm:$0xff] }
 0x527   :  { %v1939_v28 = vadd.f32 %v1938_v22, %v9707_v53  ;;  %v9719_v22 = vld [vmem:[#allocation108_spill] sm:$0xff]  ;;  %v9720_v53 = vld [vmem:[#allocation43_spill] sm:$0xff] }
 0x529   :  { %6521 = vtanh.f32 %v1939_v28  ;;  %v9721_v28 = vld [vmem:[#allocation109_spill] sm:$0xff] }
 0x533   :  { %v6522_v45 = vpop.eup %6521 }
 0x534   :  { %v1942_v19 = vmul.f32 %v6522_v45, %v1941_v54  ;;  %v9723_v54 = vld [vmem:[#allocation110_spill] sm:$0xff]  ;;  %v9724_v45 = vld [vmem:[#allocation47_spill] sm:$0xff] }
 0x536   :  { %v8324_v33 = vadd.f32 %v1943_v30, %v1942_v19  ;;  %v9725_v19 = vld [vmem:[#allocation111_spill] sm:$0xff]  ;;  %v9726_v30 = vld [vmem:[#allocation49_spill] sm:$0xff] }
 0x538   :  { %2010 = vmatmul.mubr.f32.vlgmr.msra.gmra.mrb[24].mxu1 %v8324_v33  ;;  %2081 = vmatmul.mubr.f32.vlgmr.msra.gmra.mrb[26].mxu0 %v8324_v33 }
 0x539   :  { %5340 = vmatpush1.bf16.msra.mxu1 %v7595_v11  ;;  %5404 = vmatpush1.bf16.msra.mxu0 %v9641_v4  ;;  %v9741_v4 = vld [vmem:[#allocation15_spill] sm:$0xff] }
 0x53a   :  { %2151 = vmatprep.mubr.f32.mxu1 %v8311_v37  ;;  %5342 = vmatprep.subr.bf16.mxu1 %v7599_v2 }
 0x53b   :  { %5406 = vmatprep.subr.bf16.mxu0 %v9642_v15  ;;  %2243 = vmatprep.mubr.f32.mxu0 %v9457_v13  ;;  %v9740_v15 = vld [vmem:[#allocation65_spill] sm:$0xff] }
 0x53d   :  { %5344 = vmatpush1.bf16.msra.mxu1 %v7617_v52  ;;  %5408 = vmatpush1.bf16.msra.mxu0 %v9645_v25  ;;  %v9739_v25 = vld [vmem:[#allocation63_spill] sm:$0xff] }
 0x53e   :  { %5346 = vmatprep.subr.bf16.mxu1 %v7621_v10  ;;  %5410 = vmatprep.subr.bf16.mxu0 %v9646_v39  ;;  %v9738_v39 = vld [vmem:[#allocation12_spill] sm:$0xff] }
 0x541   :  { %5348 = vmatpush1.bf16.msra.mxu1 %v7640_v34  ;;  %5412 = vmatpush1.bf16.msra.mxu0 %v9649_v58  ;;  %v9737_v58 = vld [vmem:[#allocation61_spill] sm:$0xff] }
 0x542   :  { %5350 = vmatprep.subr.bf16.mxu1 %v7644_v1  ;;  %5414 = vmatprep.subr.bf16.mxu0 %v9650_v56  ;;  %v9736_v56 = vld [vmem:[#allocation59_spill] sm:$0xff] }
 0x545   :  { %5352 = vmatpush1.bf16.msra.mxu1 %v7660_v0  ;;  %5416 = vmatpush1.bf16.msra.mxu0 %v9653_v31  ;;  %v9735_v31 = vld [vmem:[#allocation9_spill] sm:$0xff] }
 0x546   :  { %5354 = vmatprep.subr.bf16.mxu1 %v9529_v46  ;;  %5418 = vmatprep.subr.bf16.mxu0 %v9654_v6  ;;  %v9734_v6 = vld [vmem:[#allocation57_spill] sm:$0xff] }
 0x549   :  { %5356 = vmatpush1.bf16.msra.mxu1 %v7680_v61  ;;  %5420 = vmatpush1.bf16.msra.mxu0 %v9657_v17  ;;  %v9733_v17 = vmov 0.0|0.0  }
 0x54a   :  { %5358 = vmatprep.subr.bf16.mxu1 %v9530_v57  ;;  %5422 = vmatprep.subr.bf16.mxu0 %v9658_v50  ;;  %v9732_v50 = vld [vmem:[#allocation55_spill] sm:$0xff] }
 0x54d   :  { %5360 = vmatpush1.bf16.msra.mxu1 %v7700_v55  ;;  %5424 = vmatpush1.bf16.msra.mxu0 %v9661_v47  ;;  %v9731_v47 = vld [vmem:[#allocation114_spill] sm:$0xff] }
 0x54e   :  { %5362 = vmatprep.subr.bf16.mxu1 %v9531_v51  ;;  %5426 = vmatprep.subr.bf16.mxu0 %v9662_v62  ;;  %v9730_v62 = vld [vmem:[#allocation53_spill] sm:$0xff] }
 0x551   :  { %5364 = vmatpush1.bf16.msra.mxu1 %v7720_v3  ;;  %5428 = vmatpush1.bf16.msra.mxu0 %v9665_v9  ;;  %v9729_v9 = vld [vmem:[#allocation113_spill] sm:$0xff] }
 0x552   :  { %5366 = vmatprep.subr.bf16.mxu1 %v7724_v44  ;;  %5430 = vmatprep.subr.bf16.mxu0 %v9666_v12  ;;  %v9728_v12 = vld [vmem:[#allocation51_spill] sm:$0xff] }
 0x555   :  { %5368 = vmatpush1.bf16.msra.mxu1 %v7740_v14  ;;  %5432 = vmatpush1.bf16.msra.mxu0 %v9669_v8  ;;  %v9727_v8 = vld [vmem:[#allocation112_spill] sm:$0xff] }
 0x556   :  { %5370 = vmatprep.subr.bf16.mxu1 %v7744_v59  ;;  %5458 = vmatprep.subr.bf16.mxu0 %v9532_v23 }
 0x558   :  { %2244 = vmatmul.mubr.f32.vlgmr.msra.gmra.mrb[8].mxu0 %v8324_v33 }
 0x559   :  { %5372 = vmatpush1.bf16.msra.mxu1 %v7760_v26  ;;  %5460 = vmatpush1.bf16.msra.mxu0 %v6958_v32 }
 0x55a   :  { %5374 = vmatprep.subr.bf16.mxu1 %v9533_v7  ;;  %5462 = vmatprep.subr.bf16.mxu0 %v9534_v42 }
 0x55d   :  { %5376 = vmatpush1.bf16.msra.mxu1 %v7780_v40  ;;  %5464 = vmatpush1.bf16.msra.mxu0 %v9708_v18 }
 0x55e   :  { %5378 = vmatprep.subr.bf16.mxu1 %v9709_v43  ;;  %5466 = vmatprep.subr.bf16.mxu0 %v9710_v36 }
 0x561   :  { %5380 = vmatpush1.bf16.msra.mxu1 %v9711_v48  ;;  %5468 = vmatpush1.bf16.msra.mxu0 %v9712_v5 }
 0x562   :  { %5382 = vmatprep.subr.bf16.mxu1 %v9713_v41  ;;  %5470 = vmatprep.subr.bf16.mxu0 %v9714_v63  ;;  %v9794_v63 = vld [vmem:[#allocation118_spill] sm:$0xff] }
 0x565   :  { %5384 = vmatpush1.bf16.msra.mxu1 %v9715_v24  ;;  %5472 = vmatpush1.bf16.msra.mxu0 %v9716_v49  ;;  %v9793_v49 = vld [vmem:[#allocation117_spill] sm:$0xff] }
 0x566   :  { %5386 = vmatprep.subr.bf16.mxu1 %v9717_v27  ;;  %5474 = vmatprep.subr.bf16.mxu0 %v9718_v29 }
 0x569   :  { %5388 = vmatpush1.bf16.msra.mxu1 %v9719_v22  ;;  %5476 = vmatpush1.bf16.msra.mxu0 %v9720_v53  ;;  %v9792_v53 = vld [vmem:[#allocation116_spill] sm:$0xff] }
 0x56a   :  { %5390 = vmatprep.subr.bf16.mxu1 %v9721_v28  ;;  %5478 = vmatprep.subr.bf16.mxu0 %v9722_v21  ;;  %v9770_v21 = vld [vmem:[#allocation48_spill] sm:$0xff] }
 0x56d   :  { %5392 = vmatpush1.bf16.msra.mxu1 %v9723_v54  ;;  %5480 = vmatpush1.bf16.msra.mxu0 %v9724_v45  ;;  %v9763_v45 = vld [vmem:[#allocation35_spill] sm:$0xff]  ;;  %v9766_v54 = vld [vmem:[#allocation40_spill] sm:$0xff] }
 0x56e   :  { %5394 = vmatprep.subr.bf16.mxu1 %v9725_v19  ;;  %5482 = vmatprep.subr.bf16.mxu0 %v9726_v30  ;;  %v9759_v30 = vld [vmem:[#allocation89_spill] sm:$0xff]  ;;  %v9762_v19 = vld [vmem:[#allocation34_spill] sm:$0xff] }
 0x571   :  { %5396 = vmatpush1.bf16.msra.mxu1 %v9727_v8  ;;  %5484 = vmatpush1.bf16.msra.mxu0 %v9728_v12  ;;  %v9753_v12 = vld [vmem:[#allocation26_spill] sm:$0xff]  ;;  %v9756_v8 = vld [vmem:[#allocation29_spill] sm:$0xff] }
 0x572   :  { %5398 = vmatprep.subr.bf16.mxu1 %v9729_v9  ;;  %5486 = vmatprep.subr.bf16.mxu0 %v9730_v62  ;;  %v9747_v62 = vld [vmem:[#allocation21_spill] sm:$0xff]  ;;  %v9750_v9 = vld [vmem:[#allocation24_spill] sm:$0xff] }
 0x575   :  { %5400 = vmatpush1.bf16.msra.mxu1 %v9731_v47  ;;  %5488 = vmatpush1.bf16.msra.mxu0 %v9732_v50  ;;  %v9743_v50 = vld [vmem:[#allocation69_spill] sm:$0xff]  ;;  %v9744_v47 = vld [vmem:[#allocation18_spill] sm:$0xff] }
 0x576   :  { %5433 = vmatprep.subr.bf16.mxu1 %v9733_v17  ;;  %5490 = vmatprep.subr.bf16.mxu0 %v9734_v6  ;;  %v9742_v6 = vld [vmem:[#allocation67_spill] sm:$0xff] }
 0x578   :  { %2152 = vmatmul.mubr.f32.vlgmr.msra.gmra.mrb[26].mxu1 %v8324_v33 }
 0x579   :  { %5435 = vmatpush3.bf16.msra.mxu1 %v9735_v31  ;;  %4266 = vmatprep.mubr.msk.f32.mxu1 %vm6617_vm2, %v9457_v13 }
 0x57a   :  { %5436 = vmatprep.subr.bf16.mxu1 %v9733_v17  ;;  %5492 = vmatpush1.bf16.msra.mxu0 %v9736_v56  ;;  %v9746_v56 = vld [vmem:[#allocation73_spill] sm:$0xff] }
 0x57b   :  { %5494 = vmatprep.subr.bf16.mxu0 %v9737_v58  ;;  %v9745_v58 = vld [vmem:[#allocation71_spill] sm:$0xff] }
 0x57d   :  { %5438 = vmatpush3.bf16.msra.mxu1 %v9738_v39 }
 0x57e   :  { %5439 = vmatprep.subr.bf16.mxu1 %v9733_v17  ;;  %5496 = vmatpush1.bf16.msra.mxu0 %v9739_v25  ;;  %v9749_v25 = vld [vmem:[#allocation77_spill] sm:$0xff] }
 0x57f   :  { %5498 = vmatprep.subr.bf16.mxu0 %v9740_v15  ;;  %v9748_v15 = vld [vmem:[#allocation75_spill] sm:$0xff] }
 0x581   :  { %5441 = vmatpush3.bf16.msra.mxu1 %v9741_v4 }
 0x582   :  { %5442 = vmatprep.subr.bf16.mxu1 %v9733_v17  ;;  %5500 = vmatpush1.bf16.msra.mxu0 %v9742_v6  ;;  %v9752_v6 = vld [vmem:[#allocation81_spill] sm:$0xff] }
 0x583   :  { %5502 = vmatprep.subr.bf16.mxu0 %v9743_v50  ;;  %v9751_v50 = vld [vmem:[#allocation79_spill] sm:$0xff] }
 0x585   :  { %5444 = vmatpush3.bf16.msra.mxu1 %v9744_v47 }
 0x586   :  { %5445 = vmatprep.subr.bf16.mxu1 %v9733_v17  ;;  %5504 = vmatpush1.bf16.msra.mxu0 %v9745_v58  ;;  %v9755_v58 = vld [vmem:[#allocation85_spill] sm:$0xff] }
 0x587   :  { %5506 = vmatprep.subr.bf16.mxu0 %v9746_v56  ;;  %v9754_v56 = vld [vmem:[#allocation83_spill] sm:$0xff] }
 0x589   :  { %5447 = vmatpush3.bf16.msra.mxu1 %v9747_v62 }
 0x58a   :  { %5448 = vmatprep.subr.bf16.mxu1 %v9733_v17  ;;  %5508 = vmatpush1.bf16.msra.mxu0 %v9748_v15  ;;  %v9757_v15 = vld [vmem:[#allocation30_spill] sm:$0xff] }
 0x58b   :  { %5510 = vmatprep.subr.bf16.mxu0 %v9749_v25  ;;  %v9758_v25 = vld [vmem:[#allocation87_spill] sm:$0xff] }
 0x58d   :  { %5450 = vmatpush3.bf16.msra.mxu1 %v9750_v9 }
 0x58e   :  { %5451 = vmatprep.subr.bf16.mxu1 %v9733_v17  ;;  %5512 = vmatpush1.bf16.msra.mxu0 %v9751_v50  ;;  %v9760_v50 = vld [vmem:[#allocation32_spill] sm:$0xff] }
 0x58f   :  { %5514 = vmatprep.subr.bf16.mxu0 %v9752_v6  ;;  %v9761_v6 = vld [vmem:[#allocation33_spill] sm:$0xff] }
 0x591   :  { %5453 = vmatpush3.bf16.msra.mxu1 %v9753_v12 }
 0x592   :  { %5454 = vmatprep.subr.bf16.mxu1 %v9733_v17  ;;  %5516 = vmatpush1.bf16.msra.mxu0 %v9754_v56  ;;  %v9764_v56 = vld [vmem:[#allocation36_spill] sm:$0xff] }
 0x593   :  { %5518 = vmatprep.subr.bf16.mxu0 %v9755_v58  ;;  %v9765_v58 = vld [vmem:[#allocation38_spill] sm:$0xff] }
 0x595   :  { %5456 = vmatpush3.bf16.msra.mxu1 %v9756_v8 }
 0x596   :  { %5522 = vmatprep.subr.bf16.mxu1 %v9757_v15  ;;  %5520 = vmatpush1.bf16.msra.mxu0 %v9758_v25  ;;  %v9767_v15 = vld [vmem:[#allocation42_spill] sm:$0xff]  ;;  %v9768_v25 = vld [vmem:[#allocation44_spill] sm:$0xff] }
 0x597   :  { %5586 = vmatprep.subr.bf16.mxu0 %v9759_v30  ;;  %v9769_v30 = vld [vmem:[#allocation46_spill] sm:$0xff] }
 0x598   :  { %4267 = vmatmul.mubr.f32.vlgmr.msra.gmra.mrb[28].mxu1 %v8324_v33 }
 0x599   :  { %5524 = vmatpush1.bf16.msra.mxu1 %v9760_v50  ;;  %v9771_v50 = vld [vmem:[#allocation50_spill] sm:$0xff] }
 0x59a   :  { %5526 = vmatprep.subr.bf16.mxu1 %v9761_v6  ;;  %v9772_v6 = vld [vmem:[#allocation52_spill] sm:$0xff] }
 0x59d   :  { %5528 = vmatpush1.bf16.msra.mxu1 %v9762_v19  ;;  %v9773_v19 = vld [vmem:[#allocation54_spill] sm:$0xff] }
 0x59e   :  { %5530 = vmatprep.subr.bf16.mxu1 %v9763_v45  ;;  %v9774_v45 = vld [vmem:[#allocation56_spill] sm:$0xff] }
 0x5a1   :  { %5532 = vmatpush1.bf16.msra.mxu1 %v9764_v56  ;;  %v9775_v56 = vld [vmem:[#allocation58_spill] sm:$0xff] }
 0x5a2   :  { %5534 = vmatprep.subr.bf16.mxu1 %v9765_v58  ;;  %v9776_v58 = vld [vmem:[#allocation60_spill] sm:$0xff] }
 0x5a5   :  { %5536 = vmatpush1.bf16.msra.mxu1 %v9766_v54  ;;  %v9777_v54 = vld [vmem:[#allocation62_spill] sm:$0xff] }
 0x5a6   :  { %5538 = vmatprep.subr.bf16.mxu1 %v9767_v15  ;;  %v9778_v15 = vld [vmem:[#allocation64_spill] sm:$0xff] }
 0x5a9   :  { %5540 = vmatpush1.bf16.msra.mxu1 %v9768_v25  ;;  %v9779_v25 = vld [vmem:[#allocation66_spill] sm:$0xff] }
 0x5aa   :  { %5542 = vmatprep.subr.bf16.mxu1 %v9769_v30  ;;  %v9780_v30 = vld [vmem:[#allocation68_spill] sm:$0xff] }
 0x5ad   :  { %5544 = vmatpush1.bf16.msra.mxu1 %v9770_v21  ;;  %v9781_v21 = vld [vmem:[#allocation70_spill] sm:$0xff] }
 0x5ae   :  { %5546 = vmatprep.subr.bf16.mxu1 %v9771_v50  ;;  %v9782_v50 = vld [vmem:[#allocation72_spill] sm:$0xff] }
 0x5b1   :  { %5548 = vmatpush1.bf16.msra.mxu1 %v9772_v6  ;;  %v9783_v6 = vld [vmem:[#allocation74_spill] sm:$0xff] }
 0x5b2   :  { %5550 = vmatprep.subr.bf16.mxu1 %v9773_v19  ;;  %v9784_v19 = vld [vmem:[#allocation76_spill] sm:$0xff] }
 0x5b5   :  { %5552 = vmatpush1.bf16.msra.mxu1 %v9774_v45  ;;  %v9785_v45 = vld [vmem:[#allocation78_spill] sm:$0xff] }
 0x5b6   :  { %5554 = vmatprep.subr.bf16.mxu1 %v9775_v56  ;;  %v9786_v56 = vld [vmem:[#allocation80_spill] sm:$0xff] }
 0x5b9   :  { %5556 = vmatpush1.bf16.msra.mxu1 %v9776_v58  ;;  %v9787_v58 = vld [vmem:[#allocation82_spill] sm:$0xff] }
 0x5ba   :  { %5558 = vmatprep.subr.bf16.mxu1 %v9777_v54  ;;  %v9788_v54 = vld [vmem:[#allocation84_spill] sm:$0xff] }
 0x5bd   :  { %5560 = vmatpush1.bf16.msra.mxu1 %v9778_v15  ;;  %v9789_v15 = vld [vmem:[#allocation86_spill] sm:$0xff] }
 0x5be   :  { %5562 = vmatprep.subr.bf16.mxu1 %v9779_v25  ;;  %v9790_v25 = vld [vmem:[#allocation88_spill] sm:$0xff] }
 0x5c1   :  { %5564 = vmatpush1.bf16.msra.mxu1 %v9780_v30  ;;  %v9791_v30 = vld [vmem:[#allocation115_spill] sm:$0xff] }
 0x5c2   :  { %5566 = vmatprep.subr.bf16.mxu1 %v9781_v21 }
 0x5c5   :  { %5568 = vmatpush1.bf16.msra.mxu1 %v9782_v50 }
 0x5c6   :  { %5570 = vmatprep.subr.bf16.mxu1 %v9783_v6 }
 0x5c9   :  { %5572 = vmatpush1.bf16.msra.mxu1 %v9784_v19 }
 0x5ca   :  { %5574 = vmatprep.subr.bf16.mxu1 %v9785_v45 }
 0x5cd   :  { %5576 = vmatpush1.bf16.msra.mxu1 %v9786_v56 }
 0x5ce   :  { %5578 = vmatprep.subr.bf16.mxu1 %v9787_v58 }
 0x5d1   :  { %5580 = vmatpush1.bf16.msra.mxu1 %v9788_v54 }
 0x5d2   :  { %5582 = vmatprep.subr.bf16.mxu1 %v9789_v15 }
 0x5d5   :  { %5584 = vmatpush1.bf16.msra.mxu1 %v9790_v25 }
 0x5d6   :  { %5681 = vmatprep.subr.bf16.mxu1 %v9733_v17 }
 0x60b   :  { %v2011_v21 = vpop.f32.mrb[24].mxu1  ;;  %v2082_v50 = vpop.f32.mrb[26].mxu0 }
 0x60c   :  { %v2012_v6 = vadd.f32 %v2011_v21, %v9791_v30  ;;  %v2013_v28 = vpop.f32.mrb[25].mxu1  ;;  %v2084_v19 = vpop.f32.mrb[27].mxu0 }
 0x60d   :  { %v2085_v45 = vadd.f32 %v2084_v19, %v9792_v53  ;;  %v2014_v24 = vadd.f32 %v2013_v28, %v9793_v49 }
 0x60f   :  { %v2158_v22 = vadd.f32 %v2085_v45, %v2012_v6  ;;  %v2083_v45 = vadd.f32 %v2082_v50, %v7994_v38 }
 0x611   :  { %v3899_v58 = vmul.f32 -1.442695, %v2158_v22 }
 0x613   :  { %6523 = vpow2.f32 %v3899_v58 }
 0x61d   :  { %v6524_v54 = vpop.eup %6523 }
 0x61e   :  { %v2162_v27 = vadd.f32 1.0, %v6524_v54 }
 0x620   :  { %6525 = vrcp.f32 %v2162_v27 }
 0x62a   :  { %v6526_v19 = vpop.eup %6525 }
 0x62b   :  { %v2245_v56 = vpop.f32.mrb[8].mxu0 }
 0x62c   :  { %v2247_v29 = vpop.f32.mrb[9].mxu0  ;;  %v6425_v25 = vadd.f32 %v2245_v56, %v9706_v16 }
 0x62d   :  { %v6426_v56 = vadd.f32 %v2247_v29, %v7573_v20 }
 0x62e   :  { %v3901_v30 = vmul.f32 -1.442695, %v6425_v25 }
 0x62f   :  { %v3902_v27 = vmul.f32 -1.442695, %v6426_v56 }
 0x630   :  { %6527 = vpow2.f32 %v3901_v30 }
 0x63a   :  { %v6528_v16 = vpop.eup %6527 }
 0x64b   :  { %v2153_v15 = vpop.f32.mrb[26].mxu1 }
 0x64c   :  { %v2154_v41 = vadd.f32 %v2153_v15, %v9794_v63  ;;  %v2155_v21 = vpop.f32.mrb[27].mxu1  ;;  %v2324_v63 = vadd.f32 1.0, %v6528_v16  ;;  %v9795_v16 = vld [vmem:[#allocation94_spill] sm:$0xff] }
 0x64d   :  { %v2156_v5 = vadd.f32 %v2155_v21, %v9616_v35 }
 0x64e   :  { %v2165_v6 = vadd.f32 %v2154_v41, %v2014_v24 }
 0x64f   :  { %v2172_v22 = vmul.f32 %v6526_v19, %v2156_v5 }
 0x650   :  { %v3900_v58 = vmul.f32 -1.442695, %v2165_v6 }
 0x651   :  { %v2173_v54 = vadd.f32 %v2172_v22, %v2083_v45 }
 0x652   :  { %6529 = vpow2.f32 %v3900_v58 }
 0x653   :  { %6531 = vpow2.f32 %v3902_v27 }
 0x65c   :  { %v6530_v28 = vpop.eup %6529 }
 0x65d   :  { %v2169_v15 = vadd.f32 1.0, %v6530_v28  ;;  %v6532_v25 = vpop.eup %6531 }
 0x65e   :  { %v2331_v24 = vadd.f32 1.0, %v6532_v25 }
 0x65f   :  { %6533 = vrcp.f32 %v2169_v15 }
 0x660   :  { %6535 = vtanh.f32 %v2173_v54 }
 0x661   :  { %6537 = vrcp.f32 %v2324_v63 }
 0x662   :  { %6539 = vrcp.f32 %v2331_v24  ;;  %v9799_v24 = vld [vmem:[#allocation106_spill] sm:$0xff] }
 0x669   :  { %v6534_v41 = vpop.eup %6533 }
 0x66a   :  { %v2175_v50 = vsub.f32 1.0, %v6534_v41  ;;  %v6536_v5 = vpop.eup %6535  ;;  %v2177_v29 = vmul.f32 %v6534_v41, %v8311_v37  ;;  %v9796_v37 = vld [vmem:[#allocation31_spill] sm:$0xff]  ;;  %v9798_v41 = vld [vmem:[#allocation37_spill] sm:$0xff] }
 0x66b   :  { %v2316_v21 = vpop.f32.mrb[28].mxu1  ;;  %v6538_v45 = vpop.eup %6537 }
 0x66c   :  { %v2334_v30 = vadd.f32 %v8319_v60, %v2316_v21  ;;  %v4268_v19 = vpop.f32.mrb[29].mxu1  ;;  %v2176_v6 = vmul.f32 %v6536_v5, %v2175_v50  ;;  %v6540_v63 = vpop.eup %6539  ;;  %v9800_v50 = vld [vmem:[#allocation39_spill] sm:$0xff]  ;;  %v9802_v21 = vld [vmem:[#allocation41_spill] sm:$0xff] }
 0x66d   :  { %v2338_v56 = vsub.f32 1.0, %v6540_v63  ;;  %v2340_v28 = vmul.f32 %v6540_v63, %v8324_v33  ;;  %v9797_v33 = vld [vmem:[#allocation105_spill] sm:$0xff]  ;;  %v9801_v5 = vld [vmem:[#allocation107_spill] sm:$0xff]  ;;  %v9811_v63 = vld [vmem:[#allocation112_spill] sm:$0xff] }
 0x66e   :  { %v2335_v22 = vmul.f32 %v6538_v45, %v2334_v30  ;;  %v8473_v58 = vadd.f32 %v2177_v29, %v2176_v6  ;;  %v9803_v30 = vld [vmem:[#allocation108_spill] sm:$0xff]  ;;  %v9804_v19 = vld [vmem:[#allocation43_spill] sm:$0xff]  ;;  %v9805_v6 = vld [vmem:[#allocation109_spill] sm:$0xff] }
 0x66f   :  { %v9806_v29 = vld [vmem:[#allocation45_spill] sm:$0xff]  ;;  %v9807_v45 = vld [vmem:[#allocation110_spill] sm:$0xff] }
 0x670   :  { %v2336_v54 = vadd.f32 %v2335_v22, %v9795_v16  ;;  %2406 = vmatprep.mubr.f32.mxu0 %v8473_v58  ;;  %2477 = vmatprep.mubr.f32.mxu1 %v8473_v58  ;;  %v9808_v22 = vld [vmem:[#allocation47_spill] sm:$0xff] }
 0x671   :  { %v9809_v16 = vld [vmem:[#allocation111_spill] sm:$0xff] }
 0x672   :  { %6541 = vtanh.f32 %v2336_v54  ;;  %v9810_v54 = vld [vmem:[#allocation49_spill] sm:$0xff] }
 0x67c   :  { %v6542_v27 = vpop.eup %6541 }
 0x67d   :  { %v2339_v15 = vmul.f32 %v6542_v27, %v2338_v56  ;;  %v9812_v56 = vld [vmem:[#allocation51_spill] sm:$0xff]  ;;  %v9813_v27 = vld [vmem:[#allocation113_spill] sm:$0xff] }
 0x67f   :  { %v8479_v25 = vadd.f32 %v2340_v28, %v2339_v15  ;;  %v9814_v28 = vld [vmem:[#allocation53_spill] sm:$0xff]  ;;  %v9815_v15 = vld [vmem:[#allocation114_spill] sm:$0xff] }
 0x681   :  { %2407 = vmatmul.mubr.f32.vlgmr.msra.gmra.mrb[28].mxu0 %v8479_v25  ;;  %2478 = vmatmul.mubr.f32.vlgmr.msra.gmra.mrb[30].mxu1 %v8479_v25 }
 0x682   :  { %5588 = vmatpush1.bf16.msra.mxu0 %v7595_v11  ;;  %5683 = vmatpush3.bf16.msra.mxu1 %v9735_v31  ;;  %v9823_v31 = vld [vmem:[#allocation5_spill] sm:$0xff] }
 0x683   :  { %2548 = vmatprep.mubr.f32.mxu0 %v8473_v58  ;;  %5590 = vmatprep.subr.bf16.mxu0 %v7599_v2 }
 0x684   :  { %5684 = vmatprep.subr.bf16.mxu1 %v9733_v17  ;;  %4301 = vmatprep.mubr.msk.f32.mxu1 %vm6617_vm2, %v9457_v13 }
 0x686   :  { %5592 = vmatpush1.bf16.msra.mxu0 %v7617_v52  ;;  %5686 = vmatpush3.bf16.msra.mxu1 %v9738_v39  ;;  %v9822_v39 = vld [vmem:[#allocation61_spill] sm:$0xff] }
 0x687   :  { %5594 = vmatprep.subr.bf16.mxu0 %v7621_v10  ;;  %5687 = vmatprep.subr.bf16.mxu1 %v9733_v17 }
 0x68a   :  { %5596 = vmatpush1.bf16.msra.mxu0 %v7640_v34  ;;  %5689 = vmatpush3.bf16.msra.mxu1 %v9741_v4  ;;  %v9821_v4 = vld [vmem:[#allocation59_spill] sm:$0xff] }
 0x68b   :  { %5598 = vmatprep.subr.bf16.mxu0 %v7644_v1  ;;  %5690 = vmatprep.subr.bf16.mxu1 %v9733_v17 }
 0x68e   :  { %5600 = vmatpush1.bf16.msra.mxu0 %v7660_v0  ;;  %5692 = vmatpush3.bf16.msra.mxu1 %v9744_v47  ;;  %v9820_v47 = vld [vmem:[#allocation4_spill] sm:$0xff] }
 0x68f   :  { %5602 = vmatprep.subr.bf16.mxu0 %v9529_v46  ;;  %5693 = vmatprep.subr.bf16.mxu1 %v9733_v17 }
 0x692   :  { %5604 = vmatpush1.bf16.msra.mxu0 %v7680_v61  ;;  %5695 = vmatpush3.bf16.msra.mxu1 %v9747_v62  ;;  %v9819_v62 = vld [vmem:[#allocation3_spill] sm:$0xff] }
 0x693   :  { %5606 = vmatprep.subr.bf16.mxu0 %v9530_v57  ;;  %5696 = vmatprep.subr.bf16.mxu1 %v9733_v17 }
 0x696   :  { %5608 = vmatpush1.bf16.msra.mxu0 %v7700_v55  ;;  %5698 = vmatpush3.bf16.msra.mxu1 %v9750_v9  ;;  %v9818_v9 = vld [vmem:[#allocation57_spill] sm:$0xff] }
 0x697   :  { %5610 = vmatprep.subr.bf16.mxu0 %v9531_v51  ;;  %5699 = vmatprep.subr.bf16.mxu1 %v9733_v17 }
 0x69a   :  { %5612 = vmatpush1.bf16.msra.mxu0 %v7720_v3  ;;  %5701 = vmatpush3.bf16.msra.mxu1 %v9753_v12  ;;  %v9817_v12 = vld [vmem:[#allocation2_spill] sm:$0xff] }
 0x69b   :  { %5614 = vmatprep.subr.bf16.mxu0 %v7724_v44  ;;  %5702 = vmatprep.subr.bf16.mxu1 %v9733_v17  ;;  %v9824_v17 = vld [vmem:[#allocation6_spill] sm:$0xff] }
 0x69e   :  { %5616 = vmatpush1.bf16.msra.mxu0 %v7740_v14  ;;  %5704 = vmatpush3.bf16.msra.mxu1 %v9756_v8  ;;  %v9816_v8 = vld [vmem:[#allocation55_spill] sm:$0xff] }
 0x69f   :  { %5618 = vmatprep.subr.bf16.mxu0 %v7744_v59  ;;  %5706 = vmatprep.subr.bf16.mxu1 %v9532_v23 }
 0x6a1   :  { %4302 = vmatmul.mubr.f32.vlgmr.msra.gmra.mrb[32].mxu1 %v8479_v25 }
 0x6a2   :  { %5620 = vmatpush1.bf16.msra.mxu0 %v7760_v26  ;;  %5708 = vmatpush1.bf16.msra.mxu1 %v6958_v32 }
 0x6a3   :  { %5622 = vmatprep.subr.bf16.mxu0 %v9533_v7  ;;  %5710 = vmatprep.subr.bf16.mxu1 %v9534_v42 }
 0x6a6   :  { %5624 = vmatpush1.bf16.msra.mxu0 %v7780_v40  ;;  %5712 = vmatpush1.bf16.msra.mxu1 %v9708_v18 }
 0x6a7   :  { %5626 = vmatprep.subr.bf16.mxu0 %v9709_v43  ;;  %5714 = vmatprep.subr.bf16.mxu1 %v9710_v36 }
 0x6aa   :  { %5628 = vmatpush1.bf16.msra.mxu0 %v9711_v48  ;;  %5716 = vmatpush1.bf16.msra.mxu1 %v9796_v37 }
 0x6ab   :  { %5630 = vmatprep.subr.bf16.mxu0 %v9797_v33  ;;  %5718 = vmatprep.subr.bf16.mxu1 %v9798_v41  ;;  %v9861_v41 = vld [vmem:[#allocation48_spill] sm:$0xff] }
 0x6ae   :  { %5632 = vmatpush1.bf16.msra.mxu0 %v9799_v24  ;;  %5720 = vmatpush1.bf16.msra.mxu1 %v9800_v50  ;;  %v9854_v50 = vld [vmem:[#allocation35_spill] sm:$0xff]  ;;  %v9857_v24 = vld [vmem:[#allocation40_spill] sm:$0xff] }
 0x6af   :  { %5634 = vmatprep.subr.bf16.mxu0 %v9801_v5  ;;  %5722 = vmatprep.subr.bf16.mxu1 %v9802_v21  ;;  %v9850_v21 = vld [vmem:[#allocation89_spill] sm:$0xff]  ;;  %v9853_v5 = vld [vmem:[#allocation34_spill] sm:$0xff] }
 0x6b2   :  { %5636 = vmatpush1.bf16.msra.mxu0 %v9803_v30  ;;  %5724 = vmatpush1.bf16.msra.mxu1 %v9804_v19  ;;  %v9846_v19 = vld [vmem:[#allocation85_spill] sm:$0xff]  ;;  %v9847_v30 = vld [vmem:[#allocation22_spill] sm:$0xff] }
 0x6b3   :  { %5638 = vmatprep.subr.bf16.mxu0 %v9805_v6  ;;  %5726 = vmatprep.subr.bf16.mxu1 %v9806_v29  ;;  %v9842_v29 = vld [vmem:[#allocation81_spill] sm:$0xff]  ;;  %v9843_v6 = vld [vmem:[#allocation19_spill] sm:$0xff] }
 0x6b6   :  { %5640 = vmatpush1.bf16.msra.mxu0 %v9807_v45  ;;  %5728 = vmatpush1.bf16.msra.mxu1 %v9808_v22  ;;  %v9838_v22 = vld [vmem:[#allocation77_spill] sm:$0xff]  ;;  %v9839_v45 = vld [vmem:[#allocation16_spill] sm:$0xff] }
 0x6b7   :  { %5642 = vmatprep.subr.bf16.mxu0 %v9809_v16  ;;  %5730 = vmatprep.subr.bf16.mxu1 %v9810_v54  ;;  %v9834_v54 = vld [vmem:[#allocation73_spill] sm:$0xff] }
 0x6b8   :  { %v9835_v16 = vld [vmem:[#allocation13_spill] sm:$0xff] }
 0x6ba   :  { %5644 = vmatpush1.bf16.msra.mxu0 %v9811_v63  ;;  %5732 = vmatpush1.bf16.msra.mxu1 %v9812_v56  ;;  %v9830_v56 = vld [vmem:[#allocation69_spill] sm:$0xff]  ;;  %v9831_v63 = vld [vmem:[#allocation10_spill] sm:$0xff] }
 0x6bb   :  { %5646 = vmatprep.subr.bf16.mxu0 %v9813_v27  ;;  %5734 = vmatprep.subr.bf16.mxu1 %v9814_v28  ;;  %v9828_v28 = vld [vmem:[#allocation8_spill] sm:$0xff]  ;;  %v9829_v27 = vld [vmem:[#allocation67_spill] sm:$0xff] }
 0x6be   :  { %5648 = vmatpush1.bf16.msra.mxu0 %v9815_v15  ;;  %5736 = vmatpush1.bf16.msra.mxu1 %v9816_v8  ;;  %v9825_v8 = vld [vmem:[#allocation63_spill] sm:$0xff]  ;;  %v9826_v15 = vld [vmem:[#allocation65_spill] sm:$0xff] }
 0x6bf   :  { %5650 = vmatprep.subr.bf16.mxu0 %v9817_v12  ;;  %5738 = vmatprep.subr.bf16.mxu1 %v9818_v9  ;;  %v9827_v9 = vld [vmem:[#allocation7_spill] sm:$0xff] }
 0x6c1   :  { %2549 = vmatmul.mubr.f32.vlgmr.msra.gmra.mrb[30].mxu0 %v8479_v25 }
 0x6c2   :  { %5652 = vmatpush1.bf16.msra.mxu0 %v9819_v62  ;;  %2640 = vmatprep.mubr.f32.mxu0 %v9457_v13 }
 0x6c3   :  { %5654 = vmatprep.subr.bf16.mxu0 %v9820_v47  ;;  %5740 = vmatpush1.bf16.msra.mxu1 %v9821_v4  ;;  %v9832_v4 = vld [vmem:[#allocation11_spill] sm:$0xff] }
 0x6c4   :  { %5742 = vmatprep.subr.bf16.mxu1 %v9822_v39  ;;  %v9833_v39 = vld [vmem:[#allocation71_spill] sm:$0xff] }
 0x6c6   :  { %5656 = vmatpush1.bf16.msra.mxu0 %v9823_v31 }
 0x6c7   :  { %5658 = vmatprep.subr.bf16.mxu0 %v9824_v17  ;;  %5744 = vmatpush1.bf16.msra.mxu1 %v9825_v8  ;;  %v9836_v8 = vld [vmem:[#allocation14_spill] sm:$0xff] }
 0x6c8   :  { %5746 = vmatprep.subr.bf16.mxu1 %v9826_v15  ;;  %v9837_v15 = vld [vmem:[#allocation75_spill] sm:$0xff] }
 0x6ca   :  { %5660 = vmatpush1.bf16.msra.mxu0 %v9827_v9 }
 0x6cb   :  { %5662 = vmatprep.subr.bf16.mxu0 %v9828_v28  ;;  %5748 = vmatpush1.bf16.msra.mxu1 %v9829_v27  ;;  %v9840_v27 = vld [vmem:[#allocation17_spill] sm:$0xff] }
 0x6cc   :  { %5750 = vmatprep.subr.bf16.mxu1 %v9830_v56  ;;  %v9841_v56 = vld [vmem:[#allocation79_spill] sm:$0xff] }
 0x6ce   :  { %5664 = vmatpush1.bf16.msra.mxu0 %v9831_v63 }
 0x6cf   :  { %5666 = vmatprep.subr.bf16.mxu0 %v9832_v4  ;;  %5752 = vmatpush1.bf16.msra.mxu1 %v9833_v39  ;;  %v9844_v39 = vld [vmem:[#allocation20_spill] sm:$0xff] }
 0x6d0   :  { %5754 = vmatprep.subr.bf16.mxu1 %v9834_v54  ;;  %v9845_v54 = vld [vmem:[#allocation83_spill] sm:$0xff] }
 0x6d2   :  { %5668 = vmatpush1.bf16.msra.mxu0 %v9835_v16 }
 0x6d3   :  { %5670 = vmatprep.subr.bf16.mxu0 %v9836_v8  ;;  %5756 = vmatpush1.bf16.msra.mxu1 %v9837_v15  ;;  %v9848_v15 = vld [vmem:[#allocation30_spill] sm:$0xff] }
 0x6d4   :  { %5758 = vmatprep.subr.bf16.mxu1 %v9838_v22  ;;  %v9849_v22 = vld [vmem:[#allocation87_spill] sm:$0xff] }
 0x6d6   :  { %5672 = vmatpush1.bf16.msra.mxu0 %v9839_v45 }
 0x6d7   :  { %5674 = vmatprep.subr.bf16.mxu0 %v9840_v27  ;;  %5760 = vmatpush1.bf16.msra.mxu1 %v9841_v56  ;;  %v9851_v56 = vld [vmem:[#allocation32_spill] sm:$0xff] }
 0x6d8   :  { %5762 = vmatprep.subr.bf16.mxu1 %v9842_v29  ;;  %v9852_v29 = vld [vmem:[#allocation33_spill] sm:$0xff] }
 0x6da   :  { %5676 = vmatpush1.bf16.msra.mxu0 %v9843_v6 }
 0x6db   :  { %5678 = vmatprep.subr.bf16.mxu0 %v9844_v39  ;;  %5764 = vmatpush1.bf16.msra.mxu1 %v9845_v54  ;;  %v9855_v54 = vld [vmem:[#allocation36_spill] sm:$0xff] }
 0x6dc   :  { %5766 = vmatprep.subr.bf16.mxu1 %v9846_v19  ;;  %v9856_v19 = vld [vmem:[#allocation38_spill] sm:$0xff] }
 0x6de   :  { %5680 = vmatpush1.bf16.msra.mxu0 %v9847_v30 }
 0x6df   :  { %5770 = vmatprep.subr.bf16.mxu0 %v9848_v15  ;;  %5768 = vmatpush1.bf16.msra.mxu1 %v9849_v22  ;;  %v9858_v15 = vld [vmem:[#allocation42_spill] sm:$0xff]  ;;  %v9859_v22 = vld [vmem:[#allocation44_spill] sm:$0xff] }
 0x6e0   :  { %5834 = vmatprep.subr.bf16.mxu1 %v9850_v21  ;;  %v9860_v21 = vld [vmem:[#allocation46_spill] sm:$0xff] }
 0x6e1   :  { %2641 = vmatmul.mubr.f32.vlgmr.msra.gmra.mrb[10].mxu0 %v8479_v25 }
 0x6e2   :  { %5772 = vmatpush1.bf16.msra.mxu0 %v9851_v56  ;;  %v9862_v56 = vld [vmem:[#allocation50_spill] sm:$0xff] }
 0x6e3   :  { %5774 = vmatprep.subr.bf16.mxu0 %v9852_v29  ;;  %v9863_v29 = vld [vmem:[#allocation52_spill] sm:$0xff] }
 0x6e6   :  { %5776 = vmatpush1.bf16.msra.mxu0 %v9853_v5  ;;  %v9864_v5 = vld [vmem:[#allocation54_spill] sm:$0xff] }
 0x6e7   :  { %5778 = vmatprep.subr.bf16.mxu0 %v9854_v50  ;;  %v9865_v50 = vld [vmem:[#allocation56_spill] sm:$0xff] }
 0x6ea   :  { %5780 = vmatpush1.bf16.msra.mxu0 %v9855_v54  ;;  %v9866_v54 = vld [vmem:[#allocation58_spill] sm:$0xff] }
 0x6eb   :  { %5782 = vmatprep.subr.bf16.mxu0 %v9856_v19  ;;  %v9867_v19 = vld [vmem:[#allocation60_spill] sm:$0xff] }
 0x6ee   :  { %5784 = vmatpush1.bf16.msra.mxu0 %v9857_v24  ;;  %v9868_v24 = vld [vmem:[#allocation62_spill] sm:$0xff] }
 0x6ef   :  { %5786 = vmatprep.subr.bf16.mxu0 %v9858_v15  ;;  %v9869_v15 = vld [vmem:[#allocation64_spill] sm:$0xff] }
 0x6f2   :  { %5788 = vmatpush1.bf16.msra.mxu0 %v9859_v22  ;;  %v9870_v22 = vld [vmem:[#allocation66_spill] sm:$0xff] }
 0x6f3   :  { %5790 = vmatprep.subr.bf16.mxu0 %v9860_v21  ;;  %v9871_v21 = vld [vmem:[#allocation68_spill] sm:$0xff] }
 0x6f6   :  { %5792 = vmatpush1.bf16.msra.mxu0 %v9861_v41  ;;  %v9872_v41 = vld [vmem:[#allocation70_spill] sm:$0xff] }
 0x6f7   :  { %5794 = vmatprep.subr.bf16.mxu0 %v9862_v56  ;;  %v9873_v56 = vld [vmem:[#allocation72_spill] sm:$0xff] }
 0x6fa   :  { %5796 = vmatpush1.bf16.msra.mxu0 %v9863_v29  ;;  %v9874_v29 = vld [vmem:[#allocation74_spill] sm:$0xff] }
 0x6fb   :  { %5798 = vmatprep.subr.bf16.mxu0 %v9864_v5  ;;  %v9875_v5 = vld [vmem:[#allocation76_spill] sm:$0xff] }
 0x6fe   :  { %5800 = vmatpush1.bf16.msra.mxu0 %v9865_v50  ;;  %v9876_v50 = vld [vmem:[#allocation78_spill] sm:$0xff] }
 0x6ff   :  { %5802 = vmatprep.subr.bf16.mxu0 %v9866_v54  ;;  %v9877_v54 = vld [vmem:[#allocation80_spill] sm:$0xff] }
 0x702   :  { %5804 = vmatpush1.bf16.msra.mxu0 %v9867_v19  ;;  %v9878_v19 = vld [vmem:[#allocation82_spill] sm:$0xff] }
 0x703   :  { %5806 = vmatprep.subr.bf16.mxu0 %v9868_v24  ;;  %v9879_v24 = vld [vmem:[#allocation84_spill] sm:$0xff] }
 0x706   :  { %5808 = vmatpush1.bf16.msra.mxu0 %v9869_v15  ;;  %v9880_v15 = vld [vmem:[#allocation86_spill] sm:$0xff] }
 0x707   :  { %5810 = vmatprep.subr.bf16.mxu0 %v9870_v22  ;;  %v9881_v22 = vld [vmem:[#allocation88_spill] sm:$0xff] }
 0x70a   :  { %5812 = vmatpush1.bf16.msra.mxu0 %v9871_v21  ;;  %v9882_v21 = vld [vmem:[#allocation115_spill] sm:$0xff] }
 0x70b   :  { %5814 = vmatprep.subr.bf16.mxu0 %v9872_v41 }
 0x70e   :  { %5816 = vmatpush1.bf16.msra.mxu0 %v9873_v56 }
 0x70f   :  { %5818 = vmatprep.subr.bf16.mxu0 %v9874_v29 }
 0x712   :  { %5820 = vmatpush1.bf16.msra.mxu0 %v9875_v5 }
 0x713   :  { %5822 = vmatprep.subr.bf16.mxu0 %v9876_v50 }
 0x716   :  { %5824 = vmatpush1.bf16.msra.mxu0 %v9877_v54 }
 0x717   :  { %5826 = vmatprep.subr.bf16.mxu0 %v9878_v19 }
 0x71a   :  { %5828 = vmatpush1.bf16.msra.mxu0 %v9879_v24 }
 0x71b   :  { %5830 = vmatprep.subr.bf16.mxu0 %v9880_v15 }
 0x71e   :  { %5832 = vmatpush1.bf16.msra.mxu0 %v9881_v22 }
 0x71f   :  { %5898 = vmatprep.subr.bf16.mxu0 %v9817_v12  ;;  %v9883_v12 = vld [vmem:[#allocation118_spill] sm:$0xff] }
 0x754   :  { %v2408_v41 = vpop.f32.mrb[28].mxu0  ;;  %v2479_v56 = vpop.f32.mrb[30].mxu1 }
 0x755   :  { %v2409_v29 = vadd.f32 %v2408_v41, %v9882_v21  ;;  %v2410_v33 = vpop.f32.mrb[29].mxu0  ;;  %v2481_v5 = vpop.f32.mrb[31].mxu1 }
 0x756   :  { %v2482_v50 = vadd.f32 %v2481_v5, %v9792_v53  ;;  %v2411_v22 = vadd.f32 %v2410_v33, %v9793_v49  ;;  %v2480_v5 = vadd.f32 %v2479_v56, %v7994_v38 }
 0x758   :  { %v2555_v37 = vadd.f32 %v2482_v50, %v2409_v29 }
 0x75a   :  { %v3903_v19 = vmul.f32 -1.442695, %v2555_v37 }
 0x75c   :  { %6543 = vpow2.f32 %v3903_v19 }
 0x766   :  { %v6544_v24 = vpop.eup %6543 }
 0x767   :  { %v2559_v36 = vadd.f32 1.0, %v6544_v24 }
 0x769   :  { %6545 = vrcp.f32 %v2559_v36 }
 0x773   :  { %v6546_v21 = vpop.eup %6545 }
 0x774   :  { %v2713_v54 = vpop.f32.mrb[32].mxu1 }
 0x775   :  { %v4303_v48 = vpop.f32.mrb[33].mxu1 }
 0x794   :  { %v2550_v15 = vpop.f32.mrb[30].mxu0 }
 0x795   :  { %v2551_v43 = vadd.f32 %v2550_v15, %v9883_v12  ;;  %v2552_v18 = vpop.f32.mrb[31].mxu0  ;;  %v9884_v15 = vld [vmem:[#allocation97_spill] sm:$0xff] }
 0x796   :  { %v2553_v41 = vadd.f32 %v2552_v18, %v9616_v35 }
 0x797   :  { %v2562_v40 = vadd.f32 %v2551_v43, %v2411_v22 }
 0x798   :  { %v2569_v50 = vmul.f32 %v6546_v21, %v2553_v41 }
 0x799   :  { %v3904_v29 = vmul.f32 -1.442695, %v2562_v40 }
 0x79a   :  { %v2570_v48 = vadd.f32 %v2569_v50, %v2480_v5 }
 0x79b   :  { %6547 = vpow2.f32 %v3904_v29  ;;  %v2731_v29 = vadd.f32 %v8319_v60, %v2713_v54  ;;  %v9886_v60 = vld [vmem:[#allocation102_spill] sm:$0xff]  ;;  %v9888_v54 = vld [vmem:[#allocation103_spill] sm:$0xff] }
 0x7a5   :  { %v6548_v37 = vpop.eup %6547 }
 0x7a6   :  { %v2566_v19 = vadd.f32 1.0, %v6548_v37 }
 0x7a8   :  { %6549 = vrcp.f32 %v2566_v19 }
 0x7a9   :  { %6551 = vtanh.f32 %v2570_v48  ;;  %v9885_v48 = vld [vmem:[#allocation93_spill] sm:$0xff] }
 0x7b2   :  { %v6550_v36 = vpop.eup %6549 }
 0x7b3   :  { %v2572_v24 = vsub.f32 1.0, %v6550_v36  ;;  %v6552_v33 = vpop.eup %6551  ;;  %v2574_v43 = vmul.f32 %v6550_v36, %v8473_v58 }
 0x7b4   :  { %v2642_v49 = vpop.f32.mrb[10].mxu0 }
 0x7b5   :  { %v6427_v12 = vadd.f32 %v2642_v49, %v9884_v15  ;;  %v2644_v53 = vpop.f32.mrb[11].mxu0  ;;  %v2573_v18 = vmul.f32 %v6552_v33, %v2572_v24 }
 0x7b6   :  { %v6428_v40 = vadd.f32 %v2644_v53, %v7573_v20 }
 0x7b7   :  { %v3905_v22 = vmul.f32 -1.442695, %v6427_v12  ;;  %v8626_v56 = vadd.f32 %v2574_v43, %v2573_v18  ;;  %v9889_v43 = vld [vmem:[#allocation28_spill] sm:$0xff] }
 0x7b8   :  { %v3906_v21 = vmul.f32 -1.442695, %v6428_v40  ;;  %v9891_v40 = vld [vmem:[#allocation31_spill] sm:$0xff] }
 0x7b9   :  { %6553 = vpow2.f32 %v3905_v22  ;;  %2803 = vmatprep.mubr.f32.mxu1 %v8626_v56  ;;  %2874 = vmatprep.mubr.f32.mxu0 %v8626_v56  ;;  %v9890_v22 = vld [vmem:[#allocation104_spill] sm:$0xff] }
 0x7ba   :  { %6555 = vpow2.f32 %v3906_v21  ;;  %v9892_v21 = vld [vmem:[#allocation105_spill] sm:$0xff] }
 0x7c3   :  { %v6554_v41 = vpop.eup %6553 }
 0x7c4   :  { %v2721_v5 = vadd.f32 1.0, %v6554_v41  ;;  %v6556_v49 = vpop.eup %6555  ;;  %v9893_v41 = vld [vmem:[#allocation37_spill] sm:$0xff] }
 0x7c5   :  { %v2728_v50 = vadd.f32 1.0, %v6556_v49  ;;  %v9895_v49 = vld [vmem:[#allocation39_spill] sm:$0xff] }
 0x7c6   :  { %6557 = vrcp.f32 %v2721_v5  ;;  %v9894_v5 = vld [vmem:[#allocation106_spill] sm:$0xff] }
 0x7c7   :  { %6559 = vrcp.f32 %v2728_v50  ;;  %v9896_v50 = vld [vmem:[#allocation107_spill] sm:$0xff] }
 0x7d0   :  { %v6558_v58 = vpop.eup %6557 }
 0x7d1   :  { %v2732_v12 = vmul.f32 %v6558_v58, %v2731_v29  ;;  %v6560_v53 = vpop.eup %6559  ;;  %v9897_v29 = vld [vmem:[#allocation41_spill] sm:$0xff]  ;;  %v9898_v58 = vld [vmem:[#allocation108_spill] sm:$0xff] }
 0x7d2   :  { %v2735_v19 = vsub.f32 1.0, %v6560_v53  ;;  %v2737_v33 = vmul.f32 %v6560_v53, %v8479_v25  ;;  %v9887_v25 = vld [vmem:[#allocation27_spill] sm:$0xff]  ;;  %v9902_v53 = vld [vmem:[#allocation110_spill] sm:$0xff] }
 0x7d3   :  { %v2733_v37 = vadd.f32 %v2732_v12, %v9885_v48  ;;  %v9899_v12 = vld [vmem:[#allocation43_spill] sm:$0xff]  ;;  %v9900_v48 = vld [vmem:[#allocation109_spill] sm:$0xff] }
 0x7d5   :  { %6561 = vtanh.f32 %v2733_v37  ;;  %v9901_v37 = vld [vmem:[#allocation45_spill] sm:$0xff] }
 0x7df   :  { %v6562_v36 = vpop.eup %6561 }
 0x7e0   :  { %v2736_v24 = vmul.f32 %v6562_v36, %v2735_v19  ;;  %v9903_v19 = vld [vmem:[#allocation47_spill] sm:$0xff] }
 0x7e1   :  { %v9904_v36 = vld [vmem:[#allocation111_spill] sm:$0xff] }
 0x7e2   :  { %v8634_v18 = vadd.f32 %v2737_v33, %v2736_v24  ;;  %v9905_v24 = vld [vmem:[#allocation49_spill] sm:$0xff]  ;;  %v9906_v33 = vld [vmem:[#allocation112_spill] sm:$0xff] }
 0x7e4   :  { %2804 = vmatmul.mubr.f32.vlgmr.msra.gmra.mrb[34].mxu1 %v8634_v18  ;;  %2875 = vmatmul.mubr.f32.vlgmr.msra.gmra.mrb[32].mxu0 %v8634_v18 }
 0x7e5   :  { %5836 = vmatpush1.bf16.msra.mxu1 %v7595_v11  ;;  %5900 = vmatpush1.bf16.msra.mxu0 %v9819_v62  ;;  %v9921_v62 = vld [vmem:[#allocation67_spill] sm:$0xff] }
 0x7e6   :  { %2945 = vmatprep.mubr.f32.mxu1 %v8626_v56  ;;  %5838 = vmatprep.subr.bf16.mxu1 %v7599_v2 }
 0x7e7   :  { %5902 = vmatprep.subr.bf16.mxu0 %v9820_v47  ;;  %3037 = vmatprep.mubr.f32.mxu0 %v9457_v13  ;;  %v9920_v47 = vld [vmem:[#allocation15_spill] sm:$0xff] }
 0x7e9   :  { %5840 = vmatpush1.bf16.msra.mxu1 %v7617_v52  ;;  %5904 = vmatpush1.bf16.msra.mxu0 %v9823_v31  ;;  %v9919_v31 = vld [vmem:[#allocation65_spill] sm:$0xff] }
 0x7ea   :  { %5842 = vmatprep.subr.bf16.mxu1 %v7621_v10  ;;  %5906 = vmatprep.subr.bf16.mxu0 %v9824_v17  ;;  %v9918_v17 = vld [vmem:[#allocation63_spill] sm:$0xff] }
 0x7ed   :  { %5844 = vmatpush1.bf16.msra.mxu1 %v7640_v34  ;;  %5908 = vmatpush1.bf16.msra.mxu0 %v9827_v9  ;;  %v9917_v9 = vld [vmem:[#allocation12_spill] sm:$0xff] }
 0x7ee   :  { %5846 = vmatprep.subr.bf16.mxu1 %v7644_v1  ;;  %5910 = vmatprep.subr.bf16.mxu0 %v9828_v28  ;;  %v9916_v28 = vld [vmem:[#allocation61_spill] sm:$0xff] }
 0x7f1   :  { %5848 = vmatpush1.bf16.msra.mxu1 %v7660_v0  ;;  %5912 = vmatpush1.bf16.msra.mxu0 %v9831_v63  ;;  %v9915_v63 = vld [vmem:[#allocation59_spill] sm:$0xff] }
 0x7f2   :  { %5850 = vmatprep.subr.bf16.mxu1 %v9529_v46  ;;  %5914 = vmatprep.subr.bf16.mxu0 %v9832_v4  ;;  %v9914_v4 = vld [vmem:[#allocation9_spill] sm:$0xff] }
 0x7f5   :  { %5852 = vmatpush1.bf16.msra.mxu1 %v7680_v61  ;;  %5916 = vmatpush1.bf16.msra.mxu0 %v9835_v16  ;;  %v9913_v16 = vld [vmem:[#allocation57_spill] sm:$0xff] }
 0x7f6   :  { %5854 = vmatprep.subr.bf16.mxu1 %v9530_v57  ;;  %5918 = vmatprep.subr.bf16.mxu0 %v9836_v8  ;;  %v9912_v8 = vmov 0.0|0.0  }
 0x7f9   :  { %5856 = vmatpush1.bf16.msra.mxu1 %v7700_v55  ;;  %5920 = vmatpush1.bf16.msra.mxu0 %v9839_v45  ;;  %v9911_v45 = vld [vmem:[#allocation55_spill] sm:$0xff] }
 0x7fa   :  { %5858 = vmatprep.subr.bf16.mxu1 %v9531_v51  ;;  %5922 = vmatprep.subr.bf16.mxu0 %v9840_v27  ;;  %v9910_v27 = vld [vmem:[#allocation114_spill] sm:$0xff] }
 0x7fd   :  { %5860 = vmatpush1.bf16.msra.mxu1 %v7720_v3  ;;  %5924 = vmatpush1.bf16.msra.mxu0 %v9843_v6  ;;  %v9909_v6 = vld [vmem:[#allocation53_spill] sm:$0xff] }
 0x7fe   :  { %5862 = vmatprep.subr.bf16.mxu1 %v7724_v44  ;;  %5926 = vmatprep.subr.bf16.mxu0 %v9844_v39  ;;  %v9908_v39 = vld [vmem:[#allocation113_spill] sm:$0xff] }
 0x801   :  { %5864 = vmatpush1.bf16.msra.mxu1 %v7740_v14  ;;  %5928 = vmatpush1.bf16.msra.mxu0 %v9847_v30  ;;  %v9907_v30 = vld [vmem:[#allocation51_spill] sm:$0xff] }
 0x802   :  { %5866 = vmatprep.subr.bf16.mxu1 %v7744_v59  ;;  %5954 = vmatprep.subr.bf16.mxu0 %v9532_v23 }
 0x804   :  { %3038 = vmatmul.mubr.f32.vlgmr.msra.gmra.mrb[12].mxu0 %v8634_v18 }
 0x805   :  { %5868 = vmatpush1.bf16.msra.mxu1 %v7760_v26  ;;  %5956 = vmatpush1.bf16.msra.mxu0 %v6958_v32 }
 0x806   :  { %5870 = vmatprep.subr.bf16.mxu1 %v9533_v7  ;;  %5958 = vmatprep.subr.bf16.mxu0 %v9534_v42 }
 0x809   :  { %5872 = vmatpush1.bf16.msra.mxu1 %v9886_v60  ;;  %5960 = vmatpush1.bf16.msra.mxu0 %v9887_v25 }
 0x80a   :  { %5874 = vmatprep.subr.bf16.mxu1 %v9888_v54  ;;  %5962 = vmatprep.subr.bf16.mxu0 %v9889_v43 }
 0x80d   :  { %5876 = vmatpush1.bf16.msra.mxu1 %v9890_v22  ;;  %5964 = vmatpush1.bf16.msra.mxu0 %v9891_v40 }
 0x80e   :  { %5878 = vmatprep.subr.bf16.mxu1 %v9892_v21  ;;  %5966 = vmatprep.subr.bf16.mxu0 %v9893_v41 }
 0x811   :  { %5880 = vmatpush1.bf16.msra.mxu1 %v9894_v5  ;;  %5968 = vmatpush1.bf16.msra.mxu0 %v9895_v49  ;;  %v9973_v5 = vld [vmem:[#allocation118_spill] sm:$0xff] }
 0x812   :  { %5882 = vmatprep.subr.bf16.mxu1 %v9896_v50  ;;  %5970 = vmatprep.subr.bf16.mxu0 %v9897_v29  ;;  %v9972_v50 = vld [vmem:[#allocation117_spill] sm:$0xff] }
 0x815   :  { %5884 = vmatpush1.bf16.msra.mxu1 %v9898_v58  ;;  %5972 = vmatpush1.bf16.msra.mxu0 %v9899_v12 }
 0x816   :  { %5886 = vmatprep.subr.bf16.mxu1 %v9900_v48  ;;  %5974 = vmatprep.subr.bf16.mxu0 %v9901_v37  ;;  %v9971_v48 = vld [vmem:[#allocation116_spill] sm:$0xff] }
 0x819   :  { %5888 = vmatpush1.bf16.msra.mxu1 %v9902_v53  ;;  %5976 = vmatpush1.bf16.msra.mxu0 %v9903_v19  ;;  %v9945_v19 = vld [vmem:[#allocation40_spill] sm:$0xff] }
 0x81a   :  { %5890 = vmatprep.subr.bf16.mxu1 %v9904_v36  ;;  %5978 = vmatprep.subr.bf16.mxu0 %v9905_v24  ;;  %v9941_v24 = vld [vmem:[#allocation34_spill] sm:$0xff]  ;;  %v9942_v36 = vld [vmem:[#allocation35_spill] sm:$0xff]  ;;  %v9949_v53 = vld [vmem:[#allocation48_spill] sm:$0xff] }
 0x81d   :  { %5892 = vmatpush1.bf16.msra.mxu1 %v9906_v33  ;;  %5980 = vmatpush1.bf16.msra.mxu0 %v9907_v30  ;;  %v9935_v30 = vld [vmem:[#allocation29_spill] sm:$0xff] }
 0x81e   :  { %5894 = vmatprep.subr.bf16.mxu1 %v9908_v39  ;;  %5982 = vmatprep.subr.bf16.mxu0 %v9909_v6  ;;  %v9929_v6 = vld [vmem:[#allocation24_spill] sm:$0xff]  ;;  %v9932_v39 = vld [vmem:[#allocation26_spill] sm:$0xff]  ;;  %v9938_v33 = vld [vmem:[#allocation89_spill] sm:$0xff] }
 0x821   :  { %5896 = vmatpush1.bf16.msra.mxu1 %v9910_v27  ;;  %5984 = vmatpush1.bf16.msra.mxu0 %v9911_v45  ;;  %v9923_v45 = vld [vmem:[#allocation18_spill] sm:$0xff]  ;;  %v9926_v27 = vld [vmem:[#allocation21_spill] sm:$0xff] }
 0x822   :  { %5929 = vmatprep.subr.bf16.mxu1 %v9912_v8  ;;  %5986 = vmatprep.subr.bf16.mxu0 %v9913_v16  ;;  %v9922_v16 = vld [vmem:[#allocation69_spill] sm:$0xff] }
 0x824   :  { %2946 = vmatmul.mubr.f32.vlgmr.msra.gmra.mrb[36].mxu1 %v8634_v18 }
 0x825   :  { %5931 = vmatpush3.bf16.msra.mxu1 %v9914_v4  ;;  %4336 = vmatprep.mubr.msk.f32.mxu1 %vm6617_vm2, %v9457_v13 }
 0x826   :  { %5932 = vmatprep.subr.bf16.mxu1 %v9912_v8  ;;  %5988 = vmatpush1.bf16.msra.mxu0 %v9915_v63  ;;  %v9925_v63 = vld [vmem:[#allocation73_spill] sm:$0xff] }
 0x827   :  { %5990 = vmatprep.subr.bf16.mxu0 %v9916_v28  ;;  %v9924_v28 = vld [vmem:[#allocation71_spill] sm:$0xff] }
 0x829   :  { %5934 = vmatpush3.bf16.msra.mxu1 %v9917_v9 }
 0x82a   :  { %5935 = vmatprep.subr.bf16.mxu1 %v9912_v8  ;;  %5992 = vmatpush1.bf16.msra.mxu0 %v9918_v17  ;;  %v9928_v17 = vld [vmem:[#allocation77_spill] sm:$0xff] }
 0x82b   :  { %5994 = vmatprep.subr.bf16.mxu0 %v9919_v31  ;;  %v9927_v31 = vld [vmem:[#allocation75_spill] sm:$0xff] }
 0x82d   :  { %5937 = vmatpush3.bf16.msra.mxu1 %v9920_v47 }
 0x82e   :  { %5938 = vmatprep.subr.bf16.mxu1 %v9912_v8  ;;  %5996 = vmatpush1.bf16.msra.mxu0 %v9921_v62  ;;  %v9931_v62 = vld [vmem:[#allocation81_spill] sm:$0xff] }
 0x82f   :  { %5998 = vmatprep.subr.bf16.mxu0 %v9922_v16  ;;  %v9930_v16 = vld [vmem:[#allocation79_spill] sm:$0xff] }
 0x831   :  { %5940 = vmatpush3.bf16.msra.mxu1 %v9923_v45 }
 0x832   :  { %5941 = vmatprep.subr.bf16.mxu1 %v9912_v8  ;;  %6000 = vmatpush1.bf16.msra.mxu0 %v9924_v28  ;;  %v9934_v28 = vld [vmem:[#allocation85_spill] sm:$0xff] }
 0x833   :  { %6002 = vmatprep.subr.bf16.mxu0 %v9925_v63  ;;  %v9933_v63 = vld [vmem:[#allocation83_spill] sm:$0xff] }
 0x835   :  { %5943 = vmatpush3.bf16.msra.mxu1 %v9926_v27 }
 0x836   :  { %5944 = vmatprep.subr.bf16.mxu1 %v9912_v8  ;;  %6004 = vmatpush1.bf16.msra.mxu0 %v9927_v31  ;;  %v9936_v31 = vld [vmem:[#allocation30_spill] sm:$0xff] }
 0x837   :  { %6006 = vmatprep.subr.bf16.mxu0 %v9928_v17  ;;  %v9937_v17 = vld [vmem:[#allocation87_spill] sm:$0xff] }
 0x839   :  { %5946 = vmatpush3.bf16.msra.mxu1 %v9929_v6 }
 0x83a   :  { %5947 = vmatprep.subr.bf16.mxu1 %v9912_v8  ;;  %6008 = vmatpush1.bf16.msra.mxu0 %v9930_v16  ;;  %v9939_v16 = vld [vmem:[#allocation32_spill] sm:$0xff] }
 0x83b   :  { %6010 = vmatprep.subr.bf16.mxu0 %v9931_v62  ;;  %v9940_v62 = vld [vmem:[#allocation33_spill] sm:$0xff] }
 0x83d   :  { %5949 = vmatpush3.bf16.msra.mxu1 %v9932_v39 }
 0x83e   :  { %5950 = vmatprep.subr.bf16.mxu1 %v9912_v8  ;;  %6012 = vmatpush1.bf16.msra.mxu0 %v9933_v63  ;;  %v9943_v63 = vld [vmem:[#allocation36_spill] sm:$0xff] }
 0x83f   :  { %6014 = vmatprep.subr.bf16.mxu0 %v9934_v28  ;;  %v9944_v28 = vld [vmem:[#allocation38_spill] sm:$0xff] }
 0x841   :  { %5952 = vmatpush3.bf16.msra.mxu1 %v9935_v30 }
 0x842   :  { %6018 = vmatprep.subr.bf16.mxu1 %v9936_v31  ;;  %6016 = vmatpush1.bf16.msra.mxu0 %v9937_v17  ;;  %v9946_v31 = vld [vmem:[#allocation42_spill] sm:$0xff]  ;;  %v9947_v17 = vld [vmem:[#allocation44_spill] sm:$0xff] }
 0x843   :  { %6082 = vmatprep.subr.bf16.mxu0 %v9938_v33  ;;  %v9948_v33 = vld [vmem:[#allocation46_spill] sm:$0xff] }
 0x844   :  { %4337 = vmatmul.mubr.f32.vlgmr.msra.gmra.mrb[38].mxu1 %v8634_v18 }
 0x845   :  { %6020 = vmatpush1.bf16.msra.mxu1 %v9939_v16  ;;  %v9950_v16 = vld [vmem:[#allocation50_spill] sm:$0xff] }
 0x846   :  { %6022 = vmatprep.subr.bf16.mxu1 %v9940_v62  ;;  %v9951_v62 = vld [vmem:[#allocation52_spill] sm:$0xff] }
 0x849   :  { %6024 = vmatpush1.bf16.msra.mxu1 %v9941_v24  ;;  %v9952_v24 = vld [vmem:[#allocation54_spill] sm:$0xff] }
 0x84a   :  { %6026 = vmatprep.subr.bf16.mxu1 %v9942_v36  ;;  %v9953_v36 = vld [vmem:[#allocation56_spill] sm:$0xff] }
 0x84d   :  { %6028 = vmatpush1.bf16.msra.mxu1 %v9943_v63  ;;  %v9954_v63 = vld [vmem:[#allocation58_spill] sm:$0xff] }
 0x84e   :  { %6030 = vmatprep.subr.bf16.mxu1 %v9944_v28  ;;  %v9955_v28 = vld [vmem:[#allocation60_spill] sm:$0xff] }
 0x851   :  { %6032 = vmatpush1.bf16.msra.mxu1 %v9945_v19  ;;  %v9956_v19 = vld [vmem:[#allocation62_spill] sm:$0xff] }
 0x852   :  { %6034 = vmatprep.subr.bf16.mxu1 %v9946_v31  ;;  %v9957_v31 = vld [vmem:[#allocation64_spill] sm:$0xff] }
 0x855   :  { %6036 = vmatpush1.bf16.msra.mxu1 %v9947_v17  ;;  %v9958_v17 = vld [vmem:[#allocation66_spill] sm:$0xff] }
 0x856   :  { %6038 = vmatprep.subr.bf16.mxu1 %v9948_v33  ;;  %v9959_v33 = vld [vmem:[#allocation68_spill] sm:$0xff] }
 0x859   :  { %6040 = vmatpush1.bf16.msra.mxu1 %v9949_v53  ;;  %v9960_v53 = vld [vmem:[#allocation70_spill] sm:$0xff] }
 0x85a   :  { %6042 = vmatprep.subr.bf16.mxu1 %v9950_v16  ;;  %v9961_v16 = vld [vmem:[#allocation72_spill] sm:$0xff] }
 0x85d   :  { %6044 = vmatpush1.bf16.msra.mxu1 %v9951_v62  ;;  %v9962_v62 = vld [vmem:[#allocation74_spill] sm:$0xff] }
 0x85e   :  { %6046 = vmatprep.subr.bf16.mxu1 %v9952_v24  ;;  %v9963_v24 = vld [vmem:[#allocation76_spill] sm:$0xff] }
 0x861   :  { %6048 = vmatpush1.bf16.msra.mxu1 %v9953_v36  ;;  %v9964_v36 = vld [vmem:[#allocation78_spill] sm:$0xff] }
 0x862   :  { %6050 = vmatprep.subr.bf16.mxu1 %v9954_v63  ;;  %v9965_v63 = vld [vmem:[#allocation80_spill] sm:$0xff] }
 0x865   :  { %6052 = vmatpush1.bf16.msra.mxu1 %v9955_v28  ;;  %v9966_v28 = vld [vmem:[#allocation82_spill] sm:$0xff] }
 0x866   :  { %6054 = vmatprep.subr.bf16.mxu1 %v9956_v19  ;;  %v9967_v19 = vld [vmem:[#allocation84_spill] sm:$0xff] }
 0x869   :  { %6056 = vmatpush1.bf16.msra.mxu1 %v9957_v31  ;;  %v9968_v31 = vld [vmem:[#allocation86_spill] sm:$0xff] }
 0x86a   :  { %6058 = vmatprep.subr.bf16.mxu1 %v9958_v17  ;;  %v9969_v17 = vld [vmem:[#allocation88_spill] sm:$0xff] }
 0x86d   :  { %6060 = vmatpush1.bf16.msra.mxu1 %v9959_v33  ;;  %v9970_v33 = vld [vmem:[#allocation115_spill] sm:$0xff] }
 0x86e   :  { %6062 = vmatprep.subr.bf16.mxu1 %v9960_v53 }
 0x871   :  { %6064 = vmatpush1.bf16.msra.mxu1 %v9961_v16 }
 0x872   :  { %6066 = vmatprep.subr.bf16.mxu1 %v9962_v62 }
 0x875   :  { %6068 = vmatpush1.bf16.msra.mxu1 %v9963_v24 }
 0x876   :  { %6070 = vmatprep.subr.bf16.mxu1 %v9964_v36 }
 0x879   :  { %6072 = vmatpush1.bf16.msra.mxu1 %v9965_v63 }
 0x87a   :  { %6074 = vmatprep.subr.bf16.mxu1 %v9966_v28 }
 0x87d   :  { %6076 = vmatpush1.bf16.msra.mxu1 %v9967_v19 }
 0x87e   :  { %6078 = vmatprep.subr.bf16.mxu1 %v9968_v31 }
 0x881   :  { %6080 = vmatpush1.bf16.msra.mxu1 %v9969_v17 }
 0x882   :  { %6177 = vmatprep.subr.bf16.mxu1 %v9912_v8 }
 0x8b7   :  { %v2805_v53 = vpop.f32.mrb[34].mxu1  ;;  %v2876_v16 = vpop.f32.mrb[32].mxu0 }
 0x8b8   :  { %v2806_v62 = vadd.f32 %v2805_v53, %v9970_v33  ;;  %v2807_v37 = vpop.f32.mrb[35].mxu1  ;;  %v2878_v24 = vpop.f32.mrb[33].mxu0 }
 0x8b9   :  { %v2879_v36 = vadd.f32 %v2878_v24, %v9971_v48  ;;  %v2808_v49 = vadd.f32 %v2807_v37, %v9972_v50 }
 0x8bb   :  { %v2952_v12 = vadd.f32 %v2879_v36, %v2806_v62  ;;  %v2877_v36 = vadd.f32 %v2876_v16, %v7994_v38 }
 0x8bd   :  { %v3907_v28 = vmul.f32 -1.442695, %v2952_v12 }
 0x8bf   :  { %6563 = vpow2.f32 %v3907_v28 }
 0x8c9   :  { %v6564_v19 = vpop.eup %6563 }
 0x8ca   :  { %v2956_v29 = vadd.f32 1.0, %v6564_v19 }
 0x8cc   :  { %6565 = vrcp.f32 %v2956_v29 }
 0x8d6   :  { %v6566_v24 = vpop.eup %6565 }
 0x8d7   :  { %v3039_v63 = vpop.f32.mrb[12].mxu0 }
 0x8d8   :  { %v3041_v58 = vpop.f32.mrb[13].mxu0  ;;  %v6429_v17 = vadd.f32 %v3039_v63, %v9884_v15 }
 0x8d9   :  { %v6430_v63 = vadd.f32 %v3041_v58, %v7573_v20 }
 0x8da   :  { %v3909_v33 = vmul.f32 -1.442695, %v6429_v17 }
 0x8db   :  { %v3910_v29 = vmul.f32 -1.442695, %v6430_v63 }
 0x8dc   :  { %6567 = vpow2.f32 %v3909_v33  ;;  %v8784_v33 = vld [vmem:[%s9057_s4] ss:$0 sm:$0xff] }
 0x8e6   :  { %v6568_v15 = vpop.eup %6567 }
 0x8f7   :  { %v2947_v31 = vpop.f32.mrb[36].mxu1 }
 0x8f8   :  { %v2948_v41 = vadd.f32 %v2947_v31, %v9973_v5  ;;  %v2949_v53 = vpop.f32.mrb[37].mxu1  ;;  %v3118_v5 = vadd.f32 1.0, %v6568_v15 }
 0x8f9   :  { %v2950_v21 = vadd.f32 %v2949_v53, %v9616_v35 }
 0x8fa   :  { %v2959_v62 = vadd.f32 %v2948_v41, %v2808_v49 }
 0x8fb   :  { %v2966_v12 = vmul.f32 %v6566_v24, %v2950_v21 }
 0x8fc   :  { %v3908_v28 = vmul.f32 -1.442695, %v2959_v62 }
 0x8fd   :  { %v2967_v19 = vadd.f32 %v2966_v12, %v2877_v36 }
 0x8fe   :  { %6569 = vpow2.f32 %v3908_v28  ;;  %v9974_v28 = vld [vmem:[#allocation96_spill] sm:$0xff] }
 0x8ff   :  { %6571 = vpow2.f32 %v3910_v29 }
 0x908   :  { %v6570_v37 = vpop.eup %6569 }
 0x909   :  { %v2963_v31 = vadd.f32 1.0, %v6570_v37  ;;  %v6572_v17 = vpop.eup %6571 }
 0x90a   :  { %v3125_v49 = vadd.f32 1.0, %v6572_v17 }
 0x90b   :  { %6573 = vrcp.f32 %v2963_v31 }
 0x90c   :  { %6575 = vtanh.f32 %v2967_v19 }
 0x90d   :  { %6577 = vrcp.f32 %v3118_v5 }
 0x90e   :  { %6579 = vrcp.f32 %v3125_v49  ;;  %v9992_v49 = vld [vmem:[#allocation53_spill] sm:$0xff] }
 0x915   :  { %v6574_v41 = vpop.eup %6573 }
 0x916   :  { %v2969_v16 = vsub.f32 1.0, %v6574_v41  ;;  %v6576_v21 = vpop.eup %6575  ;;  %v2971_v15 = vmul.f32 %v6574_v41, %v8626_v56  ;;  %v9986_v56 = vld [vmem:[#allocation47_spill] sm:$0xff]  ;;  %v9991_v41 = vld [vmem:[#allocation113_spill] sm:$0xff] }
 0x917   :  { %v3110_v53 = vpop.f32.mrb[38].mxu1  ;;  %v6578_v36 = vpop.eup %6577 }
 0x918   :  { %v3128_v58 = vadd.f32 %v8784_v33, %v3110_v53  ;;  %v4338_v24 = vpop.f32.mrb[39].mxu1  ;;  %v2970_v62 = vmul.f32 %v6576_v21, %v2969_v16  ;;  %v6580_v63 = vpop.eup %6579  ;;  %v9993_v21 = vld [vmem:[#allocation114_spill] sm:$0xff]  ;;  %v9994_v53 = vld [vmem:[#allocation55_spill] sm:$0xff] }
 0x919   :  { %v3132_v29 = vsub.f32 1.0, %v6580_v63  ;;  %v3134_v31 = vmul.f32 %v6580_v63, %v8634_v18  ;;  %v9987_v18 = vld [vmem:[#allocation111_spill] sm:$0xff]  ;;  %v9996_v24 = vld [vmem:[#allocation57_spill] sm:$0xff] }
 0x91a   :  { %v3129_v5 = vmul.f32 %v6578_v36, %v3128_v58  ;;  %v8788_v12 = vadd.f32 %v2971_v15, %v2970_v62  ;;  %v9995_v58 = vld [vmem:[#allocation2_spill] sm:$0xff]  ;;  %v9997_v62 = vld [vmem:[#allocation3_spill] sm:$0xff]  ;;  %v9998_v15 = vld [vmem:[#allocation4_spill] sm:$0xff] }
 0x91b   :  { %v9999_v36 = vld [vmem:[#allocation59_spill] sm:$0xff] }
 0x91c   :  { %v3130_v19 = vadd.f32 %v3129_v5, %v9974_v28  ;;  %3200 = vmatprep.mubr.f32.mxu0 %v8788_v12  ;;  %3271 = vmatprep.mubr.f32.mxu1 %v8788_v12  ;;  %v10000_v5 = vld [vmem:[#allocation61_spill] sm:$0xff]  ;;  %v10003_v63 = vld [vmem:[#allocation63_spill] sm:$0xff] }
 0x91d   :  { %v10001_v28 = vld [vmem:[#allocation5_spill] sm:$0xff] }
 0x91e   :  { %6581 = vtanh.f32 %v3130_v19  ;;  %v10002_v19 = vld [vmem:[#allocation6_spill] sm:$0xff] }
 0x928   :  { %v6582_v37 = vpop.eup %6581 }
 0x929   :  { %v3133_v17 = vmul.f32 %v6582_v37, %v3132_v29  ;;  %v10004_v29 = vld [vmem:[#allocation65_spill] sm:$0xff]  ;;  %v10005_v37 = vld [vmem:[#allocation7_spill] sm:$0xff] }
 0x92b   :  { %v8794_v16 = vadd.f32 %v3134_v31, %v3133_v17  ;;  %v10006_v31 = vld [vmem:[#allocation8_spill] sm:$0xff]  ;;  %v10007_v17 = vld [vmem:[#allocation67_spill] sm:$0xff] }
 0x92d   :  { %3201 = vmatmul.mubr.f32.vlgmr.msra.gmra.mrb[34].mxu0 %v8794_v16  ;;  %3272 = vmatmul.mubr.f32.vlgmr.msra.gmra.mrb[40].mxu1 %v8794_v16 }
 0x92e   :  { %6084 = vmatpush1.bf16.msra.mxu0 %v7595_v11  ;;  %6179 = vmatpush3.bf16.msra.mxu1 %v9914_v4  ;;  %v9976_v4 = vld [vmem:[#allocation37_spill] sm:$0xff] }
 0x92f   :  { %3342 = vmatprep.mubr.f32.mxu0 %v8788_v12  ;;  %6086 = vmatprep.subr.bf16.mxu0 %v7599_v2 }
 0x930   :  { %6180 = vmatprep.subr.bf16.mxu1 %v9912_v8  ;;  %4371 = vmatprep.mubr.msk.f32.mxu1 %vm6617_vm2, %v9457_v13 }
 0x932   :  { %6088 = vmatpush1.bf16.msra.mxu0 %v7617_v52  ;;  %6182 = vmatpush3.bf16.msra.mxu1 %v9917_v9  ;;  %v9980_v9 = vld [vmem:[#allocation41_spill] sm:$0xff] }
 0x933   :  { %6090 = vmatprep.subr.bf16.mxu0 %v7621_v10  ;;  %6183 = vmatprep.subr.bf16.mxu1 %v9912_v8 }
 0x936   :  { %6092 = vmatpush1.bf16.msra.mxu0 %v7640_v34  ;;  %6185 = vmatpush3.bf16.msra.mxu1 %v9920_v47  ;;  %v9981_v47 = vld [vmem:[#allocation108_spill] sm:$0xff] }
 0x937   :  { %6094 = vmatprep.subr.bf16.mxu0 %v7644_v1  ;;  %6186 = vmatprep.subr.bf16.mxu1 %v9912_v8 }
 0x93a   :  { %6096 = vmatpush1.bf16.msra.mxu0 %v7660_v0  ;;  %6188 = vmatpush3.bf16.msra.mxu1 %v9923_v45  ;;  %v9984_v45 = vld [vmem:[#allocation45_spill] sm:$0xff] }
 0x93b   :  { %6098 = vmatprep.subr.bf16.mxu0 %v9529_v46  ;;  %6189 = vmatprep.subr.bf16.mxu1 %v9912_v8 }
 0x93e   :  { %6100 = vmatpush1.bf16.msra.mxu0 %v7680_v61  ;;  %6191 = vmatpush3.bf16.msra.mxu1 %v9926_v27  ;;  %v9985_v27 = vld [vmem:[#allocation110_spill] sm:$0xff] }
 0x93f   :  { %6102 = vmatprep.subr.bf16.mxu0 %v9530_v57  ;;  %6192 = vmatprep.subr.bf16.mxu1 %v9912_v8 }
 0x942   :  { %6104 = vmatpush1.bf16.msra.mxu0 %v7700_v55  ;;  %6194 = vmatpush3.bf16.msra.mxu1 %v9929_v6  ;;  %v9983_v6 = vld [vmem:[#allocation109_spill] sm:$0xff] }
 0x943   :  { %6106 = vmatprep.subr.bf16.mxu0 %v9531_v51  ;;  %6195 = vmatprep.subr.bf16.mxu1 %v9912_v8 }
 0x946   :  { %6108 = vmatpush1.bf16.msra.mxu0 %v7720_v3  ;;  %6197 = vmatpush3.bf16.msra.mxu1 %v9932_v39  ;;  %v9975_v39 = vld [vmem:[#allocation105_spill] sm:$0xff] }
 0x947   :  { %6110 = vmatprep.subr.bf16.mxu0 %v7724_v44  ;;  %6198 = vmatprep.subr.bf16.mxu1 %v9912_v8 }
 0x94a   :  { %6112 = vmatpush1.bf16.msra.mxu0 %v7740_v14  ;;  %6200 = vmatpush3.bf16.msra.mxu1 %v9935_v30  ;;  %v9982_v30 = vld [vmem:[#allocation43_spill] sm:$0xff] }
 0x94b   :  { %6114 = vmatprep.subr.bf16.mxu0 %v7744_v59  ;;  %6202 = vmatprep.subr.bf16.mxu1 %v9532_v23  ;;  %v9978_v23 = vld [vmem:[#allocation39_spill] sm:$0xff] }
 0x94d   :  { %4372 = vmatmul.mubr.f32.vlgmr.msra.gmra.mrb[42].mxu1 %v8794_v16 }
 0x94e   :  { %6116 = vmatpush1.bf16.msra.mxu0 %v7760_v26  ;;  %6204 = vmatpush1.bf16.msra.mxu1 %v6958_v32  ;;  %v9977_v32 = vld [vmem:[#allocation106_spill] sm:$0xff] }
 0x94f   :  { %6118 = vmatprep.subr.bf16.mxu0 %v9533_v7  ;;  %6206 = vmatprep.subr.bf16.mxu1 %v9534_v42  ;;  %v9979_v42 = vld [vmem:[#allocation107_spill] sm:$0xff] }
 0x952   :  { %6120 = vmatpush1.bf16.msra.mxu0 %v9886_v60  ;;  %6208 = vmatpush1.bf16.msra.mxu1 %v9887_v25  ;;  %v9988_v25 = vld [vmem:[#allocation49_spill] sm:$0xff] }
 0x953   :  { %6122 = vmatprep.subr.bf16.mxu0 %v9888_v54  ;;  %6210 = vmatprep.subr.bf16.mxu1 %v9889_v43  ;;  %v9989_v43 = vld [vmem:[#allocation112_spill] sm:$0xff] }
 0x956   :  { %6124 = vmatpush1.bf16.msra.mxu0 %v9890_v22  ;;  %6212 = vmatpush1.bf16.msra.mxu1 %v9891_v40  ;;  %v9990_v40 = vld [vmem:[#allocation51_spill] sm:$0xff] }
 0x957   :  { %6126 = vmatprep.subr.bf16.mxu0 %v9975_v39  ;;  %6214 = vmatprep.subr.bf16.mxu1 %v9976_v4  ;;  %v10008_v4 = vld [vmem:[#allocation69_spill] sm:$0xff] }
 0x95a   :  { %6128 = vmatpush1.bf16.msra.mxu0 %v9977_v32  ;;  %6216 = vmatpush1.bf16.msra.mxu1 %v9978_v23  ;;  %v10009_v23 = vld [vmem:[#allocation10_spill] sm:$0xff] }
 0x95b   :  { %6130 = vmatprep.subr.bf16.mxu0 %v9979_v42  ;;  %6218 = vmatprep.subr.bf16.mxu1 %v9980_v9  ;;  %v10010_v9 = vld [vmem:[#allocation11_spill] sm:$0xff] }
 0x95e   :  { %6132 = vmatpush1.bf16.msra.mxu0 %v9981_v47  ;;  %6220 = vmatpush1.bf16.msra.mxu1 %v9982_v30  ;;  %v10011_v30 = vld [vmem:[#allocation71_spill] sm:$0xff] }
 0x95f   :  { %6134 = vmatprep.subr.bf16.mxu0 %v9983_v6  ;;  %6222 = vmatprep.subr.bf16.mxu1 %v9984_v45  ;;  %v10012_v45 = vld [vmem:[#allocation73_spill] sm:$0xff] }
 0x962   :  { %6136 = vmatpush1.bf16.msra.mxu0 %v9985_v27  ;;  %6224 = vmatpush1.bf16.msra.mxu1 %v9986_v56  ;;  %v10013_v56 = vld [vmem:[#allocation13_spill] sm:$0xff] }
 0x963   :  { %6138 = vmatprep.subr.bf16.mxu0 %v9987_v18  ;;  %6226 = vmatprep.subr.bf16.mxu1 %v9988_v25  ;;  %v10014_v25 = vld [vmem:[#allocation14_spill] sm:$0xff] }
 0x966   :  { %6140 = vmatpush1.bf16.msra.mxu0 %v9989_v43  ;;  %6228 = vmatpush1.bf16.msra.mxu1 %v9990_v40  ;;  %v10015_v40 = vld [vmem:[#allocation75_spill] sm:$0xff] }
 0x967   :  { %6142 = vmatprep.subr.bf16.mxu0 %v9991_v41  ;;  %6230 = vmatprep.subr.bf16.mxu1 %v9992_v49  ;;  %v10016_v49 = vld [vmem:[#allocation77_spill] sm:$0xff] }
 0x96a   :  { %6144 = vmatpush1.bf16.msra.mxu0 %v9993_v21  ;;  %6232 = vmatpush1.bf16.msra.mxu1 %v9994_v53  ;;  %v10017_v53 = vld [vmem:[#allocation16_spill] sm:$0xff] }
 0x96b   :  { %6146 = vmatprep.subr.bf16.mxu0 %v9995_v58  ;;  %6234 = vmatprep.subr.bf16.mxu1 %v9996_v24  ;;  %v10018_v58 = vld [vmem:[#allocation17_spill] sm:$0xff]  ;;  %v10019_v24 = vld [vmem:[#allocation79_spill] sm:$0xff] }
 0x96d   :  { %3343 = vmatmul.mubr.f32.vlgmr.msra.gmra.mrb[36].mxu0 %v8794_v16 }
 0x96e   :  { %6148 = vmatpush1.bf16.msra.mxu0 %v9997_v62  ;;  %3434 = vmatprep.mubr.f32.mxu0 %v9457_v13  ;;  %v10020_v62 = vld [vmem:[#allocation81_spill] sm:$0xff] }
 0x96f   :  { %6150 = vmatprep.subr.bf16.mxu0 %v9998_v15  ;;  %6236 = vmatpush1.bf16.msra.mxu1 %v9999_v36  ;;  %v10021_v15 = vld [vmem:[#allocation19_spill] sm:$0xff]  ;;  %v10022_v36 = vld [vmem:[#allocation20_spill] sm:$0xff] }
 0x970   :  { %6238 = vmatprep.subr.bf16.mxu1 %v10000_v5  ;;  %v10023_v5 = vld [vmem:[#allocation83_spill] sm:$0xff] }
 0x972   :  { %6152 = vmatpush1.bf16.msra.mxu0 %v10001_v28  ;;  %v10024_v28 = vld [vmem:[#allocation85_spill] sm:$0xff] }
 0x973   :  { %6154 = vmatprep.subr.bf16.mxu0 %v10002_v19  ;;  %6240 = vmatpush1.bf16.msra.mxu1 %v10003_v63  ;;  %v10025_v19 = vld [vmem:[#allocation22_spill] sm:$0xff] }
 0x974   :  { %6242 = vmatprep.subr.bf16.mxu1 %v10004_v29  ;;  %v10026_v63 = vld [vmem:[#allocation30_spill] sm:$0xff]  ;;  %v10027_v29 = vld [vmem:[#allocation87_spill] sm:$0xff] }
 0x976   :  { %6156 = vmatpush1.bf16.msra.mxu0 %v10005_v37  ;;  %v10028_v37 = vld [vmem:[#allocation89_spill] sm:$0xff] }
 0x977   :  { %6158 = vmatprep.subr.bf16.mxu0 %v10006_v31  ;;  %6244 = vmatpush1.bf16.msra.mxu1 %v10007_v17  ;;  %v10029_v31 = vld [vmem:[#allocation32_spill] sm:$0xff]  ;;  %v10030_v17 = vld [vmem:[#allocation33_spill] sm:$0xff] }
 0x978   :  { %6246 = vmatprep.subr.bf16.mxu1 %v10008_v4  ;;  %v10031_v4 = vld [vmem:[#allocation34_spill] sm:$0xff] }
 0x97a   :  { %6160 = vmatpush1.bf16.msra.mxu0 %v10009_v23  ;;  %v10032_v23 = vld [vmem:[#allocation35_spill] sm:$0xff] }
 0x97b   :  { %6162 = vmatprep.subr.bf16.mxu0 %v10010_v9  ;;  %6248 = vmatpush1.bf16.msra.mxu1 %v10011_v30  ;;  %v10033_v9 = vld [vmem:[#allocation36_spill] sm:$0xff]  ;;  %v10034_v30 = vld [vmem:[#allocation38_spill] sm:$0xff] }
 0x97c   :  { %6250 = vmatprep.subr.bf16.mxu1 %v10012_v45  ;;  %v10035_v45 = vld [vmem:[#allocation40_spill] sm:$0xff] }
 0x97e   :  { %6164 = vmatpush1.bf16.msra.mxu0 %v10013_v56  ;;  %v10036_v56 = vld [vmem:[#allocation42_spill] sm:$0xff] }
 0x97f   :  { %6166 = vmatprep.subr.bf16.mxu0 %v10014_v25  ;;  %6252 = vmatpush1.bf16.msra.mxu1 %v10015_v40  ;;  %v10037_v25 = vld [vmem:[#allocation44_spill] sm:$0xff]  ;;  %v10038_v40 = vld [vmem:[#allocation46_spill] sm:$0xff] }
 0x980   :  { %6254 = vmatprep.subr.bf16.mxu1 %v10016_v49  ;;  %v10039_v49 = vld [vmem:[#allocation48_spill] sm:$0xff] }
 0x982   :  { %6168 = vmatpush1.bf16.msra.mxu0 %v10017_v53  ;;  %v10040_v53 = vld [vmem:[#allocation50_spill] sm:$0xff] }
 0x983   :  { %6170 = vmatprep.subr.bf16.mxu0 %v10018_v58  ;;  %6256 = vmatpush1.bf16.msra.mxu1 %v10019_v24  ;;  %v10041_v58 = vld [vmem:[#allocation52_spill] sm:$0xff]  ;;  %v10042_v24 = vld [vmem:[#allocation54_spill] sm:$0xff] }
 0x984   :  { %6258 = vmatprep.subr.bf16.mxu1 %v10020_v62  ;;  %v10043_v62 = vld [vmem:[#allocation56_spill] sm:$0xff] }
 0x986   :  { %6172 = vmatpush1.bf16.msra.mxu0 %v10021_v15  ;;  %v10044_v15 = vld [vmem:[#allocation58_spill] sm:$0xff] }
 0x987   :  { %6174 = vmatprep.subr.bf16.mxu0 %v10022_v36  ;;  %6260 = vmatpush1.bf16.msra.mxu1 %v10023_v5  ;;  %v10045_v36 = vld [vmem:[#allocation60_spill] sm:$0xff]  ;;  %v10046_v5 = vld [vmem:[#allocation62_spill] sm:$0xff] }
 0x988   :  { %6262 = vmatprep.subr.bf16.mxu1 %v10024_v28  ;;  %v10047_v28 = vld [vmem:[#allocation64_spill] sm:$0xff] }
 0x98a   :  { %6176 = vmatpush1.bf16.msra.mxu0 %v10025_v19  ;;  %v10048_v19 = vld [vmem:[#allocation66_spill] sm:$0xff] }
 0x98b   :  { %6266 = vmatprep.subr.bf16.mxu0 %v10026_v63  ;;  %6264 = vmatpush1.bf16.msra.mxu1 %v10027_v29  ;;  %v10049_v63 = vld [vmem:[#allocation68_spill] sm:$0xff]  ;;  %v10050_v29 = vld [vmem:[#allocation70_spill] sm:$0xff] }
 0x98c   :  { %6330 = vmatprep.subr.bf16.mxu1 %v10028_v37  ;;  %v10051_v37 = vld [vmem:[#allocation72_spill] sm:$0xff] }
 0x98d   :  { %3435 = vmatmul.mubr.f32.vlgmr.msra.gmra.mrb[14].mxu0 %v8794_v16 }
 0x98e   :  { %6268 = vmatpush1.bf16.msra.mxu0 %v10029_v31  ;;  %v10052_v31 = vld [vmem:[#allocation74_spill] sm:$0xff] }
 0x98f   :  { %6270 = vmatprep.subr.bf16.mxu0 %v10030_v17  ;;  %v10053_v17 = vld [vmem:[#allocation76_spill] sm:$0xff] }
 0x992   :  { %6272 = vmatpush1.bf16.msra.mxu0 %v10031_v4  ;;  %v10054_v4 = vld [vmem:[#allocation78_spill] sm:$0xff] }
 0x993   :  { %6274 = vmatprep.subr.bf16.mxu0 %v10032_v23  ;;  %v10055_v23 = vld [vmem:[#allocation80_spill] sm:$0xff] }
 0x996   :  { %6276 = vmatpush1.bf16.msra.mxu0 %v10033_v9  ;;  %v10056_v9 = vld [vmem:[#allocation82_spill] sm:$0xff] }
 0x997   :  { %6278 = vmatprep.subr.bf16.mxu0 %v10034_v30  ;;  %v10057_v30 = vld [vmem:[#allocation84_spill] sm:$0xff] }
 0x99a   :  { %6280 = vmatpush1.bf16.msra.mxu0 %v10035_v45  ;;  %v10058_v45 = vld [vmem:[#allocation86_spill] sm:$0xff] }
 0x99b   :  { %6282 = vmatprep.subr.bf16.mxu0 %v10036_v56  ;;  %v10059_v56 = vld [vmem:[#allocation88_spill] sm:$0xff] }
 0x99e   :  { %6284 = vmatpush1.bf16.msra.mxu0 %v10037_v25 }
 0x99f   :  { %6286 = vmatprep.subr.bf16.mxu0 %v10038_v40 }
 0x9a2   :  { %6288 = vmatpush1.bf16.msra.mxu0 %v10039_v49  ;;  %v10060_v49 = vld [vmem:[#allocation115_spill] sm:$0xff] }
 0x9a3   :  { %6290 = vmatprep.subr.bf16.mxu0 %v10040_v53 }
 0x9a6   :  { %6292 = vmatpush1.bf16.msra.mxu0 %v10041_v58 }
 0x9a7   :  { %6294 = vmatprep.subr.bf16.mxu0 %v10042_v24 }
 0x9aa   :  { %6296 = vmatpush1.bf16.msra.mxu0 %v10043_v62 }
 0x9ab   :  { %6298 = vmatprep.subr.bf16.mxu0 %v10044_v15 }
 0x9ae   :  { %6300 = vmatpush1.bf16.msra.mxu0 %v10045_v36 }
 0x9af   :  { %6302 = vmatprep.subr.bf16.mxu0 %v10046_v5 }
 0x9b2   :  { %6304 = vmatpush1.bf16.msra.mxu0 %v10047_v28 }
 0x9b3   :  { %6306 = vmatprep.subr.bf16.mxu0 %v10048_v19 }
 0x9b6   :  { %6308 = vmatpush1.bf16.msra.mxu0 %v10049_v63 }
 0x9b7   :  { %6310 = vmatprep.subr.bf16.mxu0 %v10050_v29 }
 0x9ba   :  { %6312 = vmatpush1.bf16.msra.mxu0 %v10051_v37 }
 0x9bb   :  { %6314 = vmatprep.subr.bf16.mxu0 %v10052_v31  ;;  %v10061_v31 = vld [vmem:[#allocation118_spill] sm:$0xff] }
 0x9be   :  { %6316 = vmatpush1.bf16.msra.mxu0 %v10053_v17 }
 0x9bf   :  { %6318 = vmatprep.subr.bf16.mxu0 %v10054_v4 }
 0x9c2   :  { %6320 = vmatpush1.bf16.msra.mxu0 %v10055_v23 }
 0x9c3   :  { %6322 = vmatprep.subr.bf16.mxu0 %v10056_v9 }
 0x9c6   :  { %6324 = vmatpush1.bf16.msra.mxu0 %v10057_v30 }
 0x9c7   :  { %6326 = vmatprep.subr.bf16.mxu0 %v10058_v45 }
 0x9ca   :  { %6328 = vmatpush1.bf16.msra.mxu0 %v10059_v56 }
 0x9cb   :  { %6393 = vmatprep.subr.bf16.mxu0 %v9912_v8 }
 0xa00   :  { %v3202_v25 = vpop.f32.mrb[34].mxu0  ;;  %v3273_v40 = vpop.f32.mrb[40].mxu1 }
 0xa01   :  { %v3203_v53 = vadd.f32 %v3202_v25, %v10060_v49  ;;  %v3204_v58 = vpop.f32.mrb[35].mxu0  ;;  %v3275_v24 = vpop.f32.mrb[41].mxu1  ;;  %v3274_v45 = vadd.f32 %v3273_v40, %v7994_v38 }
 0xa02   :  { %v3276_v62 = vadd.f32 %v3275_v24, %v9971_v48  ;;  %v3205_v37 = vadd.f32 %v3204_v58, %v9972_v50 }
 0xa04   :  { %v3349_v15 = vadd.f32 %v3276_v62, %v3203_v53 }
 0xa06   :  { %v3911_v28 = vmul.f32 -1.442695, %v3349_v15 }
 0xa08   :  { %6583 = vpow2.f32 %v3911_v28 }
 0xa12   :  { %v6584_v19 = vpop.eup %6583 }
 0xa13   :  { %v3353_v63 = vadd.f32 1.0, %v6584_v19  ;;  %v10062_v19 = vld [vmem:[#allocation97_spill] sm:$0xff] }
 0xa15   :  { %6585 = vrcp.f32 %v3353_v63 }
 0xa1f   :  { %v6586_v9 = vpop.eup %6585 }
 0xa20   :  { %v3507_v36 = vpop.f32.mrb[42].mxu1 }
 0xa21   :  { %v4373_v5 = vpop.f32.mrb[43].mxu1 }
 0xa40   :  { %v3344_v29 = vpop.f32.mrb[36].mxu0 }
 0xa41   :  { %v3345_v17 = vadd.f32 %v3344_v29, %v10061_v31  ;;  %v3346_v4 = vpop.f32.mrb[37].mxu0 }
 0xa42   :  { %v3347_v23 = vadd.f32 %v3346_v4, %v9616_v35 }
 0xa43   :  { %v3356_v30 = vadd.f32 %v3345_v17, %v3205_v37 }
 0xa44   :  { %v3363_v56 = vmul.f32 %v6586_v9, %v3347_v23 }
 0xa45   :  { %v3912_v25 = vmul.f32 -1.442695, %v3356_v30 }
 0xa46   :  { %v3364_v53 = vadd.f32 %v3363_v56, %v3274_v45 }
 0xa47   :  { %6587 = vpow2.f32 %v3912_v25 }
 0xa51   :  { %v6588_v24 = vpop.eup %6587 }
 0xa52   :  { %v3360_v62 = vadd.f32 1.0, %v6588_v24 }
 0xa54   :  { %6589 = vrcp.f32 %v3360_v62  ;;  %v10063_v62 = vld [vmem:[#allocation95_spill] sm:$0xff] }
 0xa55   :  { %6591 = vtanh.f32 %v3364_v53  ;;  %v3525_v53 = vadd.f32 %v8784_v33, %v3507_v36  ;;  %v3782_v33 = vld [vmem:[%s9059_s7 + $0x78] sm:$0xff] }
 0xa5e   :  { %v6590_v15 = vpop.eup %6589 }
 0xa5f   :  { %v3366_v5 = vsub.f32 1.0, %v6590_v15  ;;  %v6592_v58 = vpop.eup %6591  ;;  %v3368_v37 = vmul.f32 %v6590_v15, %v8788_v12 }
 0xa60   :  { %v3436_v28 = vpop.f32.mrb[14].mxu0 }
 0xa61   :  { %v6431_v63 = vadd.f32 %v3436_v28, %v10062_v19  ;;  %v3438_v29 = vpop.f32.mrb[15].mxu0  ;;  %v3367_v4 = vmul.f32 %v6592_v58, %v3366_v5 }
 0xa62   :  { %v6432_v23 = vadd.f32 %v3438_v29, %v7573_v20 }
 0xa63   :  { %v3913_v17 = vmul.f32 -1.442695, %v6431_v63  ;;  %v8941_v40 = vadd.f32 %v3368_v37, %v3367_v4 }
 0xa64   :  { %v3914_v9 = vmul.f32 -1.442695, %v6432_v23 }
 0xa65   :  { %6593 = vpow2.f32 %v3913_v17  ;;  %3597 = vmatprep.mubr.f32.mxu1 %v8941_v40  ;;  %3668 = vmatprep.mubr.f32.mxu0 %v8941_v40 }
 0xa66   :  { %6595 = vpow2.f32 %v3914_v9 }
 0xa6f   :  { %v6594_v30 = vpop.eup %6593 }
 0xa70   :  { %v3515_v45 = vadd.f32 1.0, %v6594_v30  ;;  %v6596_v56 = vpop.eup %6595 }
 0xa71   :  { %v3522_v25 = vadd.f32 1.0, %v6596_v56 }
 0xa72   :  { %6597 = vrcp.f32 %v3515_v45 }
 0xa73   :  { %6599 = vrcp.f32 %v3522_v25 }
 0xa7c   :  { %v6598_v12 = vpop.eup %6597 }
 0xa7d   :  { %v3526_v24 = vmul.f32 %v6598_v12, %v3525_v53  ;;  %v6600_v20 = vpop.eup %6599 }
 0xa7e   :  { %v3529_v5 = vsub.f32 1.0, %v6600_v20  ;;  %v3531_v19 = vmul.f32 %v6600_v20, %v8794_v16 }
 0xa7f   :  { %v3527_v15 = vadd.f32 %v3526_v24, %v10063_v62 }
 0xa81   :  { %6601 = vtanh.f32 %v3527_v15 }
 0xa8b   :  { %v6602_v58 = vpop.eup %6601 }
 0xa8c   :  { %v3530_v28 = vmul.f32 %v6602_v58, %v3529_v5 }
 0xa8e   :  { %v3532_v63 = vadd.f32 %v3531_v19, %v3530_v28 }
 0xa90   :  { %3598 = vmatmul.mubr.f32.vlgmr.msra.gmra.mrb[44].mxu1 %v3532_v63  ;;  %3669 = vmatmul.mubr.f32.vlgmr.msra.gmra.mrb[38].mxu0 %v3532_v63 }
 0xa91   :  { %6332 = vmatpush1.bf16.msra.mxu1 %v7595_v11  ;;  %3739 = vmatprep.mubr.f32.mxu1 %v8941_v40  ;;  %v3767_v11 = vld [vmem:[%s9059_s7] sm:$0xff] }
 0xa92   :  { %6334 = vmatprep.subr.bf16.mxu1 %v7599_v2  ;;  %4406 = vmatprep.mubr.msk.f32.mxu0 %vm6617_vm2, %v9457_v13  ;;  %v3768_v2 = vld [vmem:[%s9059_s7 + $0x8] sm:$0xff]  ;;  %v3770_v13 = vld [vmem:[%s9059_s7 + $0x18] sm:$0xff] }
 0xa95   :  { %6336 = vmatpush1.bf16.msra.mxu1 %v7617_v52  ;;  %v6394_v52 = vpack.c.bf16 %v3768_v2, %v3767_v11 }
 0xa96   :  { %6338 = vmatprep.subr.bf16.mxu1 %v7621_v10  ;;  %v3769_v10 = vld [vmem:[%s9059_s7 + $0x10] sm:$0xff] }
 0xa97   :  { %6395 = vmatpush3.bf16.msra.mxu0 %v6394_v52 }
 0xa98   :  { %6396 = vmatprep.subr.bf16.mxu0 %v9912_v8 }
 0xa99   :  { %6340 = vmatpush1.bf16.msra.mxu1 %v7640_v34  ;;  %v6397_v34 = vpack.c.bf16 %v3770_v13, %v3769_v10 }
 0xa9a   :  { %6342 = vmatprep.subr.bf16.mxu1 %v7644_v1  ;;  %v3771_v1 = vld [vmem:[%s9059_s7 + $0x20] sm:$0xff] }
 0xa9b   :  { %6398 = vmatpush3.bf16.msra.mxu0 %v6397_v34 }
 0xa9c   :  { %6399 = vmatprep.subr.bf16.mxu0 %v9912_v8 }
 0xa9d   :  { %6344 = vmatpush1.bf16.msra.mxu1 %v7660_v0  ;;  %v3772_v0 = vld [vmem:[%s9059_s7 + $0x28] sm:$0xff] }
 0xa9e   :  { %6346 = vmatprep.subr.bf16.mxu1 %v9529_v46  ;;  %v3777_v46 = vld [vmem:[%s9059_s7 + $0x50] sm:$0xff] }
 0xaa1   :  { %6348 = vmatpush1.bf16.msra.mxu1 %v7680_v61  ;;  %v6400_v61 = vpack.c.bf16 %v3772_v0, %v3771_v1 }
 0xaa2   :  { %6350 = vmatprep.subr.bf16.mxu1 %v9530_v57  ;;  %v3778_v57 = vld [vmem:[%s9059_s7 + $0x58] sm:$0xff] }
 0xaa3   :  { %6401 = vmatpush3.bf16.msra.mxu0 %v6400_v61 }
 0xaa4   :  { %6402 = vmatprep.subr.bf16.mxu0 %v9912_v8 }
 0xaa5   :  { %6352 = vmatpush1.bf16.msra.mxu1 %v7700_v55  ;;  %v3773_v55 = vld [vmem:[%s9059_s7 + $0x30] sm:$0xff] }
 0xaa6   :  { %6354 = vmatprep.subr.bf16.mxu1 %v9531_v51  ;;  %v6409_v51 = vpack.c.bf16 %v3778_v57, %v3777_v46 }
 0xaa9   :  { %6356 = vmatpush1.bf16.msra.mxu1 %v7720_v3  ;;  %v3774_v3 = vld [vmem:[%s9059_s7 + $0x38] sm:$0xff] }
 0xaaa   :  { %6358 = vmatprep.subr.bf16.mxu1 %v7724_v44  ;;  %v6403_v44 = vpack.c.bf16 %v3774_v3, %v3773_v55 }
 0xaac   :  { %6404 = vmatpush3.bf16.msra.mxu0 %v6403_v44 }
 0xaad   :  { %6360 = vmatpush1.bf16.msra.mxu1 %v7740_v14  ;;  %6405 = vmatprep.subr.bf16.mxu0 %v9912_v8  ;;  %v3775_v14 = vld [vmem:[%s9059_s7 + $0x40] sm:$0xff] }
 0xaae   :  { %6362 = vmatprep.subr.bf16.mxu1 %v7744_v59  ;;  %v3776_v59 = vld [vmem:[%s9059_s7 + $0x48] sm:$0xff] }
 0xab1   :  { %6364 = vmatpush1.bf16.msra.mxu1 %v7760_v26  ;;  %v6406_v26 = vpack.c.bf16 %v3776_v59, %v3775_v14 }
 0xab2   :  { %6366 = vmatprep.subr.bf16.mxu1 %v9533_v7  ;;  %v3779_v7 = vld [vmem:[%s9059_s7 + $0x60] sm:$0xff] }
 0xab3   :  { %6407 = vmatpush3.bf16.msra.mxu0 %v6406_v26 }
 0xab4   :  { %6408 = vmatprep.subr.bf16.mxu0 %v9912_v8 }
 0xab5   :  { %6368 = vmatpush1.bf16.msra.mxu1 %v9886_v60  ;;  %v3780_v60 = vld [vmem:[%s9059_s7 + $0x68] sm:$0xff] }
 0xab6   :  { %6370 = vmatprep.subr.bf16.mxu1 %v9888_v54  ;;  %v6412_v54 = vpack.c.bf16 %v3780_v60, %v3779_v7 }
 0xab7   :  { %6410 = vmatpush3.bf16.msra.mxu0 %v6409_v51 }
 0xab8   :  { %6411 = vmatprep.subr.bf16.mxu0 %v9912_v8 }
 0xab9   :  { %6372 = vmatpush1.bf16.msra.mxu1 %v9890_v22  ;;  %v3781_v22 = vld [vmem:[%s9059_s7 + $0x70] sm:$0xff] }
 0xaba   :  { %6374 = vmatprep.subr.bf16.mxu1 %v9975_v39  ;;  %v6415_v16 = vpack.c.bf16 %v3782_v33, %v3781_v22 }
 0xabb   :  { %6413 = vmatpush3.bf16.msra.mxu0 %v6412_v54 }
 0xabc   :  { %6414 = vmatprep.subr.bf16.mxu0 %v9912_v8 }
 0xabd   :  { %6376 = vmatpush1.bf16.msra.mxu1 %v9977_v32 }
 0xabe   :  { %6378 = vmatprep.subr.bf16.mxu1 %v9979_v42 }
 0xabf   :  { %6416 = vmatpush3.bf16.msra.mxu0 %v6415_v16 }
 0xac1   :  { %6380 = vmatpush1.bf16.msra.mxu1 %v9981_v47 }
 0xac2   :  { %6382 = vmatprep.subr.bf16.mxu1 %v9983_v6 }
 0xac5   :  { %6384 = vmatpush1.bf16.msra.mxu1 %v9985_v27 }
 0xac6   :  { %6386 = vmatprep.subr.bf16.mxu1 %v9987_v18 }
 0xac9   :  { %6388 = vmatpush1.bf16.msra.mxu1 %v9989_v43 }
 0xaca   :  { %6390 = vmatprep.subr.bf16.mxu1 %v9991_v41 }
 0xacd   :  { %6392 = vmatpush1.bf16.msra.mxu1 %v9993_v21 }
 0xad0   :  { %3740 = vmatmul.mubr.f32.vlgmr.msra.gmra.mrb[46].mxu1 %v3532_v63 }
 0xb63   :  { %v3599_v39 = vpop.f32.mrb[44].mxu1  ;;  %v3670_v32 = vpop.f32.mrb[38].mxu0 }
 0xb64   :  { %v3600_v42 = vadd.f32 %v3599_v39, %v10060_v49  ;;  %v3601_v47 = vpop.f32.mrb[45].mxu1  ;;  %v3672_v6 = vpop.f32.mrb[39].mxu0  ;;  %v3671_v23 = vadd.f32 %v3670_v32, %v7994_v38  ;;  %v3917_v38 = vld [vmem:[%s9060_s8] ss:$0 sm:$0xff] }
 0xb65   :  { %v3673_v27 = vadd.f32 %v3672_v6, %v9971_v48  ;;  %v3602_v29 = vadd.f32 %v3601_v47, %v9972_v50 }
 0xb67   :  { %v3746_v18 = vadd.f32 %v3673_v27, %v3600_v42 }
 0xb69   :  { %v3915_v43 = vmul.f32 -1.442695, %v3746_v18 }
 0xb6b   :  { %6603 = vpow2.f32 %v3915_v43 }
 0xb75   :  { %v6604_v41 = vpop.eup %6603 }
 0xb76   :  { %v3750_v21 = vadd.f32 1.0, %v6604_v41 }
 0xb78   :  { %6605 = vrcp.f32 %v3750_v21 }
 0xb82   :  { %v6606_v17 = vpop.eup %6605 }
 0xba3   :  { %v3741_v36 = vpop.f32.mrb[46].mxu1 }
 0xba4   :  { %v3742_v8 = vadd.f32 %v3741_v36, %v10061_v31  ;;  %v3743_v4 = vpop.f32.mrb[47].mxu1 }
 0xba5   :  { %v3744_v37 = vadd.f32 %v3743_v4, %v9616_v35 }
 0xba6   :  { %v3753_v49 = vadd.f32 %v3742_v8, %v3602_v29 }
 0xba7   :  { %v3760_v9 = vmul.f32 %v6606_v17, %v3744_v37 }
 0xba8   :  { %v3916_v48 = vmul.f32 -1.442695, %v3753_v49 }
 0xba9   :  { %v3761_v30 = vadd.f32 %v3760_v9, %v3671_v23 }
 0xbaa   :  { %6607 = vpow2.f32 %v3916_v48 }
 0xbb4   :  { %v6608_v45 = vpop.eup %6607 }
 0xbb5   :  { %v3757_v56 = vadd.f32 1.0, %v6608_v45 }
 0xbb7   :  { %6609 = vrcp.f32 %v3757_v56 }
 0xbb8   :  { %6611 = vtanh.f32 %v3761_v30 }
 0xbc1   :  { %v6610_v25 = vpop.eup %6609 }
 0xbc2   :  { %v3763_v53 = vsub.f32 1.0, %v6610_v25  ;;  %v6612_v50 = vpop.eup %6611  ;;  %v3765_v31 = vmul.f32 %v6610_v25, %v8941_v40 }
 0xbc4   :  { %v3764_v12 = vmul.f32 %v6612_v50, %v3763_v53 }
 0xbc6   :  { %v3766_v24 = vadd.f32 %v3765_v31, %v3764_v12 }
 0xbc8   :  { %4407 = vmatmul.mubr.f32.vlgmr.msra.gmra.mrb[40].mxu0 %v3766_v24 }
 0xc9b   :  { %v3856_v35 = vpop.f32.mrb[40].mxu0 }
 0xc9c   :  { %v3857_v62 = vadd.f32 %v3917_v38, %v3856_v35  ;;  %v4408_v15 = vpop.f32.mrb[41].mxu0 }
 0xc9e   :  { %3860 = vst.msk [vmem:[%s9061_s9] sm:$0xff] %vm62_vm1, %v3857_v62 }

</bundles_post_ra>
